<compile_context>
chip_gen: v5e
topology: v5e:2x2
jax: 0.10.0
libtpu: 0.0.40
codegen_flags: <defaults>
</compile_context>

<pallas_src>
import functools

import jax
import jax.numpy as jnp
from jax.experimental import pallas as pl
from jax.experimental.pallas import tpu as pltpu

# ---------------- KAN spline configuration (static) ----------------
G = 5            # number of grid intervals
K = 3            # spline order (cubic)
N_BASIS = G + K  # 8 basis functions per channel
GRID_LO, GRID_HI = -1.0, 1.0
_H = (GRID_HI - GRID_LO) / G
# extended knot vector (Python floats -> constants inside the kernel)
GRID = [GRID_LO + (i - K) * _H for i in range(G + 2 * K + 1)]   # 12 knots

N_PACK = 3 + N_BASIS   # per-layer packed params: [bias | scale_base | scale_sp | coef]


# ---------------- device-generation tuning ----------------
def _device_kind():
  try:
    return jax.devices()[0].device_kind.lower()
  except Exception:  # pragma: no cover - e.g. uninitialized backend
    return ""


def _has_bf16_vpu():
  # v6e / v7x VALUs process packed bf16 at 2x the f32 rate; v5e (and older)
  # have no bf16 VPU, so the spline stays f32 there.
  k = _device_kind()
  return ("v6" in k) or ("v7" in k) or ("7x" in k)


def _gen_config():
  """(max pixel tile, scoped-VMEM limit in bytes) per TPU generation."""
  k = _device_kind()
  if "7" in k:                       # v7x: 64 MiB physical VMEM per TensorCore
    return 2048, 48 * 1024 * 1024
  return 4096, 64 * 1024 * 1024      # v5e / v6e: 128 MiB physical VMEM


# ---------------- kernel ----------------
def _kan_layer(pre, p_ref, spline_dtype):
  """KAN activation for one layer on a (C, T) tile.

  pre          : (C, T) f32 pre-activation (conv output WITHOUT bias)
  p_ref        : (C, 3 + N_BASIS) packed [bias | scale_base | scale_sp | coef]
  spline_dtype : dtype for the basis recursion (f32 everywhere; bf16 is a
                 ~2x VALU win on v6e/v7x at ~1e-2-level absolute error).
  """
  p = p_ref[...]
  h = pre + p[:, 0:1]                              # conv bias

  # Base branch: silu(x) = x * sigmoid(x); the tanh form keeps the
  # transcendental on the EUP slot (free next to the VALU-bound spline).
  silu = h * (0.5 * jnp.tanh(0.5 * h) + 0.5)

  # ---- spline branch: Cox-de Boor on a uniform grid, knot coordinates ----
  # u = (h - GRID[0]) / H puts knot i at u == i, so every knot difference the
  # recursion needs is just (u - const): no hoisted 12-entry diff list stays
  # live (cuts vreg pressure / spill stores).
  u = ((h - GRID[0]) * (1.0 / _H)).astype(spline_dtype)

  # Order-1 "hat" bases directly: B_i^1(u) = max(0, 1 - |u - (i+1)|).
  # Exactly equal to pushing the half-open order-0 steps through one
  # Cox-de Boor level, but without the 12 cmps / mask converts / p=1 level.
  n1 = len(GRID) - 2                               # 10 hats
  bases = [jnp.maximum(0.0, 1.0 - jnp.abs(u - float(i + 1))) for i in range(n1)]

  # p = 2 level: B_i^2 = ((u - i) * B_i^1 - (u - i - 3) * B_{i+1}^1) / 2
  bases = [0.5 * ((u - float(i)) * bases[i] - (u - float(i + 3)) * bases[i + 1])
           for i in range(n1 - 1)]                 # 9 bases

  # p = 3 level fused with the coefficient accumulation so only one order-3
  # basis is live at a time; coef-weighted accumulation stays f32.
  coef = p[:, 3:]
  spline = None
  for j in range(N_BASIS):                         # 8 bases
    bj = (1.0 / 3.0) * ((u - float(j)) * bases[j]
                        - (u - float(j + 4)) * bases[j + 1])
    term = coef[:, j:j + 1] * bj.astype(jnp.float32)
    spline = term if spline is None else spline + term

  return p[:, 1:2] * silu + p[:, 2:3] * spline


def _model_kernel(spline_dtype, x_ref,
                  w1_ref, p1_ref, w2_ref, p2_ref, w3_ref, p3_ref,
                  w4_ref, b4_ref, out_ref):
  h = x_ref[...].astype(jnp.float32)                          # (1, T)

  # ckan1: 1x1 conv with C_in = 1 is just a broadcast multiply.
  h = _kan_layer(w1_ref[...] * h, p1_ref, spline_dtype)       # (16, T)

  # ckan2 / ckan3: small (C_out, C_in) @ (C_in, T) MXU matmuls (review: the
  # MXU has large slack, leave them unpadded).
  h = _kan_layer(jnp.dot(w2_ref[...], h, preferred_element_type=jnp.float32),
                 p2_ref, spline_dtype)                        # (32, T)
  h = _kan_layer(jnp.dot(w3_ref[...], h, preferred_element_type=jnp.float32),
                 p3_ref, spline_dtype)                        # (64, T)

  # final 1x1 conv
  h = jnp.dot(w4_ref[...], h, preferred_element_type=jnp.float32) + b4_ref[...]
  out_ref[...] = h.astype(out_ref.dtype)                      # (num_classes, T)


# ---------------- tiling ----------------
def _round_up(n, m):
  return ((n + m - 1) // m) * m


def _pick_tile(hw, batch, max_tile):
  """Lane-aligned per-image pixel tile."""
  hw128 = _round_up(hw, 128)
  cap = min(max_tile, hw128)
  # Prefer the largest tile <= cap that divides the (128-rounded) per-image
  # pixel count: no padding and no output slice.  Fall back to `cap` (with
  # padding) only when the best divisor is tiny.
  divisors = [c for c in range(128, cap + 1, 128) if hw128 % c == 0]
  tile = divisors[-1] if divisors[-1] * 4 >= cap else cap
  # v7x has 2 TensorCores: aim for >= 4 total grid steps so each core gets
  # >= 2 and the DMA prologue/epilogue stays off the critical path.
  while batch * pl.cdiv(hw128, tile) < 4:
    smaller = [c for c in divisors if c < tile]
    if not smaller:
      break
    tile = smaller[-1]
  return tile


# ---------------- wrapper ----------------
@functools.partial(jax.jit, static_argnames=("num_classes", "spline_dtype"))
def ckan_segmentation_forward(x_nchw, params, num_classes=3,
                              spline_dtype=jnp.float32):
  """x_nchw: (B, 1, H, W) float32 -> (B, num_classes, H, W) float32."""
  B, Cin, H, W = x_nchw.shape
  assert Cin == 1
  HW = H * W

  max_tile, vmem_limit = _gen_config()
  tile = _pick_tile(HW, B, max_tile)
  hw_pad = pl.cdiv(HW, tile) * tile

  # C_in == 1: this reshape is free (no data movement); pixels land on the
  # 128-lane axis inside the kernel.
  x = x_nchw.reshape(B, 1, HW)
  if hw_pad != HW:
    # TODO(synk): the ragged last tile could be masked in-kernel instead of
    # padded; only hit when H*W is not a multiple of the chosen tile.
    x = jnp.pad(x, ((0, 0), (0, 0), (0, hw_pad - HW)))

  w1, p1, w2, p2, w3, p3, w4, b4 = params
  plist = (w1, p1, w2, p2, w3, p3, w4, b4)
  grid = (B, hw_pad // tile)

  def _param_spec(arr):
    # un-tiled 2-D parameter: same full block at every grid step
    return pl.BlockSpec(arr.shape, lambda b, s: (0, 0))

  out = pl.pallas_call(
      functools.partial(_model_kernel, spline_dtype),
      out_shape=jax.ShapeDtypeStruct((B, num_classes, hw_pad), jnp.float32),
      grid_spec=pltpu.PrefetchScalarGridSpec(
          num_scalar_prefetch=0,
          grid=grid,
          in_specs=[pl.BlockSpec((None, 1, tile), lambda b, s: (b, 0, s))]
                   + [_param_spec(p) for p in plist],
          out_specs=pl.BlockSpec((None, num_classes, tile),
                                 lambda b, s: (b, 0, s)),
      ),
      compiler_params=pltpu.CompilerParams(
          dimension_semantics=("parallel", "parallel"),
          vmem_limit_bytes=vmem_limit),
  )(x, *plist)

  if hw_pad != HW:
    out = out[:, :, :HW]
  # (B, C, HW) -> (B, C, H, W): free reshape; no transpose / slice on the
  # fast path (H*W a multiple of the tile), so no extra HBM round trips.
  return out.reshape(B, num_classes, H, W)


# ---------------- pure-JAX reference (correctness oracle) ----------------
def _kan_act_ref(h, sb, sp, coef):
  silu = h * (1.0 / (1.0 + jnp.exp(-h)))
  bases = [jnp.where((h >= GRID[i]) & (h < GRID[i + 1]), 1.0, 0.0)
           for i in range(len(GRID) - 1)]
  for p in range(1, K + 1):
    bases = [(h - GRID[i]) / (GRID[i + p] - GRID[i]) * bases[i]
             + (GRID[i + p + 1] - h) / (GRID[i + p + 1] - GRID[i + 1]) * bases[i + 1]
             for i in range(len(bases) - 1)]
  spline = sum(coef[:, j:j + 1] * bases[j] for j in range(N_BASIS))
  return sb * silu + sp * spline


def _forward_ref(x_nchw, params, num_classes=3):
  w1, p1, w2, p2, w3, p3, w4, b4 = params
  B, _, H, W = x_nchw.shape
  h = x_nchw.reshape(1, B * H * W)
  h = w1 * h + p1[:, 0:1]
  h = _kan_act_ref(h, p1[:, 1:2], p1[:, 2:3], p1[:, 3:])
  h = w2 @ h + p2[:, 0:1]
  h = _kan_act_ref(h, p2[:, 1:2], p2[:, 2:3], p2[:, 3:])
  h = w3 @ h + p3[:, 0:1]
  h = _kan_act_ref(h, p3[:, 1:2], p3[:, 2:3], p3[:, 3:])
  h = w4 @ h + b4
  out = h.reshape(num_classes, B, H, W)
  return jnp.transpose(out, (1, 0, 2, 3))


# ---------------- deterministic parameter construction ----------------
def make_params(key, num_classes=3):
  # Weights are stored pre-transposed as (C_out, C_in).  Per KAN layer the
  # conv bias, scale_base, scale_sp and spline coefficients are packed into a
  # single (C_out, 3 + N_BASIS) array (fewer refs / DMA descriptors).
  def conv_w(k, c_in, c_out):
    return jax.random.normal(k, (c_out, c_in), jnp.float32) * (1.0 / max(c_in, 1)) ** 0.5

  def kan_layer_params(k, c_in, c_out):
    k1, k2, k3, k4, k5 = jax.random.split(k, 5)
    w = conv_w(k1, c_in, c_out)
    b = jax.random.normal(k2, (c_out, 1), jnp.float32) * 0.01
    sb = 1.0 + 0.1 * jax.random.normal(k3, (c_out, 1), jnp.float32)
    sp = 1.0 + 0.1 * jax.random.normal(k4, (c_out, 1), jnp.float32)
    coef = 0.1 * jax.random.normal(k5, (c_out, N_BASIS), jnp.float32)
    packed = jnp.concatenate([b, sb, sp, coef], axis=1)   # (c_out, N_PACK)
    return w, packed

  keys = jax.random.split(key, 4)
  w1, p1 = kan_layer_params(keys[0], 1, 16)
  w2, p2 = kan_layer_params(keys[1], 16, 32)
  w3, p3 = kan_layer_params(keys[2], 32, 64)
  k1, k2 = jax.random.split(keys[3])
  w4 = conv_w(k1, 64, num_classes)
  b4 = jax.random.normal(k2, (num_classes, 1), jnp.float32) * 0.01
  return (w1, p1, w2, p2, w3, p3, w4, b4)


if __name__ == "__main__":
  key = jax.random.PRNGKey(0)
  kx, kp = jax.random.split(key)

  B, H, W = 2, 16, 16
  num_classes = 3
  x = jax.random.normal(kx, (B, 1, H, W), jnp.float32)   # NCHW, like PyTorch
  params = make_params(kp, num_classes)

  # Default (f32 spline) path: reference-exact on every TPU generation.
  out = ckan_segmentation_forward(x, params, num_classes=num_classes)
  out = jax.block_until_ready(out)

  ref = _forward_ref(x, params, num_classes=num_classes)
  assert out.shape == (B, num_classes, H, W), out.shape
  assert jnp.allclose(out, ref, atol=2e-3, rtol=2e-3), \
      float(jnp.max(jnp.abs(out - ref)))

  # bf16 spline-basis path (v6e / v7x only): ~2x on the VALU-bound spline
  # math.  Loose sanity check only; exactness is covered by the f32 path.
  if _has_bf16_vpu():
    out_bf16 = ckan_segmentation_forward(x, params, num_classes=num_classes,
                                         spline_dtype=jnp.bfloat16)
    out_bf16 = jax.block_until_ready(out_bf16)
    assert jnp.allclose(out_bf16, ref, atol=1e-1, rtol=1e-1), \
        float(jnp.max(jnp.abs(out_bf16 - ref)))

  print("KERNEL_OK")
</pallas_src>

<mosaic_0001>
module attributes {stable_mosaic.version = 11 : i64} {
  func.func @_model_kernel(%arg0: i32, %arg1: i32, %arg2: memref<1x1x128xf32, #tpu.memory_space<vmem>>, %arg3: memref<16x1xf32, #tpu.memory_space<vmem>>, %arg4: memref<16x11xf32, #tpu.memory_space<vmem>>, %arg5: memref<32x16xf32, #tpu.memory_space<vmem>>, %arg6: memref<32x11xf32, #tpu.memory_space<vmem>>, %arg7: memref<64x32xf32, #tpu.memory_space<vmem>>, %arg8: memref<64x11xf32, #tpu.memory_space<vmem>>, %arg9: memref<3x64xf32, #tpu.memory_space<vmem>>, %arg10: memref<3x1xf32, #tpu.memory_space<vmem>>, %arg11: memref<1x3x128xf32, #tpu.memory_space<vmem>>) attributes {dimension_semantics = [#tpu.dimension_semantics<parallel>, #tpu.dimension_semantics<parallel>], iteration_bounds = array<i64: 2, 2>, scalar_prefetch = 0 : i64, scratch_operands = 0 : i64, tpu.core_type = #tpu.core_type<tc>, window_params = [{transform_indices = @transform_0, window_bounds = array<i64: 1, 1, 128>}, {pipeline_mode = #tpu.pipeline_mode<synchronous>, transform_indices = @transform_1, window_bounds = array<i64: 16, 1>}, {pipeline_mode = #tpu.pipeline_mode<synchronous>, transform_indices = @transform_2, window_bounds = array<i64: 16, 11>}, {pipeline_mode = #tpu.pipeline_mode<synchronous>, transform_indices = @transform_3, window_bounds = array<i64: 32, 16>}, {pipeline_mode = #tpu.pipeline_mode<synchronous>, transform_indices = @transform_4, window_bounds = array<i64: 32, 11>}, {pipeline_mode = #tpu.pipeline_mode<synchronous>, transform_indices = @transform_5, window_bounds = array<i64: 64, 32>}, {pipeline_mode = #tpu.pipeline_mode<synchronous>, transform_indices = @transform_6, window_bounds = array<i64: 64, 11>}, {pipeline_mode = #tpu.pipeline_mode<synchronous>, transform_indices = @transform_7, window_bounds = array<i64: 3, 64>}, {pipeline_mode = #tpu.pipeline_mode<synchronous>, transform_indices = @transform_8, window_bounds = array<i64: 3, 1>}, {transform_indices = @transform_9, window_bounds = array<i64: 1, 3, 128>}]} {
    %c0 = arith.constant 0 : index
    %c0_0 = arith.constant 0 : index
    %c0_1 = arith.constant 0 : index
    %0 = vector.load %arg2[%c0, %c0_0, %c0_1] : memref<1x1x128xf32, #tpu.memory_space<vmem>>, vector<1x1x128xf32>
    %1 = vector.shape_cast %0 : vector<1x1x128xf32> to vector<1x128xf32>
    %c0_2 = arith.constant 0 : index
    %c0_3 = arith.constant 0 : index
    %2 = vector.load %arg3[%c0_2, %c0_3] : memref<16x1xf32, #tpu.memory_space<vmem>>, vector<16x1xf32>
    %3 = vector.broadcast %2 : vector<16x1xf32> to vector<16x128xf32>
    %4 = vector.broadcast %1 : vector<1x128xf32> to vector<16x128xf32>
    %5 = arith.mulf %3, %4 : vector<16x128xf32>
    %c0_4 = arith.constant 0 : index
    %c0_5 = arith.constant 0 : index
    %6 = vector.load %arg4[%c0_4, %c0_5] : memref<16x11xf32, #tpu.memory_space<vmem>>, vector<16x11xf32>
    %7 = vector.extract_strided_slice %6 {offsets = [0, 0], sizes = [16, 1], strides = [1, 1]} : vector<16x11xf32> to vector<16x1xf32>
    %8 = vector.broadcast %7 : vector<16x1xf32> to vector<16x128xf32>
    %9 = arith.addf %5, %8 : vector<16x128xf32>
    %cst = arith.constant 5.000000e-01 : f32
    %10 = vector.broadcast %cst : f32 to vector<16x128xf32>
    %11 = arith.mulf %10, %9 : vector<16x128xf32>
    %12 = math.tanh %11 : vector<16x128xf32>
    %cst_6 = arith.constant 5.000000e-01 : f32
    %13 = vector.broadcast %cst_6 : f32 to vector<16x128xf32>
    %14 = arith.mulf %13, %12 : vector<16x128xf32>
    %cst_7 = arith.constant 5.000000e-01 : f32
    %15 = vector.broadcast %cst_7 : f32 to vector<16x128xf32>
    %16 = arith.addf %14, %15 : vector<16x128xf32>
    %17 = arith.mulf %9, %16 : vector<16x128xf32>
    %cst_8 = arith.constant -2.200000e+00 : f32
    %18 = vector.broadcast %cst_8 : f32 to vector<16x128xf32>
    %19 = arith.subf %9, %18 : vector<16x128xf32>
    %cst_9 = arith.constant 2.500000e+00 : f32
    %20 = vector.broadcast %cst_9 : f32 to vector<16x128xf32>
    %21 = arith.mulf %19, %20 : vector<16x128xf32>
    %cst_10 = arith.constant 1.000000e+00 : f32
    %22 = vector.broadcast %cst_10 : f32 to vector<16x128xf32>
    %23 = arith.subf %21, %22 : vector<16x128xf32>
    %24 = math.absf %23 : vector<16x128xf32>
    %cst_11 = arith.constant 1.000000e+00 : f32
    %25 = vector.broadcast %cst_11 : f32 to vector<16x128xf32>
    %26 = arith.subf %25, %24 : vector<16x128xf32>
    %cst_12 = arith.constant 0.000000e+00 : f32
    %27 = vector.broadcast %cst_12 : f32 to vector<16x128xf32>
    %28 = arith.maximumf %27, %26 : vector<16x128xf32>
    %cst_13 = arith.constant 2.000000e+00 : f32
    %29 = vector.broadcast %cst_13 : f32 to vector<16x128xf32>
    %30 = arith.subf %21, %29 : vector<16x128xf32>
    %31 = math.absf %30 : vector<16x128xf32>
    %cst_14 = arith.constant 1.000000e+00 : f32
    %32 = vector.broadcast %cst_14 : f32 to vector<16x128xf32>
    %33 = arith.subf %32, %31 : vector<16x128xf32>
    %cst_15 = arith.constant 0.000000e+00 : f32
    %34 = vector.broadcast %cst_15 : f32 to vector<16x128xf32>
    %35 = arith.maximumf %34, %33 : vector<16x128xf32>
    %cst_16 = arith.constant 3.000000e+00 : f32
    %36 = vector.broadcast %cst_16 : f32 to vector<16x128xf32>
    %37 = arith.subf %21, %36 : vector<16x128xf32>
    %38 = math.absf %37 : vector<16x128xf32>
    %cst_17 = arith.constant 1.000000e+00 : f32
    %39 = vector.broadcast %cst_17 : f32 to vector<16x128xf32>
    %40 = arith.subf %39, %38 : vector<16x128xf32>
    %cst_18 = arith.constant 0.000000e+00 : f32
    %41 = vector.broadcast %cst_18 : f32 to vector<16x128xf32>
    %42 = arith.maximumf %41, %40 : vector<16x128xf32>
    %cst_19 = arith.constant 4.000000e+00 : f32
    %43 = vector.broadcast %cst_19 : f32 to vector<16x128xf32>
    %44 = arith.subf %21, %43 : vector<16x128xf32>
    %45 = math.absf %44 : vector<16x128xf32>
    %cst_20 = arith.constant 1.000000e+00 : f32
    %46 = vector.broadcast %cst_20 : f32 to vector<16x128xf32>
    %47 = arith.subf %46, %45 : vector<16x128xf32>
    %cst_21 = arith.constant 0.000000e+00 : f32
    %48 = vector.broadcast %cst_21 : f32 to vector<16x128xf32>
    %49 = arith.maximumf %48, %47 : vector<16x128xf32>
    %cst_22 = arith.constant 5.000000e+00 : f32
    %50 = vector.broadcast %cst_22 : f32 to vector<16x128xf32>
    %51 = arith.subf %21, %50 : vector<16x128xf32>
    %52 = math.absf %51 : vector<16x128xf32>
    %cst_23 = arith.constant 1.000000e+00 : f32
    %53 = vector.broadcast %cst_23 : f32 to vector<16x128xf32>
    %54 = arith.subf %53, %52 : vector<16x128xf32>
    %cst_24 = arith.constant 0.000000e+00 : f32
    %55 = vector.broadcast %cst_24 : f32 to vector<16x128xf32>
    %56 = arith.maximumf %55, %54 : vector<16x128xf32>
    %cst_25 = arith.constant 6.000000e+00 : f32
    %57 = vector.broadcast %cst_25 : f32 to vector<16x128xf32>
    %58 = arith.subf %21, %57 : vector<16x128xf32>
    %59 = math.absf %58 : vector<16x128xf32>
    %cst_26 = arith.constant 1.000000e+00 : f32
    %60 = vector.broadcast %cst_26 : f32 to vector<16x128xf32>
    %61 = arith.subf %60, %59 : vector<16x128xf32>
    %cst_27 = arith.constant 0.000000e+00 : f32
    %62 = vector.broadcast %cst_27 : f32 to vector<16x128xf32>
    %63 = arith.maximumf %62, %61 : vector<16x128xf32>
    %cst_28 = arith.constant 7.000000e+00 : f32
    %64 = vector.broadcast %cst_28 : f32 to vector<16x128xf32>
    %65 = arith.subf %21, %64 : vector<16x128xf32>
    %66 = math.absf %65 : vector<16x128xf32>
    %cst_29 = arith.constant 1.000000e+00 : f32
    %67 = vector.broadcast %cst_29 : f32 to vector<16x128xf32>
    %68 = arith.subf %67, %66 : vector<16x128xf32>
    %cst_30 = arith.constant 0.000000e+00 : f32
    %69 = vector.broadcast %cst_30 : f32 to vector<16x128xf32>
    %70 = arith.maximumf %69, %68 : vector<16x128xf32>
    %cst_31 = arith.constant 8.000000e+00 : f32
    %71 = vector.broadcast %cst_31 : f32 to vector<16x128xf32>
    %72 = arith.subf %21, %71 : vector<16x128xf32>
    %73 = math.absf %72 : vector<16x128xf32>
    %cst_32 = arith.constant 1.000000e+00 : f32
    %74 = vector.broadcast %cst_32 : f32 to vector<16x128xf32>
    %75 = arith.subf %74, %73 : vector<16x128xf32>
    %cst_33 = arith.constant 0.000000e+00 : f32
    %76 = vector.broadcast %cst_33 : f32 to vector<16x128xf32>
    %77 = arith.maximumf %76, %75 : vector<16x128xf32>
    %cst_34 = arith.constant 9.000000e+00 : f32
    %78 = vector.broadcast %cst_34 : f32 to vector<16x128xf32>
    %79 = arith.subf %21, %78 : vector<16x128xf32>
    %80 = math.absf %79 : vector<16x128xf32>
    %cst_35 = arith.constant 1.000000e+00 : f32
    %81 = vector.broadcast %cst_35 : f32 to vector<16x128xf32>
    %82 = arith.subf %81, %80 : vector<16x128xf32>
    %cst_36 = arith.constant 0.000000e+00 : f32
    %83 = vector.broadcast %cst_36 : f32 to vector<16x128xf32>
    %84 = arith.maximumf %83, %82 : vector<16x128xf32>
    %cst_37 = arith.constant 1.000000e+01 : f32
    %85 = vector.broadcast %cst_37 : f32 to vector<16x128xf32>
    %86 = arith.subf %21, %85 : vector<16x128xf32>
    %87 = math.absf %86 : vector<16x128xf32>
    %cst_38 = arith.constant 1.000000e+00 : f32
    %88 = vector.broadcast %cst_38 : f32 to vector<16x128xf32>
    %89 = arith.subf %88, %87 : vector<16x128xf32>
    %cst_39 = arith.constant 0.000000e+00 : f32
    %90 = vector.broadcast %cst_39 : f32 to vector<16x128xf32>
    %91 = arith.maximumf %90, %89 : vector<16x128xf32>
    %cst_40 = arith.constant 0.000000e+00 : f32
    %92 = vector.broadcast %cst_40 : f32 to vector<16x128xf32>
    %93 = arith.subf %21, %92 : vector<16x128xf32>
    %94 = arith.mulf %93, %28 : vector<16x128xf32>
    %cst_41 = arith.constant 3.000000e+00 : f32
    %95 = vector.broadcast %cst_41 : f32 to vector<16x128xf32>
    %96 = arith.subf %21, %95 : vector<16x128xf32>
    %97 = arith.mulf %96, %35 : vector<16x128xf32>
    %98 = arith.subf %94, %97 : vector<16x128xf32>
    %cst_42 = arith.constant 5.000000e-01 : f32
    %99 = vector.broadcast %cst_42 : f32 to vector<16x128xf32>
    %100 = arith.mulf %99, %98 : vector<16x128xf32>
    %cst_43 = arith.constant 1.000000e+00 : f32
    %101 = vector.broadcast %cst_43 : f32 to vector<16x128xf32>
    %102 = arith.subf %21, %101 : vector<16x128xf32>
    %103 = arith.mulf %102, %35 : vector<16x128xf32>
    %cst_44 = arith.constant 4.000000e+00 : f32
    %104 = vector.broadcast %cst_44 : f32 to vector<16x128xf32>
    %105 = arith.subf %21, %104 : vector<16x128xf32>
    %106 = arith.mulf %105, %42 : vector<16x128xf32>
    %107 = arith.subf %103, %106 : vector<16x128xf32>
    %cst_45 = arith.constant 5.000000e-01 : f32
    %108 = vector.broadcast %cst_45 : f32 to vector<16x128xf32>
    %109 = arith.mulf %108, %107 : vector<16x128xf32>
    %cst_46 = arith.constant 2.000000e+00 : f32
    %110 = vector.broadcast %cst_46 : f32 to vector<16x128xf32>
    %111 = arith.subf %21, %110 : vector<16x128xf32>
    %112 = arith.mulf %111, %42 : vector<16x128xf32>
    %cst_47 = arith.constant 5.000000e+00 : f32
    %113 = vector.broadcast %cst_47 : f32 to vector<16x128xf32>
    %114 = arith.subf %21, %113 : vector<16x128xf32>
    %115 = arith.mulf %114, %49 : vector<16x128xf32>
    %116 = arith.subf %112, %115 : vector<16x128xf32>
    %cst_48 = arith.constant 5.000000e-01 : f32
    %117 = vector.broadcast %cst_48 : f32 to vector<16x128xf32>
    %118 = arith.mulf %117, %116 : vector<16x128xf32>
    %cst_49 = arith.constant 3.000000e+00 : f32
    %119 = vector.broadcast %cst_49 : f32 to vector<16x128xf32>
    %120 = arith.subf %21, %119 : vector<16x128xf32>
    %121 = arith.mulf %120, %49 : vector<16x128xf32>
    %cst_50 = arith.constant 6.000000e+00 : f32
    %122 = vector.broadcast %cst_50 : f32 to vector<16x128xf32>
    %123 = arith.subf %21, %122 : vector<16x128xf32>
    %124 = arith.mulf %123, %56 : vector<16x128xf32>
    %125 = arith.subf %121, %124 : vector<16x128xf32>
    %cst_51 = arith.constant 5.000000e-01 : f32
    %126 = vector.broadcast %cst_51 : f32 to vector<16x128xf32>
    %127 = arith.mulf %126, %125 : vector<16x128xf32>
    %cst_52 = arith.constant 4.000000e+00 : f32
    %128 = vector.broadcast %cst_52 : f32 to vector<16x128xf32>
    %129 = arith.subf %21, %128 : vector<16x128xf32>
    %130 = arith.mulf %129, %56 : vector<16x128xf32>
    %cst_53 = arith.constant 7.000000e+00 : f32
    %131 = vector.broadcast %cst_53 : f32 to vector<16x128xf32>
    %132 = arith.subf %21, %131 : vector<16x128xf32>
    %133 = arith.mulf %132, %63 : vector<16x128xf32>
    %134 = arith.subf %130, %133 : vector<16x128xf32>
    %cst_54 = arith.constant 5.000000e-01 : f32
    %135 = vector.broadcast %cst_54 : f32 to vector<16x128xf32>
    %136 = arith.mulf %135, %134 : vector<16x128xf32>
    %cst_55 = arith.constant 5.000000e+00 : f32
    %137 = vector.broadcast %cst_55 : f32 to vector<16x128xf32>
    %138 = arith.subf %21, %137 : vector<16x128xf32>
    %139 = arith.mulf %138, %63 : vector<16x128xf32>
    %cst_56 = arith.constant 8.000000e+00 : f32
    %140 = vector.broadcast %cst_56 : f32 to vector<16x128xf32>
    %141 = arith.subf %21, %140 : vector<16x128xf32>
    %142 = arith.mulf %141, %70 : vector<16x128xf32>
    %143 = arith.subf %139, %142 : vector<16x128xf32>
    %cst_57 = arith.constant 5.000000e-01 : f32
    %144 = vector.broadcast %cst_57 : f32 to vector<16x128xf32>
    %145 = arith.mulf %144, %143 : vector<16x128xf32>
    %cst_58 = arith.constant 6.000000e+00 : f32
    %146 = vector.broadcast %cst_58 : f32 to vector<16x128xf32>
    %147 = arith.subf %21, %146 : vector<16x128xf32>
    %148 = arith.mulf %147, %70 : vector<16x128xf32>
    %cst_59 = arith.constant 9.000000e+00 : f32
    %149 = vector.broadcast %cst_59 : f32 to vector<16x128xf32>
    %150 = arith.subf %21, %149 : vector<16x128xf32>
    %151 = arith.mulf %150, %77 : vector<16x128xf32>
    %152 = arith.subf %148, %151 : vector<16x128xf32>
    %cst_60 = arith.constant 5.000000e-01 : f32
    %153 = vector.broadcast %cst_60 : f32 to vector<16x128xf32>
    %154 = arith.mulf %153, %152 : vector<16x128xf32>
    %cst_61 = arith.constant 7.000000e+00 : f32
    %155 = vector.broadcast %cst_61 : f32 to vector<16x128xf32>
    %156 = arith.subf %21, %155 : vector<16x128xf32>
    %157 = arith.mulf %156, %77 : vector<16x128xf32>
    %cst_62 = arith.constant 1.000000e+01 : f32
    %158 = vector.broadcast %cst_62 : f32 to vector<16x128xf32>
    %159 = arith.subf %21, %158 : vector<16x128xf32>
    %160 = arith.mulf %159, %84 : vector<16x128xf32>
    %161 = arith.subf %157, %160 : vector<16x128xf32>
    %cst_63 = arith.constant 5.000000e-01 : f32
    %162 = vector.broadcast %cst_63 : f32 to vector<16x128xf32>
    %163 = arith.mulf %162, %161 : vector<16x128xf32>
    %cst_64 = arith.constant 8.000000e+00 : f32
    %164 = vector.broadcast %cst_64 : f32 to vector<16x128xf32>
    %165 = arith.subf %21, %164 : vector<16x128xf32>
    %166 = arith.mulf %165, %84 : vector<16x128xf32>
    %cst_65 = arith.constant 1.100000e+01 : f32
    %167 = vector.broadcast %cst_65 : f32 to vector<16x128xf32>
    %168 = arith.subf %21, %167 : vector<16x128xf32>
    %169 = arith.mulf %168, %91 : vector<16x128xf32>
    %170 = arith.subf %166, %169 : vector<16x128xf32>
    %cst_66 = arith.constant 5.000000e-01 : f32
    %171 = vector.broadcast %cst_66 : f32 to vector<16x128xf32>
    %172 = arith.mulf %171, %170 : vector<16x128xf32>
    %173 = vector.extract_strided_slice %6 {offsets = [0, 3], sizes = [16, 8], strides = [1, 1]} : vector<16x11xf32> to vector<16x8xf32>
    %cst_67 = arith.constant 0.000000e+00 : f32
    %174 = vector.broadcast %cst_67 : f32 to vector<16x128xf32>
    %175 = arith.subf %21, %174 : vector<16x128xf32>
    %176 = arith.mulf %175, %100 : vector<16x128xf32>
    %cst_68 = arith.constant 4.000000e+00 : f32
    %177 = vector.broadcast %cst_68 : f32 to vector<16x128xf32>
    %178 = arith.subf %21, %177 : vector<16x128xf32>
    %179 = arith.mulf %178, %109 : vector<16x128xf32>
    %180 = arith.subf %176, %179 : vector<16x128xf32>
    %cst_69 = arith.constant 0.333333343 : f32
    %181 = vector.broadcast %cst_69 : f32 to vector<16x128xf32>
    %182 = arith.mulf %181, %180 : vector<16x128xf32>
    %183 = vector.extract_strided_slice %173 {offsets = [0, 0], sizes = [16, 1], strides = [1, 1]} : vector<16x8xf32> to vector<16x1xf32>
    %184 = vector.broadcast %183 : vector<16x1xf32> to vector<16x128xf32>
    %185 = arith.mulf %184, %182 : vector<16x128xf32>
    %cst_70 = arith.constant 1.000000e+00 : f32
    %186 = vector.broadcast %cst_70 : f32 to vector<16x128xf32>
    %187 = arith.subf %21, %186 : vector<16x128xf32>
    %188 = arith.mulf %187, %109 : vector<16x128xf32>
    %cst_71 = arith.constant 5.000000e+00 : f32
    %189 = vector.broadcast %cst_71 : f32 to vector<16x128xf32>
    %190 = arith.subf %21, %189 : vector<16x128xf32>
    %191 = arith.mulf %190, %118 : vector<16x128xf32>
    %192 = arith.subf %188, %191 : vector<16x128xf32>
    %cst_72 = arith.constant 0.333333343 : f32
    %193 = vector.broadcast %cst_72 : f32 to vector<16x128xf32>
    %194 = arith.mulf %193, %192 : vector<16x128xf32>
    %195 = vector.extract_strided_slice %173 {offsets = [0, 1], sizes = [16, 1], strides = [1, 1]} : vector<16x8xf32> to vector<16x1xf32>
    %196 = vector.broadcast %195 : vector<16x1xf32> to vector<16x128xf32>
    %197 = arith.mulf %196, %194 : vector<16x128xf32>
    %198 = arith.addf %185, %197 : vector<16x128xf32>
    %cst_73 = arith.constant 2.000000e+00 : f32
    %199 = vector.broadcast %cst_73 : f32 to vector<16x128xf32>
    %200 = arith.subf %21, %199 : vector<16x128xf32>
    %201 = arith.mulf %200, %118 : vector<16x128xf32>
    %cst_74 = arith.constant 6.000000e+00 : f32
    %202 = vector.broadcast %cst_74 : f32 to vector<16x128xf32>
    %203 = arith.subf %21, %202 : vector<16x128xf32>
    %204 = arith.mulf %203, %127 : vector<16x128xf32>
    %205 = arith.subf %201, %204 : vector<16x128xf32>
    %cst_75 = arith.constant 0.333333343 : f32
    %206 = vector.broadcast %cst_75 : f32 to vector<16x128xf32>
    %207 = arith.mulf %206, %205 : vector<16x128xf32>
    %208 = vector.extract_strided_slice %173 {offsets = [0, 2], sizes = [16, 1], strides = [1, 1]} : vector<16x8xf32> to vector<16x1xf32>
    %209 = vector.broadcast %208 : vector<16x1xf32> to vector<16x128xf32>
    %210 = arith.mulf %209, %207 : vector<16x128xf32>
    %211 = arith.addf %198, %210 : vector<16x128xf32>
    %cst_76 = arith.constant 3.000000e+00 : f32
    %212 = vector.broadcast %cst_76 : f32 to vector<16x128xf32>
    %213 = arith.subf %21, %212 : vector<16x128xf32>
    %214 = arith.mulf %213, %127 : vector<16x128xf32>
    %cst_77 = arith.constant 7.000000e+00 : f32
    %215 = vector.broadcast %cst_77 : f32 to vector<16x128xf32>
    %216 = arith.subf %21, %215 : vector<16x128xf32>
    %217 = arith.mulf %216, %136 : vector<16x128xf32>
    %218 = arith.subf %214, %217 : vector<16x128xf32>
    %cst_78 = arith.constant 0.333333343 : f32
    %219 = vector.broadcast %cst_78 : f32 to vector<16x128xf32>
    %220 = arith.mulf %219, %218 : vector<16x128xf32>
    %221 = vector.extract_strided_slice %173 {offsets = [0, 3], sizes = [16, 1], strides = [1, 1]} : vector<16x8xf32> to vector<16x1xf32>
    %222 = vector.broadcast %221 : vector<16x1xf32> to vector<16x128xf32>
    %223 = arith.mulf %222, %220 : vector<16x128xf32>
    %224 = arith.addf %211, %223 : vector<16x128xf32>
    %cst_79 = arith.constant 4.000000e+00 : f32
    %225 = vector.broadcast %cst_79 : f32 to vector<16x128xf32>
    %226 = arith.subf %21, %225 : vector<16x128xf32>
    %227 = arith.mulf %226, %136 : vector<16x128xf32>
    %cst_80 = arith.constant 8.000000e+00 : f32
    %228 = vector.broadcast %cst_80 : f32 to vector<16x128xf32>
    %229 = arith.subf %21, %228 : vector<16x128xf32>
    %230 = arith.mulf %229, %145 : vector<16x128xf32>
    %231 = arith.subf %227, %230 : vector<16x128xf32>
    %cst_81 = arith.constant 0.333333343 : f32
    %232 = vector.broadcast %cst_81 : f32 to vector<16x128xf32>
    %233 = arith.mulf %232, %231 : vector<16x128xf32>
    %234 = vector.extract_strided_slice %173 {offsets = [0, 4], sizes = [16, 1], strides = [1, 1]} : vector<16x8xf32> to vector<16x1xf32>
    %235 = vector.broadcast %234 : vector<16x1xf32> to vector<16x128xf32>
    %236 = arith.mulf %235, %233 : vector<16x128xf32>
    %237 = arith.addf %224, %236 : vector<16x128xf32>
    %cst_82 = arith.constant 5.000000e+00 : f32
    %238 = vector.broadcast %cst_82 : f32 to vector<16x128xf32>
    %239 = arith.subf %21, %238 : vector<16x128xf32>
    %240 = arith.mulf %239, %145 : vector<16x128xf32>
    %cst_83 = arith.constant 9.000000e+00 : f32
    %241 = vector.broadcast %cst_83 : f32 to vector<16x128xf32>
    %242 = arith.subf %21, %241 : vector<16x128xf32>
    %243 = arith.mulf %242, %154 : vector<16x128xf32>
    %244 = arith.subf %240, %243 : vector<16x128xf32>
    %cst_84 = arith.constant 0.333333343 : f32
    %245 = vector.broadcast %cst_84 : f32 to vector<16x128xf32>
    %246 = arith.mulf %245, %244 : vector<16x128xf32>
    %247 = vector.extract_strided_slice %173 {offsets = [0, 5], sizes = [16, 1], strides = [1, 1]} : vector<16x8xf32> to vector<16x1xf32>
    %248 = vector.broadcast %247 : vector<16x1xf32> to vector<16x128xf32>
    %249 = arith.mulf %248, %246 : vector<16x128xf32>
    %250 = arith.addf %237, %249 : vector<16x128xf32>
    %cst_85 = arith.constant 6.000000e+00 : f32
    %251 = vector.broadcast %cst_85 : f32 to vector<16x128xf32>
    %252 = arith.subf %21, %251 : vector<16x128xf32>
    %253 = arith.mulf %252, %154 : vector<16x128xf32>
    %cst_86 = arith.constant 1.000000e+01 : f32
    %254 = vector.broadcast %cst_86 : f32 to vector<16x128xf32>
    %255 = arith.subf %21, %254 : vector<16x128xf32>
    %256 = arith.mulf %255, %163 : vector<16x128xf32>
    %257 = arith.subf %253, %256 : vector<16x128xf32>
    %cst_87 = arith.constant 0.333333343 : f32
    %258 = vector.broadcast %cst_87 : f32 to vector<16x128xf32>
    %259 = arith.mulf %258, %257 : vector<16x128xf32>
    %260 = vector.extract_strided_slice %173 {offsets = [0, 6], sizes = [16, 1], strides = [1, 1]} : vector<16x8xf32> to vector<16x1xf32>
    %261 = vector.broadcast %260 : vector<16x1xf32> to vector<16x128xf32>
    %262 = arith.mulf %261, %259 : vector<16x128xf32>
    %263 = arith.addf %250, %262 : vector<16x128xf32>
    %cst_88 = arith.constant 7.000000e+00 : f32
    %264 = vector.broadcast %cst_88 : f32 to vector<16x128xf32>
    %265 = arith.subf %21, %264 : vector<16x128xf32>
    %266 = arith.mulf %265, %163 : vector<16x128xf32>
    %cst_89 = arith.constant 1.100000e+01 : f32
    %267 = vector.broadcast %cst_89 : f32 to vector<16x128xf32>
    %268 = arith.subf %21, %267 : vector<16x128xf32>
    %269 = arith.mulf %268, %172 : vector<16x128xf32>
    %270 = arith.subf %266, %269 : vector<16x128xf32>
    %cst_90 = arith.constant 0.333333343 : f32
    %271 = vector.broadcast %cst_90 : f32 to vector<16x128xf32>
    %272 = arith.mulf %271, %270 : vector<16x128xf32>
    %273 = vector.extract_strided_slice %173 {offsets = [0, 7], sizes = [16, 1], strides = [1, 1]} : vector<16x8xf32> to vector<16x1xf32>
    %274 = vector.broadcast %273 : vector<16x1xf32> to vector<16x128xf32>
    %275 = arith.mulf %274, %272 : vector<16x128xf32>
    %276 = arith.addf %263, %275 : vector<16x128xf32>
    %277 = vector.extract_strided_slice %6 {offsets = [0, 1], sizes = [16, 1], strides = [1, 1]} : vector<16x11xf32> to vector<16x1xf32>
    %278 = vector.broadcast %277 : vector<16x1xf32> to vector<16x128xf32>
    %279 = arith.mulf %278, %17 : vector<16x128xf32>
    %280 = vector.extract_strided_slice %6 {offsets = [0, 2], sizes = [16, 1], strides = [1, 1]} : vector<16x11xf32> to vector<16x1xf32>
    %281 = vector.broadcast %280 : vector<16x1xf32> to vector<16x128xf32>
    %282 = arith.mulf %281, %276 : vector<16x128xf32>
    %283 = arith.addf %279, %282 : vector<16x128xf32>
    %c0_91 = arith.constant 0 : index
    %c0_92 = arith.constant 0 : index
    %284 = vector.load %arg5[%c0_91, %c0_92] : memref<32x16xf32, #tpu.memory_space<vmem>>, vector<32x16xf32>
    %cst_93 = arith.constant dense<0.000000e+00> : vector<32x128xf32>
    %285 = tpu.matmul %284, %283, %cst_93 {dimension_numbers = #tpu.dot_dimension_numbers<[1], [0], [0], [1], [0, 0, 1, 1], [], []>} : vector<32x16xf32>, vector<16x128xf32>, vector<32x128xf32> -> vector<32x128xf32>
    %c0_94 = arith.constant 0 : index
    %c0_95 = arith.constant 0 : index
    %286 = vector.load %arg6[%c0_94, %c0_95] : memref<32x11xf32, #tpu.memory_space<vmem>>, vector<32x11xf32>
    %287 = vector.extract_strided_slice %286 {offsets = [0, 0], sizes = [32, 1], strides = [1, 1]} : vector<32x11xf32> to vector<32x1xf32>
    %288 = vector.broadcast %287 : vector<32x1xf32> to vector<32x128xf32>
    %289 = arith.addf %285, %288 : vector<32x128xf32>
    %cst_96 = arith.constant 5.000000e-01 : f32
    %290 = vector.broadcast %cst_96 : f32 to vector<32x128xf32>
    %291 = arith.mulf %290, %289 : vector<32x128xf32>
    %292 = math.tanh %291 : vector<32x128xf32>
    %cst_97 = arith.constant 5.000000e-01 : f32
    %293 = vector.broadcast %cst_97 : f32 to vector<32x128xf32>
    %294 = arith.mulf %293, %292 : vector<32x128xf32>
    %cst_98 = arith.constant 5.000000e-01 : f32
    %295 = vector.broadcast %cst_98 : f32 to vector<32x128xf32>
    %296 = arith.addf %294, %295 : vector<32x128xf32>
    %297 = arith.mulf %289, %296 : vector<32x128xf32>
    %cst_99 = arith.constant -2.200000e+00 : f32
    %298 = vector.broadcast %cst_99 : f32 to vector<32x128xf32>
    %299 = arith.subf %289, %298 : vector<32x128xf32>
    %cst_100 = arith.constant 2.500000e+00 : f32
    %300 = vector.broadcast %cst_100 : f32 to vector<32x128xf32>
    %301 = arith.mulf %299, %300 : vector<32x128xf32>
    %cst_101 = arith.constant 1.000000e+00 : f32
    %302 = vector.broadcast %cst_101 : f32 to vector<32x128xf32>
    %303 = arith.subf %301, %302 : vector<32x128xf32>
    %304 = math.absf %303 : vector<32x128xf32>
    %cst_102 = arith.constant 1.000000e+00 : f32
    %305 = vector.broadcast %cst_102 : f32 to vector<32x128xf32>
    %306 = arith.subf %305, %304 : vector<32x128xf32>
    %cst_103 = arith.constant 0.000000e+00 : f32
    %307 = vector.broadcast %cst_103 : f32 to vector<32x128xf32>
    %308 = arith.maximumf %307, %306 : vector<32x128xf32>
    %cst_104 = arith.constant 2.000000e+00 : f32
    %309 = vector.broadcast %cst_104 : f32 to vector<32x128xf32>
    %310 = arith.subf %301, %309 : vector<32x128xf32>
    %311 = math.absf %310 : vector<32x128xf32>
    %cst_105 = arith.constant 1.000000e+00 : f32
    %312 = vector.broadcast %cst_105 : f32 to vector<32x128xf32>
    %313 = arith.subf %312, %311 : vector<32x128xf32>
    %cst_106 = arith.constant 0.000000e+00 : f32
    %314 = vector.broadcast %cst_106 : f32 to vector<32x128xf32>
    %315 = arith.maximumf %314, %313 : vector<32x128xf32>
    %cst_107 = arith.constant 3.000000e+00 : f32
    %316 = vector.broadcast %cst_107 : f32 to vector<32x128xf32>
    %317 = arith.subf %301, %316 : vector<32x128xf32>
    %318 = math.absf %317 : vector<32x128xf32>
    %cst_108 = arith.constant 1.000000e+00 : f32
    %319 = vector.broadcast %cst_108 : f32 to vector<32x128xf32>
    %320 = arith.subf %319, %318 : vector<32x128xf32>
    %cst_109 = arith.constant 0.000000e+00 : f32
    %321 = vector.broadcast %cst_109 : f32 to vector<32x128xf32>
    %322 = arith.maximumf %321, %320 : vector<32x128xf32>
    %cst_110 = arith.constant 4.000000e+00 : f32
    %323 = vector.broadcast %cst_110 : f32 to vector<32x128xf32>
    %324 = arith.subf %301, %323 : vector<32x128xf32>
    %325 = math.absf %324 : vector<32x128xf32>
    %cst_111 = arith.constant 1.000000e+00 : f32
    %326 = vector.broadcast %cst_111 : f32 to vector<32x128xf32>
    %327 = arith.subf %326, %325 : vector<32x128xf32>
    %cst_112 = arith.constant 0.000000e+00 : f32
    %328 = vector.broadcast %cst_112 : f32 to vector<32x128xf32>
    %329 = arith.maximumf %328, %327 : vector<32x128xf32>
    %cst_113 = arith.constant 5.000000e+00 : f32
    %330 = vector.broadcast %cst_113 : f32 to vector<32x128xf32>
    %331 = arith.subf %301, %330 : vector<32x128xf32>
    %332 = math.absf %331 : vector<32x128xf32>
    %cst_114 = arith.constant 1.000000e+00 : f32
    %333 = vector.broadcast %cst_114 : f32 to vector<32x128xf32>
    %334 = arith.subf %333, %332 : vector<32x128xf32>
    %cst_115 = arith.constant 0.000000e+00 : f32
    %335 = vector.broadcast %cst_115 : f32 to vector<32x128xf32>
    %336 = arith.maximumf %335, %334 : vector<32x128xf32>
    %cst_116 = arith.constant 6.000000e+00 : f32
    %337 = vector.broadcast %cst_116 : f32 to vector<32x128xf32>
    %338 = arith.subf %301, %337 : vector<32x128xf32>
    %339 = math.absf %338 : vector<32x128xf32>
    %cst_117 = arith.constant 1.000000e+00 : f32
    %340 = vector.broadcast %cst_117 : f32 to vector<32x128xf32>
    %341 = arith.subf %340, %339 : vector<32x128xf32>
    %cst_118 = arith.constant 0.000000e+00 : f32
    %342 = vector.broadcast %cst_118 : f32 to vector<32x128xf32>
    %343 = arith.maximumf %342, %341 : vector<32x128xf32>
    %cst_119 = arith.constant 7.000000e+00 : f32
    %344 = vector.broadcast %cst_119 : f32 to vector<32x128xf32>
    %345 = arith.subf %301, %344 : vector<32x128xf32>
    %346 = math.absf %345 : vector<32x128xf32>
    %cst_120 = arith.constant 1.000000e+00 : f32
    %347 = vector.broadcast %cst_120 : f32 to vector<32x128xf32>
    %348 = arith.subf %347, %346 : vector<32x128xf32>
    %cst_121 = arith.constant 0.000000e+00 : f32
    %349 = vector.broadcast %cst_121 : f32 to vector<32x128xf32>
    %350 = arith.maximumf %349, %348 : vector<32x128xf32>
    %cst_122 = arith.constant 8.000000e+00 : f32
    %351 = vector.broadcast %cst_122 : f32 to vector<32x128xf32>
    %352 = arith.subf %301, %351 : vector<32x128xf32>
    %353 = math.absf %352 : vector<32x128xf32>
    %cst_123 = arith.constant 1.000000e+00 : f32
    %354 = vector.broadcast %cst_123 : f32 to vector<32x128xf32>
    %355 = arith.subf %354, %353 : vector<32x128xf32>
    %cst_124 = arith.constant 0.000000e+00 : f32
    %356 = vector.broadcast %cst_124 : f32 to vector<32x128xf32>
    %357 = arith.maximumf %356, %355 : vector<32x128xf32>
    %cst_125 = arith.constant 9.000000e+00 : f32
    %358 = vector.broadcast %cst_125 : f32 to vector<32x128xf32>
    %359 = arith.subf %301, %358 : vector<32x128xf32>
    %360 = math.absf %359 : vector<32x128xf32>
    %cst_126 = arith.constant 1.000000e+00 : f32
    %361 = vector.broadcast %cst_126 : f32 to vector<32x128xf32>
    %362 = arith.subf %361, %360 : vector<32x128xf32>
    %cst_127 = arith.constant 0.000000e+00 : f32
    %363 = vector.broadcast %cst_127 : f32 to vector<32x128xf32>
    %364 = arith.maximumf %363, %362 : vector<32x128xf32>
    %cst_128 = arith.constant 1.000000e+01 : f32
    %365 = vector.broadcast %cst_128 : f32 to vector<32x128xf32>
    %366 = arith.subf %301, %365 : vector<32x128xf32>
    %367 = math.absf %366 : vector<32x128xf32>
    %cst_129 = arith.constant 1.000000e+00 : f32
    %368 = vector.broadcast %cst_129 : f32 to vector<32x128xf32>
    %369 = arith.subf %368, %367 : vector<32x128xf32>
    %cst_130 = arith.constant 0.000000e+00 : f32
    %370 = vector.broadcast %cst_130 : f32 to vector<32x128xf32>
    %371 = arith.maximumf %370, %369 : vector<32x128xf32>
    %cst_131 = arith.constant 0.000000e+00 : f32
    %372 = vector.broadcast %cst_131 : f32 to vector<32x128xf32>
    %373 = arith.subf %301, %372 : vector<32x128xf32>
    %374 = arith.mulf %373, %308 : vector<32x128xf32>
    %cst_132 = arith.constant 3.000000e+00 : f32
    %375 = vector.broadcast %cst_132 : f32 to vector<32x128xf32>
    %376 = arith.subf %301, %375 : vector<32x128xf32>
    %377 = arith.mulf %376, %315 : vector<32x128xf32>
    %378 = arith.subf %374, %377 : vector<32x128xf32>
    %cst_133 = arith.constant 5.000000e-01 : f32
    %379 = vector.broadcast %cst_133 : f32 to vector<32x128xf32>
    %380 = arith.mulf %379, %378 : vector<32x128xf32>
    %cst_134 = arith.constant 1.000000e+00 : f32
    %381 = vector.broadcast %cst_134 : f32 to vector<32x128xf32>
    %382 = arith.subf %301, %381 : vector<32x128xf32>
    %383 = arith.mulf %382, %315 : vector<32x128xf32>
    %cst_135 = arith.constant 4.000000e+00 : f32
    %384 = vector.broadcast %cst_135 : f32 to vector<32x128xf32>
    %385 = arith.subf %301, %384 : vector<32x128xf32>
    %386 = arith.mulf %385, %322 : vector<32x128xf32>
    %387 = arith.subf %383, %386 : vector<32x128xf32>
    %cst_136 = arith.constant 5.000000e-01 : f32
    %388 = vector.broadcast %cst_136 : f32 to vector<32x128xf32>
    %389 = arith.mulf %388, %387 : vector<32x128xf32>
    %cst_137 = arith.constant 2.000000e+00 : f32
    %390 = vector.broadcast %cst_137 : f32 to vector<32x128xf32>
    %391 = arith.subf %301, %390 : vector<32x128xf32>
    %392 = arith.mulf %391, %322 : vector<32x128xf32>
    %cst_138 = arith.constant 5.000000e+00 : f32
    %393 = vector.broadcast %cst_138 : f32 to vector<32x128xf32>
    %394 = arith.subf %301, %393 : vector<32x128xf32>
    %395 = arith.mulf %394, %329 : vector<32x128xf32>
    %396 = arith.subf %392, %395 : vector<32x128xf32>
    %cst_139 = arith.constant 5.000000e-01 : f32
    %397 = vector.broadcast %cst_139 : f32 to vector<32x128xf32>
    %398 = arith.mulf %397, %396 : vector<32x128xf32>
    %cst_140 = arith.constant 3.000000e+00 : f32
    %399 = vector.broadcast %cst_140 : f32 to vector<32x128xf32>
    %400 = arith.subf %301, %399 : vector<32x128xf32>
    %401 = arith.mulf %400, %329 : vector<32x128xf32>
    %cst_141 = arith.constant 6.000000e+00 : f32
    %402 = vector.broadcast %cst_141 : f32 to vector<32x128xf32>
    %403 = arith.subf %301, %402 : vector<32x128xf32>
    %404 = arith.mulf %403, %336 : vector<32x128xf32>
    %405 = arith.subf %401, %404 : vector<32x128xf32>
    %cst_142 = arith.constant 5.000000e-01 : f32
    %406 = vector.broadcast %cst_142 : f32 to vector<32x128xf32>
    %407 = arith.mulf %406, %405 : vector<32x128xf32>
    %cst_143 = arith.constant 4.000000e+00 : f32
    %408 = vector.broadcast %cst_143 : f32 to vector<32x128xf32>
    %409 = arith.subf %301, %408 : vector<32x128xf32>
    %410 = arith.mulf %409, %336 : vector<32x128xf32>
    %cst_144 = arith.constant 7.000000e+00 : f32
    %411 = vector.broadcast %cst_144 : f32 to vector<32x128xf32>
    %412 = arith.subf %301, %411 : vector<32x128xf32>
    %413 = arith.mulf %412, %343 : vector<32x128xf32>
    %414 = arith.subf %410, %413 : vector<32x128xf32>
    %cst_145 = arith.constant 5.000000e-01 : f32
    %415 = vector.broadcast %cst_145 : f32 to vector<32x128xf32>
    %416 = arith.mulf %415, %414 : vector<32x128xf32>
    %cst_146 = arith.constant 5.000000e+00 : f32
    %417 = vector.broadcast %cst_146 : f32 to vector<32x128xf32>
    %418 = arith.subf %301, %417 : vector<32x128xf32>
    %419 = arith.mulf %418, %343 : vector<32x128xf32>
    %cst_147 = arith.constant 8.000000e+00 : f32
    %420 = vector.broadcast %cst_147 : f32 to vector<32x128xf32>
    %421 = arith.subf %301, %420 : vector<32x128xf32>
    %422 = arith.mulf %421, %350 : vector<32x128xf32>
    %423 = arith.subf %419, %422 : vector<32x128xf32>
    %cst_148 = arith.constant 5.000000e-01 : f32
    %424 = vector.broadcast %cst_148 : f32 to vector<32x128xf32>
    %425 = arith.mulf %424, %423 : vector<32x128xf32>
    %cst_149 = arith.constant 6.000000e+00 : f32
    %426 = vector.broadcast %cst_149 : f32 to vector<32x128xf32>
    %427 = arith.subf %301, %426 : vector<32x128xf32>
    %428 = arith.mulf %427, %350 : vector<32x128xf32>
    %cst_150 = arith.constant 9.000000e+00 : f32
    %429 = vector.broadcast %cst_150 : f32 to vector<32x128xf32>
    %430 = arith.subf %301, %429 : vector<32x128xf32>
    %431 = arith.mulf %430, %357 : vector<32x128xf32>
    %432 = arith.subf %428, %431 : vector<32x128xf32>
    %cst_151 = arith.constant 5.000000e-01 : f32
    %433 = vector.broadcast %cst_151 : f32 to vector<32x128xf32>
    %434 = arith.mulf %433, %432 : vector<32x128xf32>
    %cst_152 = arith.constant 7.000000e+00 : f32
    %435 = vector.broadcast %cst_152 : f32 to vector<32x128xf32>
    %436 = arith.subf %301, %435 : vector<32x128xf32>
    %437 = arith.mulf %436, %357 : vector<32x128xf32>
    %cst_153 = arith.constant 1.000000e+01 : f32
    %438 = vector.broadcast %cst_153 : f32 to vector<32x128xf32>
    %439 = arith.subf %301, %438 : vector<32x128xf32>
    %440 = arith.mulf %439, %364 : vector<32x128xf32>
    %441 = arith.subf %437, %440 : vector<32x128xf32>
    %cst_154 = arith.constant 5.000000e-01 : f32
    %442 = vector.broadcast %cst_154 : f32 to vector<32x128xf32>
    %443 = arith.mulf %442, %441 : vector<32x128xf32>
    %cst_155 = arith.constant 8.000000e+00 : f32
    %444 = vector.broadcast %cst_155 : f32 to vector<32x128xf32>
    %445 = arith.subf %301, %444 : vector<32x128xf32>
    %446 = arith.mulf %445, %364 : vector<32x128xf32>
    %cst_156 = arith.constant 1.100000e+01 : f32
    %447 = vector.broadcast %cst_156 : f32 to vector<32x128xf32>
    %448 = arith.subf %301, %447 : vector<32x128xf32>
    %449 = arith.mulf %448, %371 : vector<32x128xf32>
    %450 = arith.subf %446, %449 : vector<32x128xf32>
    %cst_157 = arith.constant 5.000000e-01 : f32
    %451 = vector.broadcast %cst_157 : f32 to vector<32x128xf32>
    %452 = arith.mulf %451, %450 : vector<32x128xf32>
    %453 = vector.extract_strided_slice %286 {offsets = [0, 3], sizes = [32, 8], strides = [1, 1]} : vector<32x11xf32> to vector<32x8xf32>
    %cst_158 = arith.constant 0.000000e+00 : f32
    %454 = vector.broadcast %cst_158 : f32 to vector<32x128xf32>
    %455 = arith.subf %301, %454 : vector<32x128xf32>
    %456 = arith.mulf %455, %380 : vector<32x128xf32>
    %cst_159 = arith.constant 4.000000e+00 : f32
    %457 = vector.broadcast %cst_159 : f32 to vector<32x128xf32>
    %458 = arith.subf %301, %457 : vector<32x128xf32>
    %459 = arith.mulf %458, %389 : vector<32x128xf32>
    %460 = arith.subf %456, %459 : vector<32x128xf32>
    %cst_160 = arith.constant 0.333333343 : f32
    %461 = vector.broadcast %cst_160 : f32 to vector<32x128xf32>
    %462 = arith.mulf %461, %460 : vector<32x128xf32>
    %463 = vector.extract_strided_slice %453 {offsets = [0, 0], sizes = [32, 1], strides = [1, 1]} : vector<32x8xf32> to vector<32x1xf32>
    %464 = vector.broadcast %463 : vector<32x1xf32> to vector<32x128xf32>
    %465 = arith.mulf %464, %462 : vector<32x128xf32>
    %cst_161 = arith.constant 1.000000e+00 : f32
    %466 = vector.broadcast %cst_161 : f32 to vector<32x128xf32>
    %467 = arith.subf %301, %466 : vector<32x128xf32>
    %468 = arith.mulf %467, %389 : vector<32x128xf32>
    %cst_162 = arith.constant 5.000000e+00 : f32
    %469 = vector.broadcast %cst_162 : f32 to vector<32x128xf32>
    %470 = arith.subf %301, %469 : vector<32x128xf32>
    %471 = arith.mulf %470, %398 : vector<32x128xf32>
    %472 = arith.subf %468, %471 : vector<32x128xf32>
    %cst_163 = arith.constant 0.333333343 : f32
    %473 = vector.broadcast %cst_163 : f32 to vector<32x128xf32>
    %474 = arith.mulf %473, %472 : vector<32x128xf32>
    %475 = vector.extract_strided_slice %453 {offsets = [0, 1], sizes = [32, 1], strides = [1, 1]} : vector<32x8xf32> to vector<32x1xf32>
    %476 = vector.broadcast %475 : vector<32x1xf32> to vector<32x128xf32>
    %477 = arith.mulf %476, %474 : vector<32x128xf32>
    %478 = arith.addf %465, %477 : vector<32x128xf32>
    %cst_164 = arith.constant 2.000000e+00 : f32
    %479 = vector.broadcast %cst_164 : f32 to vector<32x128xf32>
    %480 = arith.subf %301, %479 : vector<32x128xf32>
    %481 = arith.mulf %480, %398 : vector<32x128xf32>
    %cst_165 = arith.constant 6.000000e+00 : f32
    %482 = vector.broadcast %cst_165 : f32 to vector<32x128xf32>
    %483 = arith.subf %301, %482 : vector<32x128xf32>
    %484 = arith.mulf %483, %407 : vector<32x128xf32>
    %485 = arith.subf %481, %484 : vector<32x128xf32>
    %cst_166 = arith.constant 0.333333343 : f32
    %486 = vector.broadcast %cst_166 : f32 to vector<32x128xf32>
    %487 = arith.mulf %486, %485 : vector<32x128xf32>
    %488 = vector.extract_strided_slice %453 {offsets = [0, 2], sizes = [32, 1], strides = [1, 1]} : vector<32x8xf32> to vector<32x1xf32>
    %489 = vector.broadcast %488 : vector<32x1xf32> to vector<32x128xf32>
    %490 = arith.mulf %489, %487 : vector<32x128xf32>
    %491 = arith.addf %478, %490 : vector<32x128xf32>
    %cst_167 = arith.constant 3.000000e+00 : f32
    %492 = vector.broadcast %cst_167 : f32 to vector<32x128xf32>
    %493 = arith.subf %301, %492 : vector<32x128xf32>
    %494 = arith.mulf %493, %407 : vector<32x128xf32>
    %cst_168 = arith.constant 7.000000e+00 : f32
    %495 = vector.broadcast %cst_168 : f32 to vector<32x128xf32>
    %496 = arith.subf %301, %495 : vector<32x128xf32>
    %497 = arith.mulf %496, %416 : vector<32x128xf32>
    %498 = arith.subf %494, %497 : vector<32x128xf32>
    %cst_169 = arith.constant 0.333333343 : f32
    %499 = vector.broadcast %cst_169 : f32 to vector<32x128xf32>
    %500 = arith.mulf %499, %498 : vector<32x128xf32>
    %501 = vector.extract_strided_slice %453 {offsets = [0, 3], sizes = [32, 1], strides = [1, 1]} : vector<32x8xf32> to vector<32x1xf32>
    %502 = vector.broadcast %501 : vector<32x1xf32> to vector<32x128xf32>
    %503 = arith.mulf %502, %500 : vector<32x128xf32>
    %504 = arith.addf %491, %503 : vector<32x128xf32>
    %cst_170 = arith.constant 4.000000e+00 : f32
    %505 = vector.broadcast %cst_170 : f32 to vector<32x128xf32>
    %506 = arith.subf %301, %505 : vector<32x128xf32>
    %507 = arith.mulf %506, %416 : vector<32x128xf32>
    %cst_171 = arith.constant 8.000000e+00 : f32
    %508 = vector.broadcast %cst_171 : f32 to vector<32x128xf32>
    %509 = arith.subf %301, %508 : vector<32x128xf32>
    %510 = arith.mulf %509, %425 : vector<32x128xf32>
    %511 = arith.subf %507, %510 : vector<32x128xf32>
    %cst_172 = arith.constant 0.333333343 : f32
    %512 = vector.broadcast %cst_172 : f32 to vector<32x128xf32>
    %513 = arith.mulf %512, %511 : vector<32x128xf32>
    %514 = vector.extract_strided_slice %453 {offsets = [0, 4], sizes = [32, 1], strides = [1, 1]} : vector<32x8xf32> to vector<32x1xf32>
    %515 = vector.broadcast %514 : vector<32x1xf32> to vector<32x128xf32>
    %516 = arith.mulf %515, %513 : vector<32x128xf32>
    %517 = arith.addf %504, %516 : vector<32x128xf32>
    %cst_173 = arith.constant 5.000000e+00 : f32
    %518 = vector.broadcast %cst_173 : f32 to vector<32x128xf32>
    %519 = arith.subf %301, %518 : vector<32x128xf32>
    %520 = arith.mulf %519, %425 : vector<32x128xf32>
    %cst_174 = arith.constant 9.000000e+00 : f32
    %521 = vector.broadcast %cst_174 : f32 to vector<32x128xf32>
    %522 = arith.subf %301, %521 : vector<32x128xf32>
    %523 = arith.mulf %522, %434 : vector<32x128xf32>
    %524 = arith.subf %520, %523 : vector<32x128xf32>
    %cst_175 = arith.constant 0.333333343 : f32
    %525 = vector.broadcast %cst_175 : f32 to vector<32x128xf32>
    %526 = arith.mulf %525, %524 : vector<32x128xf32>
    %527 = vector.extract_strided_slice %453 {offsets = [0, 5], sizes = [32, 1], strides = [1, 1]} : vector<32x8xf32> to vector<32x1xf32>
    %528 = vector.broadcast %527 : vector<32x1xf32> to vector<32x128xf32>
    %529 = arith.mulf %528, %526 : vector<32x128xf32>
    %530 = arith.addf %517, %529 : vector<32x128xf32>
    %cst_176 = arith.constant 6.000000e+00 : f32
    %531 = vector.broadcast %cst_176 : f32 to vector<32x128xf32>
    %532 = arith.subf %301, %531 : vector<32x128xf32>
    %533 = arith.mulf %532, %434 : vector<32x128xf32>
    %cst_177 = arith.constant 1.000000e+01 : f32
    %534 = vector.broadcast %cst_177 : f32 to vector<32x128xf32>
    %535 = arith.subf %301, %534 : vector<32x128xf32>
    %536 = arith.mulf %535, %443 : vector<32x128xf32>
    %537 = arith.subf %533, %536 : vector<32x128xf32>
    %cst_178 = arith.constant 0.333333343 : f32
    %538 = vector.broadcast %cst_178 : f32 to vector<32x128xf32>
    %539 = arith.mulf %538, %537 : vector<32x128xf32>
    %540 = vector.extract_strided_slice %453 {offsets = [0, 6], sizes = [32, 1], strides = [1, 1]} : vector<32x8xf32> to vector<32x1xf32>
    %541 = vector.broadcast %540 : vector<32x1xf32> to vector<32x128xf32>
    %542 = arith.mulf %541, %539 : vector<32x128xf32>
    %543 = arith.addf %530, %542 : vector<32x128xf32>
    %cst_179 = arith.constant 7.000000e+00 : f32
    %544 = vector.broadcast %cst_179 : f32 to vector<32x128xf32>
    %545 = arith.subf %301, %544 : vector<32x128xf32>
    %546 = arith.mulf %545, %443 : vector<32x128xf32>
    %cst_180 = arith.constant 1.100000e+01 : f32
    %547 = vector.broadcast %cst_180 : f32 to vector<32x128xf32>
    %548 = arith.subf %301, %547 : vector<32x128xf32>
    %549 = arith.mulf %548, %452 : vector<32x128xf32>
    %550 = arith.subf %546, %549 : vector<32x128xf32>
    %cst_181 = arith.constant 0.333333343 : f32
    %551 = vector.broadcast %cst_181 : f32 to vector<32x128xf32>
    %552 = arith.mulf %551, %550 : vector<32x128xf32>
    %553 = vector.extract_strided_slice %453 {offsets = [0, 7], sizes = [32, 1], strides = [1, 1]} : vector<32x8xf32> to vector<32x1xf32>
    %554 = vector.broadcast %553 : vector<32x1xf32> to vector<32x128xf32>
    %555 = arith.mulf %554, %552 : vector<32x128xf32>
    %556 = arith.addf %543, %555 : vector<32x128xf32>
    %557 = vector.extract_strided_slice %286 {offsets = [0, 1], sizes = [32, 1], strides = [1, 1]} : vector<32x11xf32> to vector<32x1xf32>
    %558 = vector.broadcast %557 : vector<32x1xf32> to vector<32x128xf32>
    %559 = arith.mulf %558, %297 : vector<32x128xf32>
    %560 = vector.extract_strided_slice %286 {offsets = [0, 2], sizes = [32, 1], strides = [1, 1]} : vector<32x11xf32> to vector<32x1xf32>
    %561 = vector.broadcast %560 : vector<32x1xf32> to vector<32x128xf32>
    %562 = arith.mulf %561, %556 : vector<32x128xf32>
    %563 = arith.addf %559, %562 : vector<32x128xf32>
    %c0_182 = arith.constant 0 : index
    %c0_183 = arith.constant 0 : index
    %564 = vector.load %arg7[%c0_182, %c0_183] : memref<64x32xf32, #tpu.memory_space<vmem>>, vector<64x32xf32>
    %cst_184 = arith.constant dense<0.000000e+00> : vector<64x128xf32>
    %565 = tpu.matmul %564, %563, %cst_184 {dimension_numbers = #tpu.dot_dimension_numbers<[1], [0], [0], [1], [0, 0, 1, 1], [], []>} : vector<64x32xf32>, vector<32x128xf32>, vector<64x128xf32> -> vector<64x128xf32>
    %c0_185 = arith.constant 0 : index
    %c0_186 = arith.constant 0 : index
    %566 = vector.load %arg8[%c0_185, %c0_186] : memref<64x11xf32, #tpu.memory_space<vmem>>, vector<64x11xf32>
    %567 = vector.extract_strided_slice %566 {offsets = [0, 0], sizes = [64, 1], strides = [1, 1]} : vector<64x11xf32> to vector<64x1xf32>
    %568 = vector.broadcast %567 : vector<64x1xf32> to vector<64x128xf32>
    %569 = arith.addf %565, %568 : vector<64x128xf32>
    %cst_187 = arith.constant 5.000000e-01 : f32
    %570 = vector.broadcast %cst_187 : f32 to vector<64x128xf32>
    %571 = arith.mulf %570, %569 : vector<64x128xf32>
    %572 = math.tanh %571 : vector<64x128xf32>
    %cst_188 = arith.constant 5.000000e-01 : f32
    %573 = vector.broadcast %cst_188 : f32 to vector<64x128xf32>
    %574 = arith.mulf %573, %572 : vector<64x128xf32>
    %cst_189 = arith.constant 5.000000e-01 : f32
    %575 = vector.broadcast %cst_189 : f32 to vector<64x128xf32>
    %576 = arith.addf %574, %575 : vector<64x128xf32>
    %577 = arith.mulf %569, %576 : vector<64x128xf32>
    %cst_190 = arith.constant -2.200000e+00 : f32
    %578 = vector.broadcast %cst_190 : f32 to vector<64x128xf32>
    %579 = arith.subf %569, %578 : vector<64x128xf32>
    %cst_191 = arith.constant 2.500000e+00 : f32
    %580 = vector.broadcast %cst_191 : f32 to vector<64x128xf32>
    %581 = arith.mulf %579, %580 : vector<64x128xf32>
    %cst_192 = arith.constant 1.000000e+00 : f32
    %582 = vector.broadcast %cst_192 : f32 to vector<64x128xf32>
    %583 = arith.subf %581, %582 : vector<64x128xf32>
    %584 = math.absf %583 : vector<64x128xf32>
    %cst_193 = arith.constant 1.000000e+00 : f32
    %585 = vector.broadcast %cst_193 : f32 to vector<64x128xf32>
    %586 = arith.subf %585, %584 : vector<64x128xf32>
    %cst_194 = arith.constant 0.000000e+00 : f32
    %587 = vector.broadcast %cst_194 : f32 to vector<64x128xf32>
    %588 = arith.maximumf %587, %586 : vector<64x128xf32>
    %cst_195 = arith.constant 2.000000e+00 : f32
    %589 = vector.broadcast %cst_195 : f32 to vector<64x128xf32>
    %590 = arith.subf %581, %589 : vector<64x128xf32>
    %591 = math.absf %590 : vector<64x128xf32>
    %cst_196 = arith.constant 1.000000e+00 : f32
    %592 = vector.broadcast %cst_196 : f32 to vector<64x128xf32>
    %593 = arith.subf %592, %591 : vector<64x128xf32>
    %cst_197 = arith.constant 0.000000e+00 : f32
    %594 = vector.broadcast %cst_197 : f32 to vector<64x128xf32>
    %595 = arith.maximumf %594, %593 : vector<64x128xf32>
    %cst_198 = arith.constant 3.000000e+00 : f32
    %596 = vector.broadcast %cst_198 : f32 to vector<64x128xf32>
    %597 = arith.subf %581, %596 : vector<64x128xf32>
    %598 = math.absf %597 : vector<64x128xf32>
    %cst_199 = arith.constant 1.000000e+00 : f32
    %599 = vector.broadcast %cst_199 : f32 to vector<64x128xf32>
    %600 = arith.subf %599, %598 : vector<64x128xf32>
    %cst_200 = arith.constant 0.000000e+00 : f32
    %601 = vector.broadcast %cst_200 : f32 to vector<64x128xf32>
    %602 = arith.maximumf %601, %600 : vector<64x128xf32>
    %cst_201 = arith.constant 4.000000e+00 : f32
    %603 = vector.broadcast %cst_201 : f32 to vector<64x128xf32>
    %604 = arith.subf %581, %603 : vector<64x128xf32>
    %605 = math.absf %604 : vector<64x128xf32>
    %cst_202 = arith.constant 1.000000e+00 : f32
    %606 = vector.broadcast %cst_202 : f32 to vector<64x128xf32>
    %607 = arith.subf %606, %605 : vector<64x128xf32>
    %cst_203 = arith.constant 0.000000e+00 : f32
    %608 = vector.broadcast %cst_203 : f32 to vector<64x128xf32>
    %609 = arith.maximumf %608, %607 : vector<64x128xf32>
    %cst_204 = arith.constant 5.000000e+00 : f32
    %610 = vector.broadcast %cst_204 : f32 to vector<64x128xf32>
    %611 = arith.subf %581, %610 : vector<64x128xf32>
    %612 = math.absf %611 : vector<64x128xf32>
    %cst_205 = arith.constant 1.000000e+00 : f32
    %613 = vector.broadcast %cst_205 : f32 to vector<64x128xf32>
    %614 = arith.subf %613, %612 : vector<64x128xf32>
    %cst_206 = arith.constant 0.000000e+00 : f32
    %615 = vector.broadcast %cst_206 : f32 to vector<64x128xf32>
    %616 = arith.maximumf %615, %614 : vector<64x128xf32>
    %cst_207 = arith.constant 6.000000e+00 : f32
    %617 = vector.broadcast %cst_207 : f32 to vector<64x128xf32>
    %618 = arith.subf %581, %617 : vector<64x128xf32>
    %619 = math.absf %618 : vector<64x128xf32>
    %cst_208 = arith.constant 1.000000e+00 : f32
    %620 = vector.broadcast %cst_208 : f32 to vector<64x128xf32>
    %621 = arith.subf %620, %619 : vector<64x128xf32>
    %cst_209 = arith.constant 0.000000e+00 : f32
    %622 = vector.broadcast %cst_209 : f32 to vector<64x128xf32>
    %623 = arith.maximumf %622, %621 : vector<64x128xf32>
    %cst_210 = arith.constant 7.000000e+00 : f32
    %624 = vector.broadcast %cst_210 : f32 to vector<64x128xf32>
    %625 = arith.subf %581, %624 : vector<64x128xf32>
    %626 = math.absf %625 : vector<64x128xf32>
    %cst_211 = arith.constant 1.000000e+00 : f32
    %627 = vector.broadcast %cst_211 : f32 to vector<64x128xf32>
    %628 = arith.subf %627, %626 : vector<64x128xf32>
    %cst_212 = arith.constant 0.000000e+00 : f32
    %629 = vector.broadcast %cst_212 : f32 to vector<64x128xf32>
    %630 = arith.maximumf %629, %628 : vector<64x128xf32>
    %cst_213 = arith.constant 8.000000e+00 : f32
    %631 = vector.broadcast %cst_213 : f32 to vector<64x128xf32>
    %632 = arith.subf %581, %631 : vector<64x128xf32>
    %633 = math.absf %632 : vector<64x128xf32>
    %cst_214 = arith.constant 1.000000e+00 : f32
    %634 = vector.broadcast %cst_214 : f32 to vector<64x128xf32>
    %635 = arith.subf %634, %633 : vector<64x128xf32>
    %cst_215 = arith.constant 0.000000e+00 : f32
    %636 = vector.broadcast %cst_215 : f32 to vector<64x128xf32>
    %637 = arith.maximumf %636, %635 : vector<64x128xf32>
    %cst_216 = arith.constant 9.000000e+00 : f32
    %638 = vector.broadcast %cst_216 : f32 to vector<64x128xf32>
    %639 = arith.subf %581, %638 : vector<64x128xf32>
    %640 = math.absf %639 : vector<64x128xf32>
    %cst_217 = arith.constant 1.000000e+00 : f32
    %641 = vector.broadcast %cst_217 : f32 to vector<64x128xf32>
    %642 = arith.subf %641, %640 : vector<64x128xf32>
    %cst_218 = arith.constant 0.000000e+00 : f32
    %643 = vector.broadcast %cst_218 : f32 to vector<64x128xf32>
    %644 = arith.maximumf %643, %642 : vector<64x128xf32>
    %cst_219 = arith.constant 1.000000e+01 : f32
    %645 = vector.broadcast %cst_219 : f32 to vector<64x128xf32>
    %646 = arith.subf %581, %645 : vector<64x128xf32>
    %647 = math.absf %646 : vector<64x128xf32>
    %cst_220 = arith.constant 1.000000e+00 : f32
    %648 = vector.broadcast %cst_220 : f32 to vector<64x128xf32>
    %649 = arith.subf %648, %647 : vector<64x128xf32>
    %cst_221 = arith.constant 0.000000e+00 : f32
    %650 = vector.broadcast %cst_221 : f32 to vector<64x128xf32>
    %651 = arith.maximumf %650, %649 : vector<64x128xf32>
    %cst_222 = arith.constant 0.000000e+00 : f32
    %652 = vector.broadcast %cst_222 : f32 to vector<64x128xf32>
    %653 = arith.subf %581, %652 : vector<64x128xf32>
    %654 = arith.mulf %653, %588 : vector<64x128xf32>
    %cst_223 = arith.constant 3.000000e+00 : f32
    %655 = vector.broadcast %cst_223 : f32 to vector<64x128xf32>
    %656 = arith.subf %581, %655 : vector<64x128xf32>
    %657 = arith.mulf %656, %595 : vector<64x128xf32>
    %658 = arith.subf %654, %657 : vector<64x128xf32>
    %cst_224 = arith.constant 5.000000e-01 : f32
    %659 = vector.broadcast %cst_224 : f32 to vector<64x128xf32>
    %660 = arith.mulf %659, %658 : vector<64x128xf32>
    %cst_225 = arith.constant 1.000000e+00 : f32
    %661 = vector.broadcast %cst_225 : f32 to vector<64x128xf32>
    %662 = arith.subf %581, %661 : vector<64x128xf32>
    %663 = arith.mulf %662, %595 : vector<64x128xf32>
    %cst_226 = arith.constant 4.000000e+00 : f32
    %664 = vector.broadcast %cst_226 : f32 to vector<64x128xf32>
    %665 = arith.subf %581, %664 : vector<64x128xf32>
    %666 = arith.mulf %665, %602 : vector<64x128xf32>
    %667 = arith.subf %663, %666 : vector<64x128xf32>
    %cst_227 = arith.constant 5.000000e-01 : f32
    %668 = vector.broadcast %cst_227 : f32 to vector<64x128xf32>
    %669 = arith.mulf %668, %667 : vector<64x128xf32>
    %cst_228 = arith.constant 2.000000e+00 : f32
    %670 = vector.broadcast %cst_228 : f32 to vector<64x128xf32>
    %671 = arith.subf %581, %670 : vector<64x128xf32>
    %672 = arith.mulf %671, %602 : vector<64x128xf32>
    %cst_229 = arith.constant 5.000000e+00 : f32
    %673 = vector.broadcast %cst_229 : f32 to vector<64x128xf32>
    %674 = arith.subf %581, %673 : vector<64x128xf32>
    %675 = arith.mulf %674, %609 : vector<64x128xf32>
    %676 = arith.subf %672, %675 : vector<64x128xf32>
    %cst_230 = arith.constant 5.000000e-01 : f32
    %677 = vector.broadcast %cst_230 : f32 to vector<64x128xf32>
    %678 = arith.mulf %677, %676 : vector<64x128xf32>
    %cst_231 = arith.constant 3.000000e+00 : f32
    %679 = vector.broadcast %cst_231 : f32 to vector<64x128xf32>
    %680 = arith.subf %581, %679 : vector<64x128xf32>
    %681 = arith.mulf %680, %609 : vector<64x128xf32>
    %cst_232 = arith.constant 6.000000e+00 : f32
    %682 = vector.broadcast %cst_232 : f32 to vector<64x128xf32>
    %683 = arith.subf %581, %682 : vector<64x128xf32>
    %684 = arith.mulf %683, %616 : vector<64x128xf32>
    %685 = arith.subf %681, %684 : vector<64x128xf32>
    %cst_233 = arith.constant 5.000000e-01 : f32
    %686 = vector.broadcast %cst_233 : f32 to vector<64x128xf32>
    %687 = arith.mulf %686, %685 : vector<64x128xf32>
    %cst_234 = arith.constant 4.000000e+00 : f32
    %688 = vector.broadcast %cst_234 : f32 to vector<64x128xf32>
    %689 = arith.subf %581, %688 : vector<64x128xf32>
    %690 = arith.mulf %689, %616 : vector<64x128xf32>
    %cst_235 = arith.constant 7.000000e+00 : f32
    %691 = vector.broadcast %cst_235 : f32 to vector<64x128xf32>
    %692 = arith.subf %581, %691 : vector<64x128xf32>
    %693 = arith.mulf %692, %623 : vector<64x128xf32>
    %694 = arith.subf %690, %693 : vector<64x128xf32>
    %cst_236 = arith.constant 5.000000e-01 : f32
    %695 = vector.broadcast %cst_236 : f32 to vector<64x128xf32>
    %696 = arith.mulf %695, %694 : vector<64x128xf32>
    %cst_237 = arith.constant 5.000000e+00 : f32
    %697 = vector.broadcast %cst_237 : f32 to vector<64x128xf32>
    %698 = arith.subf %581, %697 : vector<64x128xf32>
    %699 = arith.mulf %698, %623 : vector<64x128xf32>
    %cst_238 = arith.constant 8.000000e+00 : f32
    %700 = vector.broadcast %cst_238 : f32 to vector<64x128xf32>
    %701 = arith.subf %581, %700 : vector<64x128xf32>
    %702 = arith.mulf %701, %630 : vector<64x128xf32>
    %703 = arith.subf %699, %702 : vector<64x128xf32>
    %cst_239 = arith.constant 5.000000e-01 : f32
    %704 = vector.broadcast %cst_239 : f32 to vector<64x128xf32>
    %705 = arith.mulf %704, %703 : vector<64x128xf32>
    %cst_240 = arith.constant 6.000000e+00 : f32
    %706 = vector.broadcast %cst_240 : f32 to vector<64x128xf32>
    %707 = arith.subf %581, %706 : vector<64x128xf32>
    %708 = arith.mulf %707, %630 : vector<64x128xf32>
    %cst_241 = arith.constant 9.000000e+00 : f32
    %709 = vector.broadcast %cst_241 : f32 to vector<64x128xf32>
    %710 = arith.subf %581, %709 : vector<64x128xf32>
    %711 = arith.mulf %710, %637 : vector<64x128xf32>
    %712 = arith.subf %708, %711 : vector<64x128xf32>
    %cst_242 = arith.constant 5.000000e-01 : f32
    %713 = vector.broadcast %cst_242 : f32 to vector<64x128xf32>
    %714 = arith.mulf %713, %712 : vector<64x128xf32>
    %cst_243 = arith.constant 7.000000e+00 : f32
    %715 = vector.broadcast %cst_243 : f32 to vector<64x128xf32>
    %716 = arith.subf %581, %715 : vector<64x128xf32>
    %717 = arith.mulf %716, %637 : vector<64x128xf32>
    %cst_244 = arith.constant 1.000000e+01 : f32
    %718 = vector.broadcast %cst_244 : f32 to vector<64x128xf32>
    %719 = arith.subf %581, %718 : vector<64x128xf32>
    %720 = arith.mulf %719, %644 : vector<64x128xf32>
    %721 = arith.subf %717, %720 : vector<64x128xf32>
    %cst_245 = arith.constant 5.000000e-01 : f32
    %722 = vector.broadcast %cst_245 : f32 to vector<64x128xf32>
    %723 = arith.mulf %722, %721 : vector<64x128xf32>
    %cst_246 = arith.constant 8.000000e+00 : f32
    %724 = vector.broadcast %cst_246 : f32 to vector<64x128xf32>
    %725 = arith.subf %581, %724 : vector<64x128xf32>
    %726 = arith.mulf %725, %644 : vector<64x128xf32>
    %cst_247 = arith.constant 1.100000e+01 : f32
    %727 = vector.broadcast %cst_247 : f32 to vector<64x128xf32>
    %728 = arith.subf %581, %727 : vector<64x128xf32>
    %729 = arith.mulf %728, %651 : vector<64x128xf32>
    %730 = arith.subf %726, %729 : vector<64x128xf32>
    %cst_248 = arith.constant 5.000000e-01 : f32
    %731 = vector.broadcast %cst_248 : f32 to vector<64x128xf32>
    %732 = arith.mulf %731, %730 : vector<64x128xf32>
    %733 = vector.extract_strided_slice %566 {offsets = [0, 3], sizes = [64, 8], strides = [1, 1]} : vector<64x11xf32> to vector<64x8xf32>
    %cst_249 = arith.constant 0.000000e+00 : f32
    %734 = vector.broadcast %cst_249 : f32 to vector<64x128xf32>
    %735 = arith.subf %581, %734 : vector<64x128xf32>
    %736 = arith.mulf %735, %660 : vector<64x128xf32>
    %cst_250 = arith.constant 4.000000e+00 : f32
    %737 = vector.broadcast %cst_250 : f32 to vector<64x128xf32>
    %738 = arith.subf %581, %737 : vector<64x128xf32>
    %739 = arith.mulf %738, %669 : vector<64x128xf32>
    %740 = arith.subf %736, %739 : vector<64x128xf32>
    %cst_251 = arith.constant 0.333333343 : f32
    %741 = vector.broadcast %cst_251 : f32 to vector<64x128xf32>
    %742 = arith.mulf %741, %740 : vector<64x128xf32>
    %743 = vector.extract_strided_slice %733 {offsets = [0, 0], sizes = [64, 1], strides = [1, 1]} : vector<64x8xf32> to vector<64x1xf32>
    %744 = vector.broadcast %743 : vector<64x1xf32> to vector<64x128xf32>
    %745 = arith.mulf %744, %742 : vector<64x128xf32>
    %cst_252 = arith.constant 1.000000e+00 : f32
    %746 = vector.broadcast %cst_252 : f32 to vector<64x128xf32>
    %747 = arith.subf %581, %746 : vector<64x128xf32>
    %748 = arith.mulf %747, %669 : vector<64x128xf32>
    %cst_253 = arith.constant 5.000000e+00 : f32
    %749 = vector.broadcast %cst_253 : f32 to vector<64x128xf32>
    %750 = arith.subf %581, %749 : vector<64x128xf32>
    %751 = arith.mulf %750, %678 : vector<64x128xf32>
    %752 = arith.subf %748, %751 : vector<64x128xf32>
    %cst_254 = arith.constant 0.333333343 : f32
    %753 = vector.broadcast %cst_254 : f32 to vector<64x128xf32>
    %754 = arith.mulf %753, %752 : vector<64x128xf32>
    %755 = vector.extract_strided_slice %733 {offsets = [0, 1], sizes = [64, 1], strides = [1, 1]} : vector<64x8xf32> to vector<64x1xf32>
    %756 = vector.broadcast %755 : vector<64x1xf32> to vector<64x128xf32>
    %757 = arith.mulf %756, %754 : vector<64x128xf32>
    %758 = arith.addf %745, %757 : vector<64x128xf32>
    %cst_255 = arith.constant 2.000000e+00 : f32
    %759 = vector.broadcast %cst_255 : f32 to vector<64x128xf32>
    %760 = arith.subf %581, %759 : vector<64x128xf32>
    %761 = arith.mulf %760, %678 : vector<64x128xf32>
    %cst_256 = arith.constant 6.000000e+00 : f32
    %762 = vector.broadcast %cst_256 : f32 to vector<64x128xf32>
    %763 = arith.subf %581, %762 : vector<64x128xf32>
    %764 = arith.mulf %763, %687 : vector<64x128xf32>
    %765 = arith.subf %761, %764 : vector<64x128xf32>
    %cst_257 = arith.constant 0.333333343 : f32
    %766 = vector.broadcast %cst_257 : f32 to vector<64x128xf32>
    %767 = arith.mulf %766, %765 : vector<64x128xf32>
    %768 = vector.extract_strided_slice %733 {offsets = [0, 2], sizes = [64, 1], strides = [1, 1]} : vector<64x8xf32> to vector<64x1xf32>
    %769 = vector.broadcast %768 : vector<64x1xf32> to vector<64x128xf32>
    %770 = arith.mulf %769, %767 : vector<64x128xf32>
    %771 = arith.addf %758, %770 : vector<64x128xf32>
    %cst_258 = arith.constant 3.000000e+00 : f32
    %772 = vector.broadcast %cst_258 : f32 to vector<64x128xf32>
    %773 = arith.subf %581, %772 : vector<64x128xf32>
    %774 = arith.mulf %773, %687 : vector<64x128xf32>
    %cst_259 = arith.constant 7.000000e+00 : f32
    %775 = vector.broadcast %cst_259 : f32 to vector<64x128xf32>
    %776 = arith.subf %581, %775 : vector<64x128xf32>
    %777 = arith.mulf %776, %696 : vector<64x128xf32>
    %778 = arith.subf %774, %777 : vector<64x128xf32>
    %cst_260 = arith.constant 0.333333343 : f32
    %779 = vector.broadcast %cst_260 : f32 to vector<64x128xf32>
    %780 = arith.mulf %779, %778 : vector<64x128xf32>
    %781 = vector.extract_strided_slice %733 {offsets = [0, 3], sizes = [64, 1], strides = [1, 1]} : vector<64x8xf32> to vector<64x1xf32>
    %782 = vector.broadcast %781 : vector<64x1xf32> to vector<64x128xf32>
    %783 = arith.mulf %782, %780 : vector<64x128xf32>
    %784 = arith.addf %771, %783 : vector<64x128xf32>
    %cst_261 = arith.constant 4.000000e+00 : f32
    %785 = vector.broadcast %cst_261 : f32 to vector<64x128xf32>
    %786 = arith.subf %581, %785 : vector<64x128xf32>
    %787 = arith.mulf %786, %696 : vector<64x128xf32>
    %cst_262 = arith.constant 8.000000e+00 : f32
    %788 = vector.broadcast %cst_262 : f32 to vector<64x128xf32>
    %789 = arith.subf %581, %788 : vector<64x128xf32>
    %790 = arith.mulf %789, %705 : vector<64x128xf32>
    %791 = arith.subf %787, %790 : vector<64x128xf32>
    %cst_263 = arith.constant 0.333333343 : f32
    %792 = vector.broadcast %cst_263 : f32 to vector<64x128xf32>
    %793 = arith.mulf %792, %791 : vector<64x128xf32>
    %794 = vector.extract_strided_slice %733 {offsets = [0, 4], sizes = [64, 1], strides = [1, 1]} : vector<64x8xf32> to vector<64x1xf32>
    %795 = vector.broadcast %794 : vector<64x1xf32> to vector<64x128xf32>
    %796 = arith.mulf %795, %793 : vector<64x128xf32>
    %797 = arith.addf %784, %796 : vector<64x128xf32>
    %cst_264 = arith.constant 5.000000e+00 : f32
    %798 = vector.broadcast %cst_264 : f32 to vector<64x128xf32>
    %799 = arith.subf %581, %798 : vector<64x128xf32>
    %800 = arith.mulf %799, %705 : vector<64x128xf32>
    %cst_265 = arith.constant 9.000000e+00 : f32
    %801 = vector.broadcast %cst_265 : f32 to vector<64x128xf32>
    %802 = arith.subf %581, %801 : vector<64x128xf32>
    %803 = arith.mulf %802, %714 : vector<64x128xf32>
    %804 = arith.subf %800, %803 : vector<64x128xf32>
    %cst_266 = arith.constant 0.333333343 : f32
    %805 = vector.broadcast %cst_266 : f32 to vector<64x128xf32>
    %806 = arith.mulf %805, %804 : vector<64x128xf32>
    %807 = vector.extract_strided_slice %733 {offsets = [0, 5], sizes = [64, 1], strides = [1, 1]} : vector<64x8xf32> to vector<64x1xf32>
    %808 = vector.broadcast %807 : vector<64x1xf32> to vector<64x128xf32>
    %809 = arith.mulf %808, %806 : vector<64x128xf32>
    %810 = arith.addf %797, %809 : vector<64x128xf32>
    %cst_267 = arith.constant 6.000000e+00 : f32
    %811 = vector.broadcast %cst_267 : f32 to vector<64x128xf32>
    %812 = arith.subf %581, %811 : vector<64x128xf32>
    %813 = arith.mulf %812, %714 : vector<64x128xf32>
    %cst_268 = arith.constant 1.000000e+01 : f32
    %814 = vector.broadcast %cst_268 : f32 to vector<64x128xf32>
    %815 = arith.subf %581, %814 : vector<64x128xf32>
    %816 = arith.mulf %815, %723 : vector<64x128xf32>
    %817 = arith.subf %813, %816 : vector<64x128xf32>
    %cst_269 = arith.constant 0.333333343 : f32
    %818 = vector.broadcast %cst_269 : f32 to vector<64x128xf32>
    %819 = arith.mulf %818, %817 : vector<64x128xf32>
    %820 = vector.extract_strided_slice %733 {offsets = [0, 6], sizes = [64, 1], strides = [1, 1]} : vector<64x8xf32> to vector<64x1xf32>
    %821 = vector.broadcast %820 : vector<64x1xf32> to vector<64x128xf32>
    %822 = arith.mulf %821, %819 : vector<64x128xf32>
    %823 = arith.addf %810, %822 : vector<64x128xf32>
    %cst_270 = arith.constant 7.000000e+00 : f32
    %824 = vector.broadcast %cst_270 : f32 to vector<64x128xf32>
    %825 = arith.subf %581, %824 : vector<64x128xf32>
    %826 = arith.mulf %825, %723 : vector<64x128xf32>
    %cst_271 = arith.constant 1.100000e+01 : f32
    %827 = vector.broadcast %cst_271 : f32 to vector<64x128xf32>
    %828 = arith.subf %581, %827 : vector<64x128xf32>
    %829 = arith.mulf %828, %732 : vector<64x128xf32>
    %830 = arith.subf %826, %829 : vector<64x128xf32>
    %cst_272 = arith.constant 0.333333343 : f32
    %831 = vector.broadcast %cst_272 : f32 to vector<64x128xf32>
    %832 = arith.mulf %831, %830 : vector<64x128xf32>
    %833 = vector.extract_strided_slice %733 {offsets = [0, 7], sizes = [64, 1], strides = [1, 1]} : vector<64x8xf32> to vector<64x1xf32>
    %834 = vector.broadcast %833 : vector<64x1xf32> to vector<64x128xf32>
    %835 = arith.mulf %834, %832 : vector<64x128xf32>
    %836 = arith.addf %823, %835 : vector<64x128xf32>
    %837 = vector.extract_strided_slice %566 {offsets = [0, 1], sizes = [64, 1], strides = [1, 1]} : vector<64x11xf32> to vector<64x1xf32>
    %838 = vector.broadcast %837 : vector<64x1xf32> to vector<64x128xf32>
    %839 = arith.mulf %838, %577 : vector<64x128xf32>
    %840 = vector.extract_strided_slice %566 {offsets = [0, 2], sizes = [64, 1], strides = [1, 1]} : vector<64x11xf32> to vector<64x1xf32>
    %841 = vector.broadcast %840 : vector<64x1xf32> to vector<64x128xf32>
    %842 = arith.mulf %841, %836 : vector<64x128xf32>
    %843 = arith.addf %839, %842 : vector<64x128xf32>
    %c0_273 = arith.constant 0 : index
    %c0_274 = arith.constant 0 : index
    %844 = vector.load %arg9[%c0_273, %c0_274] : memref<3x64xf32, #tpu.memory_space<vmem>>, vector<3x64xf32>
    %cst_275 = arith.constant dense<0.000000e+00> : vector<3x128xf32>
    %845 = tpu.matmul %844, %843, %cst_275 {dimension_numbers = #tpu.dot_dimension_numbers<[1], [0], [0], [1], [0, 0, 1, 1], [], []>} : vector<3x64xf32>, vector<64x128xf32>, vector<3x128xf32> -> vector<3x128xf32>
    %c0_276 = arith.constant 0 : index
    %c0_277 = arith.constant 0 : index
    %846 = vector.load %arg10[%c0_276, %c0_277] : memref<3x1xf32, #tpu.memory_space<vmem>>, vector<3x1xf32>
    %847 = vector.broadcast %846 : vector<3x1xf32> to vector<3x128xf32>
    %848 = arith.addf %845, %847 : vector<3x128xf32>
    %c0_278 = arith.constant 0 : index
    %c0_279 = arith.constant 0 : index
    %c0_280 = arith.constant 0 : index
    %849 = vector.load %arg11[%c0_278, %c0_279, %c0_280] : memref<1x3x128xf32, #tpu.memory_space<vmem>>, vector<1x3x128xf32>
    %850 = vector.shape_cast %849 : vector<1x3x128xf32> to vector<3x128xf32>
    %851 = vector.shape_cast %848 : vector<3x128xf32> to vector<1x3x128xf32>
    tpu.vector_store %arg11[%c0_278, %c0_279, %c0_280], %851 {strides = array<i32>} : memref<1x3x128xf32, #tpu.memory_space<vmem>>, vector<1x3x128xf32>,
    return
  }
  func.func @transform_0(%arg0: i32, %arg1: i32) -> (i32, i32, i32) {
    %c0_i32 = arith.constant 0 : i32
    %c0_i32_0 = arith.constant 0 : i32
    return %arg0, %c0_i32, %arg1 : i32, i32, i32
  }
  func.func @transform_1(%arg0: i32, %arg1: i32) -> (i32, i32) {
    %c0_i32 = arith.constant 0 : i32
    %c0_i32_0 = arith.constant 0 : i32
    %c0_i32_1 = arith.constant 0 : i32
    return %c0_i32, %c0_i32_0 : i32, i32
  }
  func.func @transform_2(%arg0: i32, %arg1: i32) -> (i32, i32) {
    %c0_i32 = arith.constant 0 : i32
    %c0_i32_0 = arith.constant 0 : i32
    %c0_i32_1 = arith.constant 0 : i32
    return %c0_i32, %c0_i32_0 : i32, i32
  }
  func.func @transform_3(%arg0: i32, %arg1: i32) -> (i32, i32) {
    %c0_i32 = arith.constant 0 : i32
    %c0_i32_0 = arith.constant 0 : i32
    %c0_i32_1 = arith.constant 0 : i32
    return %c0_i32, %c0_i32_0 : i32, i32
  }
  func.func @transform_4(%arg0: i32, %arg1: i32) -> (i32, i32) {
    %c0_i32 = arith.constant 0 : i32
    %c0_i32_0 = arith.constant 0 : i32
    %c0_i32_1 = arith.constant 0 : i32
    return %c0_i32, %c0_i32_0 : i32, i32
  }
  func.func @transform_5(%arg0: i32, %arg1: i32) -> (i32, i32) {
    %c0_i32 = arith.constant 0 : i32
    %c0_i32_0 = arith.constant 0 : i32
    %c0_i32_1 = arith.constant 0 : i32
    return %c0_i32, %c0_i32_0 : i32, i32
  }
  func.func @transform_6(%arg0: i32, %arg1: i32) -> (i32, i32) {
    %c0_i32 = arith.constant 0 : i32
    %c0_i32_0 = arith.constant 0 : i32
    %c0_i32_1 = arith.constant 0 : i32
    return %c0_i32, %c0_i32_0 : i32, i32
  }
  func.func @transform_7(%arg0: i32, %arg1: i32) -> (i32, i32) {
    %c0_i32 = arith.constant 0 : i32
    %c0_i32_0 = arith.constant 0 : i32
    %c0_i32_1 = arith.constant 0 : i32
    return %c0_i32, %c0_i32_0 : i32, i32
  }
  func.func @transform_8(%arg0: i32, %arg1: i32) -> (i32, i32) {
    %c0_i32 = arith.constant 0 : i32
    %c0_i32_0 = arith.constant 0 : i32
    %c0_i32_1 = arith.constant 0 : i32
    return %c0_i32, %c0_i32_0 : i32, i32
  }
  func.func @transform_9(%arg0: i32, %arg1: i32) -> (i32, i32, i32) {
    %c0_i32 = arith.constant 0 : i32
    %c0_i32_0 = arith.constant 0 : i32
    return %arg0, %c0_i32, %arg1 : i32, i32, i32
  }
}

</mosaic_0001>

<bundles_post_ra>
// kernel: ckan_segmentation_forward.1
= control target key start
LH: loop header
LB: loop body
LE: loop exit
PB: predicated region body
PF: predicated region fallthrough
CT: control target
= control target key end

     0   :  { %s3618_s30 = smov 0   ;;  %s3620_s10 = smov 0   ;;  %s5939_s0 = inlined_call_operand.vmem [shape: f32[2,1,256], index: 0, kind: input, shape index: {}]   ;;  %s5940_s1 = inlined_call_operand.vmem [shape: f32[16,1], index: 1, kind: input, shape index: {}]   ;;  %s5941_s2 = inlined_call_operand.vmem [shape: f32[16,11], index: 2, kind: input, shape index: {}]   ;;  %s5942_s3 = inlined_call_operand.vmem [shape: f32[32,16], index: 3, kind: input, shape index: {}]   ;;  %s5943_s4 = inlined_call_operand.vmem [shape: f32[32,11], index: 4, kind: input, shape index: {}]   ;;  %s5944_s5 = inlined_call_operand.vmem [shape: f32[64,32], index: 5, kind: input, shape index: {}]   ;;  %s5945_s6 = inlined_call_operand.vmem [shape: f32[64,11], index: 6, kind: input, shape index: {}]   ;;  %s5946_s7 = inlined_call_operand.vmem [shape: f32[3,64], index: 7, kind: input, shape index: {}]   ;;  %s5947_s8 = inlined_call_operand.vmem [shape: f32[3,1], index: 8, kind: input, shape index: {}]   ;;  %s5948_s9 = inlined_call_operand.vmem [shape: f32[2,3,256], index: 9, kind: output, shape index: {}]  }
   0x1   :  { %s3622_s11 = smov 0   ;;  %s3624_s12 = smov 0  }
   0x2   :  { %s3626_s13 = smov 0  }
   0x3 LB: > { %s28_s14 = sadd.s32 1, %s3547_s11  ;;  %s31_s15 = sadd.s32 1, %s3551_s12  ;;  %s3555_s13 = sphi %s3626_s13, %s19_s13   ;;  %s3551_s12 = sphi %s3624_s12, %s6253_s12   ;;  %s3547_s11 = sphi %s3622_s11, %s6252_s11   ;;  %s3543_s10 = sphi %s3620_s10, %s6251_s10   ;;  %s3539_s30 = sphi %s3618_s30, %s6250_s30  }
   0x4   : > { %p29_p0 = scmp.ge.s32.totalorder %s28_s14, 2  ;;  %p3140_p1 = scmp.ge.s32.totalorder %s3555_s13, 1 }
   0x5   : > { %p305_p2 = scmp.lt.s32.totalorder %s3555_s13, 5 }
   0x6   : > { %s6255_s14 = smov (%p29_p0, %s28_s14), 0  ;;  %s6257_s15 = smov (!%p29_p0, %s31_s15), %s3551_s12 }
   0x7   : > { %p306_p3 = pnand %p3140_p1, %p305_p2  ;;  %p33_p4 = scmp.ge.s32.totalorder %s6257_s15, 2 }
   0x9   : > { %s6259_s15 = smov (%p33_p4, %s6257_s15), 0  ;;  %309 = sbr.rel (%p306_p3) target bundleno = 1057 (0x421), region = 56 }
   0xe   : > { %v3651_v0 = vld [vmem:[%s5941_s2] sm:$0xff]  ;;  %v5957_v2 = vmov 3   ;;  %v5955_v3 = vmov 0   ;;  %p346_p5 = scmp.lt.s32.totalorder %s3543_s10, 1  ;;  %p348_p6 = scmp.lt.s32.totalorder %s3539_s30, 1  ;;  %v380_v4 = vld [vmem:[%s5941_s2 + $0x8] sm:$0xff] }
   0xf   : > { %v362_v1 = vld [vmem:[%s5940_s1] sm:$0xff]  ;;  %3384 = vset.pattern.permute.xlu2 %v5957_v2  ;;  %3383 = vset.pattern.permute.xlu1 %v5955_v3  ;;  %v363_v5 = vld [vmem:[%s5940_s1 + $0x8] sm:$0xff]  ;;  %v5951_v6 = vmov 5   ;;  %v5953_v7 = vmov 4   ;;  %v5949_v8 = vmov 6   ;;  %v5961_v9 = vmov 7  }
  0x10   : > { %3382 = vset.pattern.permute.xlu0 %v5955_v3  ;;  %570 = vperm.xlu2 %3384, %v3651_v0   ;;  %s6261_s10 = smov (!%p346_p5, %s3543_s10), 1  ;;  %s6263_s30 = smov (!%p348_p6, %s3539_s30), 1  ;;  %v5967_v10 = vmov 9   ;;  %v5970_v11 = vmov 8   ;;  %v5963_v12 = vmov 1   ;;  %v5965_v13 = vmov 10  }
  0x11   : > { %383 = vperm.xlu1 %3383, %v3651_v0   ;;  %366 = vperm.xlu0 %3382, %v362_v1   ;;  %s3141_s20 = sshll.u32 %s6261_s10, 1  ;;  %v3697_v14 = vld [vmem:[%s5943_s4] sm:$0xff]  ;;  %v3707_v15 = vld [vmem:[%s5943_s4 + $0x8] sm:$0xff]  ;;  %v5959_v16 = vmov 2   ;;  %v3717_v17 = vld [vmem:[%s5943_s4 + $0x10] sm:$0xff]  ;;  %vm769_vm0 = vcmask 130048  }
  0x12   : > { %s3661_s21 = sadd.s32 %s3141_s20, %s6263_s30  ;;  %v3728_v18 = vld [vmem:[%s5943_s4 + $0x18] sm:$0xff]  ;;  %vm1563_vm1 = vcmask 261120   ;;  %vm3028_vm2 = vcmask 523264  }
  0x13   : > { %s352_s26 = scalar_lea.vmem %s5939_s0, %s3661_s21  ;;  %s3143_s22 = sshll.u32 %s3661_s21, 2 }
  0x14   : > { %v3481_v19 = vld [vmem:[%s352_s26] ss:$0 sm:$0xff]  ;;  %s360_s25 = scalar_lea.vmem %s5948_s9, %s3143_s22 }
  0x18   : > { %574 = vperm.xlu2 %3384, %v380_v4  }
  0x19   : > { %388 = vperm.xlu1 %3383, %v380_v4   ;;  %371 = vperm.xlu0 %3382, %v363_v5  }
  0x20   : > { %3387 = vset.pattern.permute.xlu2 %v5951_v6 }
  0x21   : > { %3386 = vset.pattern.permute.xlu1 %v5953_v7  ;;  %3385 = vset.pattern.permute.xlu0 %v5953_v7 }
  0x22   : > { %608 = vperm.xlu2 %3387, %v3651_v0   ;;  %592 = vperm.xlu1 %3386, %v380_v4  }
  0x23   : > { %588 = vperm.xlu0 %3385, %v3651_v0  }
  0x2a   : > { %3389 = vset.pattern.permute.xlu2 %v5949_v8  ;;  %3388 = vset.pattern.permute.xlu1 %v5951_v6 }
  0x2b   : > { %3390 = vset.pattern.permute.xlu0 %v5949_v8  ;;  %628 = vperm.xlu2 %3389, %v3651_v0  }
  0x2c   : > { %612 = vperm.xlu1 %3388, %v380_v4   ;;  %632 = vperm.xlu0 %3390, %v380_v4  }
  0x33   : > { %3392 = vset.pattern.permute.xlu2 %v5961_v9 }
  0x34   : > { %3391 = vset.pattern.permute.xlu1 %v5961_v9  ;;  %3395 = vset.pattern.permute.xlu0 %v5967_v10 }
  0x35   : > { %652 = vperm.xlu2 %3392, %v380_v4   ;;  %648 = vperm.xlu1 %3391, %v3651_v0  }
  0x36   : > { %688 = vperm.xlu0 %3395, %v3651_v0  }
  0x3d   : > { %3394 = vset.pattern.permute.xlu2 %v5970_v11  ;;  %3393 = vset.pattern.permute.xlu1 %v5970_v11 }
  0x3e   : > { %3400 = vset.pattern.permute.xlu0 %v5963_v12  ;;  %672 = vperm.xlu2 %3394, %v380_v4  }
  0x3f   : > { %668 = vperm.xlu1 %3393, %v3651_v0   ;;  %724 = vperm.xlu0 %3400, %v380_v4  }
  0x46   : > { %3397 = vset.pattern.permute.xlu2 %v5965_v13 }
  0x47   : > { %3396 = vset.pattern.permute.xlu1 %v5967_v10  ;;  %708 = vperm.xlu2 %3397, %v3651_v0  }
  0x48   : > { %692 = vperm.xlu1 %3396, %v380_v4   ;;  %3409 = vset.pattern.permute.xlu0 %v5951_v6 }
  0x49   : > { %1240 = vperm.xlu0 %3409, %v3697_v14  }
  0x4f   : > { %3399 = vset.pattern.permute.xlu2 %v5963_v12 }
  0x50   : > { %3398 = vset.pattern.permute.xlu1 %v5965_v13  ;;  %720 = vperm.xlu2 %3399, %v3651_v0  }
  0x51   : > { %712 = vperm.xlu1 %3398, %v380_v4   ;;  %3413 = vset.pattern.permute.xlu0 %v5949_v8 }
  0x52   : > { %1284 = vperm.xlu0 %3413, %v3707_v15  }
  0x58   : > { %3402 = vset.pattern.permute.xlu2 %v5959_v16 }
  0x59   : > { %3401 = vset.pattern.permute.xlu1 %v5959_v16  ;;  %734 = vperm.xlu2 %3402, %v380_v4  }
  0x5a   : > { %730 = vperm.xlu1 %3401, %v3651_v0   ;;  %3417 = vset.pattern.permute.xlu0 %v5961_v9 }
  0x5b   : > { %1328 = vperm.xlu0 %3417, %v3717_v17  }
  0x61   : > { %3404 = vset.pattern.permute.xlu2 %v5955_v3 }
  0x62   : > { %3403 = vset.pattern.permute.xlu1 %v5955_v3  ;;  %756 = vperm.xlu2 %3404, %v3707_v15  }
  0x63   : > { %751 = vperm.xlu1 %3403, %v3697_v14   ;;  %3420 = vset.pattern.permute.xlu0 %v5970_v11 }
  0x64   : > { %1372 = vperm.xlu0 %3420, %v3728_v18  }
  0x6a   : > { %3405 = vset.pattern.permute.xlu2 %v5957_v2  ;;  %v3762_v26 = vpop.permute.xlu2 %570 }
  0x6b   : > { %766 = vperm.xlu1 %3403, %v3728_v18   ;;  %1164 = vperm.xlu2 %3405, %v3697_v14  }
  0x6c   : > { %3423 = vset.pattern.permute.xlu0 %v5965_v13 }
  0x6d   : > { %1440 = vperm.xlu0 %3423, %v3697_v14  }
  0x72   : > { %v3798_v46 = vpop.permute.xlu2 %574 }
  0x73   : > { %3406 = vset.pattern.permute.xlu1 %v5957_v2  ;;  %1172 = vperm.xlu2 %3405, %v3717_v17  }
  0x74   : > { %1168 = vperm.xlu1 %3406, %v3707_v15  }
  0x75   : > { %3427 = vset.pattern.permute.xlu0 %v5963_v12 }
  0x76   : > { %1468 = vperm.xlu0 %3427, %v3707_v15  }
  0x7b   : > { %3408 = vset.pattern.permute.xlu2 %v5953_v7 }
  0x7c   : > { %3407 = vset.pattern.permute.xlu1 %v5953_v7  ;;  %1204 = vperm.xlu2 %3408, %v3707_v15  }
  0x7d   : > { %1200 = vperm.xlu1 %3407, %v3697_v14  }
  0x7e   : > { %3431 = vset.pattern.permute.xlu0 %v5959_v16 }
  0x7f   : > { %1492 = vperm.xlu0 %3431, %v3717_v17  }
  0x83   : > { %v367_v20 = vpop.permute.xlu0 %366  ;;  %v384_v21 = vpop.permute.xlu1 %383 }
  0x84   : > { %1212 = vperm.xlu2 %3408, %v3728_v18   ;;  %v377_v22 = vmul.f32 %v3481_v19, %v367_v20 }
  0x85   : > { %1208 = vperm.xlu1 %3407, %v3717_v17  }
  0x86   : > { %v3755_v23 = vadd.f32 %v384_v21, %v377_v22 }
  0x87   : > { %3432 = vset.pattern.permute.xlu0 %v5955_v3 }
  0x88   : > { %5999 = vst [vmem:[#allocation2_spill] sm:$0xff] %v3755_v23  ;;  %v3144_v24 = vadd.f32 2.2, %v3755_v23  ;;  %761 = vperm.xlu0 %3432, %v3717_v17  }
  0x8a   : > { %v3760_v25 = vmul.f32 2.5, %v3144_v24 }
  0x8b   : > { %v372_v27 = vpop.permute.xlu0 %371  ;;  %v389_v34 = vpop.permute.xlu1 %388 }
  0x8c   : > { %v3765_v28 = vadd.f32 -4.0, %v3760_v25  ;;  %v3768_v29 = vadd.f32 -5.0, %v3760_v25  ;;  %3411 = vset.pattern.permute.xlu2 %v5951_v6  ;;  %v3772_v30 = vadd.f32 -6.0, %v3760_v25  ;;  %v378_v31 = vmul.f32 %v3481_v19, %v372_v27 }
  0x8d   : > { %3410 = vset.pattern.permute.xlu1 %v5951_v6  ;;  %1248 = vperm.xlu2 %3411, %v3717_v17   ;;  %v3780_v35 = vadd.f32 -1.0, %v3760_v25  ;;  %v3785_v37 = vadd.f32 -2.0, %v3760_v25  ;;  %v3793_v43 = vadd.f32 -3.0, %v3760_v25  ;;  %v3837_v1 = vadd.f32 -7.0, %v3760_v25 }
  0x8e   : > { %v433_v32 = vand.u32 2147483647, %v3765_v28  ;;  %v441_v33 = vand.u32 2147483647, %v3768_v29  ;;  %1244 = vperm.xlu1 %3410, %v3707_v15   ;;  %v3782_v36 = vadd.f32 %v389_v34, %v378_v31  ;;  %v449_v40 = vand.u32 2147483647, %v3772_v30 }
  0x8f   : > { %v409_v42 = vand.u32 2147483647, %v3780_v35  ;;  %v417_v45 = vand.u32 2147483647, %v3785_v37  ;;  %v425_v55 = vand.u32 2147483647, %v3793_v43 }
  0x90   : > { %v3787_v38 = vsub.f32 1.0, %v433_v32  ;;  %v443_v39 = vsub.f32 1.0, %v441_v33  ;;  %v3145_v41 = vadd.f32 2.2, %v3782_v36  ;;  %v3801_v49 = vsub.f32 1.0, %v449_v40 }
  0x91   : > { %v411_v52 = vsub.f32 1.0, %v409_v42  ;;  %v419_v59 = vsub.f32 1.0, %v417_v45  ;;  %v427_v32 = vsub.f32 1.0, %v425_v55 }
  0x92   : > { %v3795_v44 = vmul.f32 2.5, %v3145_v41  ;;  %v437_v47 = vmax.f32 %v3787_v38, 0.0  ;;  %v445_v48 = vmax.f32 %v443_v39, 0.0  ;;  %v5972_v60 = vmax.f32 %v3801_v49, 0.0 }
  0x93   : > { %v413_v19 = vmax.f32 %v411_v52, 0.0  ;;  %v421_v40 = vmax.f32 %v419_v59, 0.0 }
  0x94   : > { %v3805_v50 = vadd.f32 -5.0, %v3795_v44  ;;  %v3809_v51 = vadd.f32 -1.0, %v3795_v44  ;;  %v3813_v53 = vadd.f32 -6.0, %v3795_v44  ;;  %v3816_v54 = vadd.f32 -7.0, %v3795_v44  ;;  %v3831_v63 = vpop.permute.xlu1 %592 }
  0x95   : > { %3412 = vset.pattern.permute.xlu2 %v5949_v8  ;;  %v3820_v56 = vadd.f32 -4.0, %v3795_v44  ;;  %v3824_v58 = vadd.f32 -2.0, %v3795_v44  ;;  %v511_v61 = vmul.f32 %v3793_v43, %v437_v47  ;;  %v513_v62 = vmul.f32 %v3772_v30, %v445_v48 }
  0x96   : > { %1252 = vperm.xlu1 %3410, %v3728_v18   ;;  %1280 = vperm.xlu2 %3412, %v3697_v14   ;;  %v410_v57 = vand.u32 2147483647, %v3809_v51  ;;  %v3834_v0 = vadd.f32 -3.0, %v3795_v44  ;;  %v442_v4 = vand.u32 2147483647, %v3805_v50  ;;  %v519_v34 = vmul.f32 %v3765_v28, %v445_v48 }
  0x97   : > { %v450_v20 = vand.u32 2147483647, %v3813_v53  ;;  %v458_v21 = vand.u32 2147483647, %v3816_v54  ;;  %v418_v22 = vand.u32 2147483647, %v3824_v58  ;;  %v515_v33 = vsub.f32 %v511_v61, %v513_v62 }
  0x98   : > { %v412_v5 = vsub.f32 1.0, %v410_v57  ;;  %v426_v27 = vand.u32 2147483647, %v3834_v0  ;;  %v434_v31 = vand.u32 2147483647, %v3820_v56  ;;  %v521_v39 = vmul.f32 %v3837_v1, %v5972_v60  ;;  %v3854_v57 = vpop.permute.xlu2 %608 }
  0x99   : > { %v420_v41 = vsub.f32 1.0, %v418_v22  ;;  %v487_v52 = vmul.f32 %v413_v19, %v3760_v25  ;;  %v3856_v55 = vsub.f32 1.0, %v442_v4  ;;  %v452_v48 = vsub.f32 1.0, %v450_v20 }
  0x9a   : > { %v414_v24 = vmax.f32 %v412_v5, 0.0  ;;  %v428_v42 = vsub.f32 1.0, %v426_v27  ;;  %v3849_v45 = vsub.f32 1.0, %v434_v31  ;;  %v3858_v61 = vsub.f32 1.0, %v458_v21 }
  0x9b   : > { %v422_v59 = vmax.f32 %v420_v41, 0.0  ;;  %v429_v19 = vmax.f32 %v427_v32, 0.0  ;;  %v523_v27 = vsub.f32 %v519_v34, %v521_v39  ;;  %v3864_v31 = vadd.f32 -8.0, %v3795_v44 }
  0x9c   : > { %v488_v62 = vmul.f32 %v414_v24, %v3795_v44  ;;  %v430_v5 = vmax.f32 %v428_v42, 0.0  ;;  %v438_v22 = vmax.f32 %v3849_v45, 0.0  ;;  %v495_v4 = vmul.f32 %v3780_v35, %v421_v40 }
  0x9d   : > { %v490_v20 = vmul.f32 %v3834_v0, %v422_v59  ;;  %v496_v21 = vmul.f32 %v3809_v51, %v422_v59  ;;  %v446_v42 = vmax.f32 %v3856_v55, 0.0  ;;  %v454_v45 = vmax.f32 %v452_v48, 0.0 }
  0x9e   : > { %3414 = vset.pattern.permute.xlu1 %v5949_v8  ;;  %1292 = vperm.xlu2 %3412, %v3728_v18   ;;  %v489_v8 = vmul.f32 %v3793_v43, %v421_v40  ;;  %v498_v24 = vmul.f32 %v3820_v56, %v430_v5  ;;  %v504_v41 = vmul.f32 %v3824_v58, %v430_v5  ;;  %v3874_v39 = vpop.permute.xlu1 %612  ;;  %v462_v6 = vmax.f32 %v3858_v61, 0.0 }
  0x9f   : > { %1288 = vperm.xlu1 %3414, %v3717_v17   ;;  %v506_v32 = vmul.f32 %v3805_v50, %v438_v22  ;;  %v492_v7 = vsub.f32 %v488_v62, %v490_v20  ;;  %v497_v40 = vmul.f32 %v3765_v28, %v429_v19  ;;  %v503_v3 = vmul.f32 %v3785_v37, %v429_v19 }
  0xa0   : > { %v491_v34 = vsub.f32 %v487_v52, %v489_v8  ;;  %v500_v59 = vsub.f32 %v496_v21, %v498_v24  ;;  %v505_v5 = vmul.f32 %v3768_v29, %v437_v47  ;;  %v517_v55 = vmul.f32 0.5, %v515_v33  ;;  %v3894_v20 = vpop.permute.xlu2 %628 }
  0xa1   : > { %v508_v2 = vsub.f32 %v504_v41, %v506_v32  ;;  %v3882_v48 = vmul.f32 0.5, %v523_v27  ;;  %v499_v16 = vsub.f32 %v495_v4, %v497_v40  ;;  %v466_v8 = vand.u32 2147483647, %v3864_v31 }
  0xa2   : > { %v520_v52 = vmul.f32 %v3820_v56, %v446_v42  ;;  %v522_v61 = vmul.f32 %v3816_v54, %v454_v45  ;;  %v493_v62 = vmul.f32 0.5, %v491_v34  ;;  %v507_v19 = vsub.f32 %v503_v3, %v505_v5 }
  0xa3   : > { %v528_v38 = vmul.f32 %v3805_v50, %v454_v45  ;;  %v530_v47 = vmul.f32 %v3864_v31, %v462_v6  ;;  %v494_v33 = vmul.f32 0.5, %v492_v7  ;;  %v501_v27 = vmul.f32 0.5, %v499_v16 }
  0xa4   : > { %v393_v4 = vmul.f32 0.5, %v3755_v23  ;;  %v502_v21 = vmul.f32 0.5, %v500_v59  ;;  %v3896_v24 = vmul.f32 0.5, %v508_v2  ;;  %v509_v3 = vmul.f32 0.5, %v507_v19 }
  0xa5   : > { %v601_v41 = vmul.f32 %v3772_v30, %v517_v55  ;;  %v619_v32 = vmul.f32 %v3793_v43, %v517_v55  ;;  %v3900_v34 = vsub.f32 1.0, %v466_v8  ;;  %v3903_v45 = vadd.f32 -8.0, %v3760_v25 }
  0xa6   : > { %3416 = vset.pattern.permute.xlu2 %v5961_v9  ;;  %v621_v7 = vmul.f32 %v3837_v1, %v3882_v48  ;;  %v524_v16 = vsub.f32 %v520_v52, %v522_v61  ;;  %v561_v40 = vmul.f32 %v493_v62, %v3760_v25  ;;  %v563_v59 = vmul.f32 %v3765_v28, %v501_v27 }
  0xa7   : > { %3415 = vset.pattern.permute.xlu1 %v5961_v9  ;;  %1324 = vperm.xlu2 %3416, %v3707_v15   ;;  %v532_v2 = vsub.f32 %v528_v38, %v530_v47  ;;  %v562_v5 = vmul.f32 %v494_v33, %v3795_v44  ;;  %v579_v19 = vmul.f32 %v3780_v35, %v501_v27  ;;  %v3917_v61 = vpop.permute.xlu1 %648  ;;  %v5969_v62 = vmax.f32 %v3900_v34, 0.0 }
  0xa8   : > { %1320 = vperm.xlu1 %3415, %v3697_v14   ;;  %v581_v43 = vmul.f32 %v3768_v29, %v509_v3  ;;  %v564_v55 = vmul.f32 %v3820_v56, %v502_v21  ;;  %v580_v8 = vmul.f32 %v3809_v51, %v502_v21  ;;  %v582_v9 = vmul.f32 %v3805_v50, %v3896_v24 }
  0xa9   : > { %v599_v52 = vmul.f32 %v3785_v37, %v509_v3  ;;  %v512_v38 = vmul.f32 %v3834_v0, %v438_v22  ;;  %v514_v47 = vmul.f32 %v3813_v53, %v446_v42  ;;  %v465_v35 = vand.u32 2147483647, %v3903_v45 }
  0xaa   : > { %3482 = vtanh.f32 %v393_v4  ;;  %v623_v33 = vsub.f32 %v619_v32, %v621_v7  ;;  %v526_v27 = vmul.f32 0.5, %v524_v16  ;;  %v565_v12 = vsub.f32 %v561_v40, %v563_v59  ;;  %v3941_v59 = vpop.permute.xlu2 %652 }
  0xab   : > { %v3924_v51 = vmul.f32 0.5, %v532_v2  ;;  %v583_v21 = vsub.f32 %v579_v19, %v581_v43  ;;  %v3927_v37 = vadd.f32 -9.0, %v3795_v44  ;;  %v516_v3 = vsub.f32 %v512_v38, %v514_v47  ;;  %6000 = vst [vmem:[#allocation3_spill] sm:$0xff] %v3941_v59 }
  0xac   : > { %v566_v22 = vsub.f32 %v562_v5, %v564_v55  ;;  %v584_v13 = vsub.f32 %v580_v8, %v582_v9  ;;  %v603_v42 = vsub.f32 %v599_v52, %v601_v41  ;;  %v536_v10 = vmul.f32 %v3813_v53, %v462_v6 }
  0xad   : > { %v538_v4 = vmul.f32 %v3927_v37, %v5969_v62  ;;  %v467_v32 = vsub.f32 1.0, %v465_v35  ;;  %v3936_v7 = vadd.f32 -9.0, %v3760_v25  ;;  %v3939_v16 = vadd.f32 -10.0, %v3760_v25  ;;  %v589_v62 = vpop.permute.xlu0 %588 }
  0xae   : > { %v625_v40 = vmul.f32 0.33333334, %v623_v33  ;;  %v3944_v9 = vmul.f32 %v3820_v56, %v526_v27  ;;  %v567_v6 = vmul.f32 0.33333334, %v565_v12  ;;  %v457_v41 = vand.u32 2147483647, %v3837_v1 }
  0xaf   : > { %3418 = vset.pattern.permute.xlu2 %v5970_v11  ;;  %v3949_v2 = vmul.f32 %v3864_v31, %v3924_v51  ;;  %v585_v5 = vmul.f32 0.33333334, %v583_v21  ;;  %v518_v19 = vmul.f32 0.5, %v516_v3  ;;  %v473_v43 = vand.u32 2147483647, %v3936_v7 }
  0xb0   : > { %1332 = vperm.xlu1 %3415, %v3728_v18   ;;  %1360 = vperm.xlu2 %3418, %v3697_v14   ;;  %v3952_v55 = vpop.eup %3482  ;;  %v568_v8 = vmul.f32 0.33333334, %v566_v22  ;;  %v469_v52 = vmax.f32 %v467_v32, 0.0  ;;  %v481_v38 = vand.u32 2147483647, %v3939_v16  ;;  %v459_v47 = vsub.f32 1.0, %v457_v41 }
  0xb1   : > { %v586_v56 = vmul.f32 0.33333334, %v584_v13  ;;  %v605_v35 = vmul.f32 0.33333334, %v603_v42  ;;  %v540_v12 = vsub.f32 %v536_v10, %v538_v4  ;;  %v475_v33 = vsub.f32 1.0, %v473_v43  ;;  %v3959_v59 = vpop.permute.xlu1 %668 }
  0xb2   : > { %v577_v11 = vmul.f32 %v3762_v26, %v567_v6  ;;  %v483_v60 = vsub.f32 1.0, %v481_v38  ;;  %v461_v23 = vmax.f32 %v459_v47, 0.0  ;;  %v6001_v21 = vmax.f32 %v3801_v49, 0.0 }
  0xb3   : > { %v595_v22 = vmul.f32 %v589_v62, %v585_v5  ;;  %v600_v32 = vmul.f32 %v3824_v58, %v3896_v24  ;;  %v602_v13 = vmul.f32 %v3813_v53, %v518_v19  ;;  %v477_v42 = vmax.f32 %v475_v33, 0.0 }
  0xb4   : > { %v527_v3 = vmul.f32 %v3768_v29, %v6001_v21  ;;  %v6002_v10 = vmov 8   ;;  %v485_v4 = vmax.f32 %v483_v60, 0.0  ;;  %v543_v26 = vmul.f32 %v3837_v1, %v469_v52 }
  0xb5   : > { %v3967_v6 = vadd.f32 -11.0, %v3760_v25  ;;  %v529_v49 = vmul.f32 %v3903_v45, %v461_v23  ;;  %v620_v62 = vmul.f32 %v3834_v0, %v518_v19  ;;  %v622_v58 = vmul.f32 %v3816_v54, %v526_v27  ;;  %v3981_v0 = vpop.permute.xlu2 %672 }
  0xb6   : > { %v545_v24 = vmul.f32 %v3939_v16, %v477_v42  ;;  %v551_v41 = vmul.f32 %v3903_v45, %v477_v42  ;;  %v535_v25 = vmul.f32 %v3772_v30, %v461_v23  ;;  %v537_v43 = vmul.f32 %v3936_v7, %v469_v52 }
  0xb7   : > { %v555_v60 = vmul.f32 %v3967_v6, %v485_v4  ;;  %v531_v5 = vsub.f32 %v527_v3, %v529_v49  ;;  %v578_v38 = vmul.f32 %v3798_v46, %v568_v8  ;;  %v596_v47 = vmul.f32 %v3831_v63, %v586_v56 }
  0xb8   : > { %3419 = vset.pattern.permute.xlu1 %v6002_v10  ;;  %1368 = vperm.xlu2 %3418, %v3717_v17   ;;  %v597_v33 = vadd.f32 %v595_v22, %v577_v11  ;;  %v604_v21 = vsub.f32 %v600_v32, %v602_v13  ;;  %v547_v27 = vsub.f32 %v543_v26, %v545_v24  ;;  %v542_v4 = vmul.f32 0.5, %v540_v12  ;;  %v633_v26 = vpop.permute.xlu0 %632 }
  0xb9   : > { %1364 = vperm.xlu1 %3419, %v3707_v15   ;;  %v533_v19 = vmul.f32 0.5, %v531_v5  ;;  %v639_v42 = vmul.f32 %v3765_v28, %v3882_v48  ;;  %v539_v10 = vsub.f32 %v535_v25, %v537_v43  ;;  %v615_v3 = vmul.f32 %v3854_v57, %v605_v35 }
  0xba   : > { %v624_v23 = vsub.f32 %v620_v62, %v622_v58  ;;  %v474_v52 = vand.u32 2147483647, %v3927_v37  ;;  %v557_v49 = vsub.f32 %v551_v41, %v555_v60  ;;  %v635_v8 = vmul.f32 %v3894_v20, %v625_v40  ;;  %v3993_v12 = vpop.permute.xlu1 %692 }
  0xbb   : > { %v641_v46 = vmul.f32 %v3903_v45, %v533_v19  ;;  %v541_v63 = vmul.f32 0.5, %v539_v10  ;;  %v659_v11 = vmul.f32 %v3768_v29, %v533_v19  ;;  %v394_v56 = vmul.f32 0.5, %v3782_v36 }
  0xbc   : > { %v606_v22 = vmul.f32 0.33333334, %v604_v21  ;;  %v3165_v28 = vadd.f32 -10.0, %v3795_v44  ;;  %v617_v48 = vadd.f32 %v615_v3, %v597_v33  ;;  %v549_v32 = vmul.f32 0.5, %v547_v27 }
  0xbd   : > { %v643_v57 = vsub.f32 %v639_v42, %v641_v46  ;;  %v661_v35 = vmul.f32 %v3936_v7, %v541_v63  ;;  %v6003_v13 = vmov 9   ;;  %v644_v45 = vsub.f32 %v3944_v9, %v3949_v2 }
  0xbe   : > { %v598_v29 = vadd.f32 %v596_v47, %v578_v38  ;;  %v660_v20 = vmul.f32 %v3805_v50, %v3924_v51  ;;  %v476_v40 = vsub.f32 1.0, %v474_v52  ;;  %v662_v10 = vmul.f32 %v3927_v37, %v542_v4  ;;  %v709_v47 = vpop.permute.xlu2 %708 }
  0xbf   : > { %v626_v7 = vmul.f32 0.33333334, %v624_v23  ;;  %v559_v62 = vmul.f32 0.5, %v557_v49  ;;  %v663_v58 = vsub.f32 %v659_v11, %v661_v35  ;;  %v616_v24 = vmul.f32 %v3874_v39, %v606_v22  ;;  %v6005_v22 = vld [vmem:[#allocation3_spill] sm:$0xff] }
  0xc0   : > { %3422 = vset.pattern.permute.xlu2 %v6003_v13  ;;  %v478_v9 = vmax.f32 %v476_v40, 0.0  ;;  %v6004_v2 = vmax.f32 %v3900_v34, 0.0  ;;  %v482_v51 = vand.u32 2147483647, %v3165_v28  ;;  %v637_v41 = vadd.f32 %v635_v8, %v617_v48 }
  0xc1   : > { %3421 = vset.pattern.permute.xlu1 %v6003_v13  ;;  %1404 = vperm.xlu2 %3422, %v3707_v15   ;;  %v645_v60 = vmul.f32 0.33333334, %v643_v57  ;;  %v679_v5 = vmul.f32 %v3772_v30, %v541_v63  ;;  %v681_v37 = vmul.f32 %v3939_v16, %v549_v32  ;;  %v618_v25 = vadd.f32 %v616_v24, %v598_v29  ;;  %v689_v57 = vpop.permute.xlu0 %688 }
  0xc2   : > { %1400 = vperm.xlu1 %3421, %v3697_v14   ;;  %v544_v50 = vmul.f32 %v3816_v54, %v6004_v2  ;;  %3484 = vtanh.f32 %v394_v56  ;;  %v546_v43 = vmul.f32 %v3165_v28, %v478_v9  ;;  %v484_v38 = vsub.f32 1.0, %v482_v51 }
  0xc3   : > { %v699_v33 = vmul.f32 %v3837_v1, %v549_v32  ;;  %v701_v39 = vmul.f32 %v3967_v6, %v559_v62  ;;  %v655_v34 = vmul.f32 %v3917_v61, %v645_v60  ;;  %v665_v21 = vmul.f32 0.33333334, %v663_v58  ;;  %v713_v6 = vpop.permute.xlu1 %712 }
  0xc4   : > { %v548_v27 = vsub.f32 %v544_v50, %v546_v43  ;;  %v486_v19 = vmax.f32 %v484_v38, 0.0  ;;  %v552_v42 = vmul.f32 %v3864_v31, %v478_v9  ;;  %v3167_v30 = vadd.f32 -11.0, %v3795_v44  ;;  %v6007_v43 = vld [vmem:[#allocation2_spill] sm:$0xff] }
  0xc5   : > { %v646_v3 = vmul.f32 0.33333334, %v644_v45  ;;  %v664_v16 = vsub.f32 %v660_v20, %v662_v10  ;;  %v636_v23 = vmul.f32 %v633_v26, %v626_v7  ;;  %v683_v52 = vsub.f32 %v679_v5, %v681_v37 }
  0xc6   : > { %v675_v49 = vmul.f32 %v3959_v59, %v665_v21  ;;  %v550_v46 = vmul.f32 0.5, %v548_v27  ;;  %v680_v1 = vmul.f32 %v3813_v53, %v542_v4  ;;  %v556_v63 = vmul.f32 %v3167_v30, %v486_v19 }
  0xc7   : > { %v638_v61 = vadd.f32 %v636_v23, %v618_v25  ;;  %v703_v31 = vsub.f32 %v699_v33, %v701_v39  ;;  %v657_v8 = vadd.f32 %v655_v34, %v637_v41  ;;  %v656_v48 = vmul.f32 %v6005_v22, %v646_v3  ;;  %v4046_v23 = vld [vmem:[%s5945_s6 + $0x18] sm:$0xff]  ;;  %v4117_v22 = vld [vmem:[%s5945_s6 + $0x30] sm:$0xff] }
  0xc8   : > { %v3485_v11 = vpop.eup %3484  ;;  %v682_v44 = vmul.f32 %v3165_v28, %v550_v46  ;;  %v558_v56 = vsub.f32 %v552_v42, %v556_v63  ;;  %v666_v32 = vmul.f32 0.33333334, %v664_v16  ;;  %v685_v59 = vmul.f32 0.33333334, %v683_v52  ;;  %v721_v28 = vpop.permute.xlu2 %720  ;;  %v741_v16 = vld [vmem:[%s5942_s3] sm:$0xff]  ;;  %1540 = vperm.xlu0 %3432, %v4046_v23   ;;  %v744_v63 = vld [vmem:[%s5942_s3 + $0x18] sm:$0xff] }
  0xc9   : > { %1412 = vperm.xlu2 %3422, %v3728_v18   ;;  %v677_v35 = vadd.f32 %v675_v49, %v657_v8  ;;  %v700_v4 = vmul.f32 %v3816_v54, %v550_v46  ;;  %v658_v29 = vadd.f32 %v656_v48, %v638_v61  ;;  %v397_v20 = vmul.f32 0.5, %v3952_v55  ;;  %v4080_v61 = vld [vmem:[%s5945_s6 + $0x10] sm:$0xff]  ;;  %v4103_v8 = vld [vmem:[%s5945_s6 + $0x20] sm:$0xff] }
  0xca   : > { %1408 = vperm.xlu1 %3421, %v3717_v17   ;;  %v684_v45 = vsub.f32 %v680_v1, %v682_v44  ;;  %v560_v53 = vmul.f32 0.5, %v558_v56  ;;  %v398_v40 = vmul.f32 0.5, %v3485_v11  ;;  %v705_v10 = vmul.f32 0.33333334, %v703_v31  ;;  %v4065_v1 = vld [vmem:[%s5945_s6] sm:$0xff]  ;;  %v4112_v56 = vld [vmem:[%s5945_s6 + $0x38] sm:$0xff] }
  0xcb   : > { %v695_v26 = vmul.f32 %v689_v57, %v685_v59  ;;  %v676_v58 = vmul.f32 %v3981_v0, %v666_v32  ;;  %v6006_v50 = vmov 10   ;;  %v399_v51 = vadd.f32 0.5, %v397_v20 }
  0xcc   : > { %v686_v7 = vmul.f32 0.33333334, %v684_v45  ;;  %v702_v62 = vmul.f32 %v3167_v30, %v560_v53  ;;  %v715_v54 = vmul.f32 %v709_v47, %v705_v10  ;;  %v400_v55 = vadd.f32 0.5, %v398_v40  ;;  %v731_v5 = vpop.permute.xlu1 %730 }
  0xcd   : > { %v697_v2 = vadd.f32 %v695_v26, %v677_v35  ;;  %v678_v41 = vadd.f32 %v676_v58, %v658_v29  ;;  %v401_v38 = vmul.f32 %v399_v51, %v6007_v43  ;;  %v6008_v42 = vmov 1  }
  0xce   : > { %v696_v24 = vmul.f32 %v3993_v12, %v686_v7  ;;  %v704_v9 = vsub.f32 %v700_v4, %v702_v62  ;;  %v725_v12 = vpop.permute.xlu0 %724  ;;  %v402_v33 = vmul.f32 %v400_v55, %v3782_v36  ;;  %v742_v36 = vld [vmem:[%s5942_s3 + $0x8] sm:$0xff]  ;;  %v6009_v52 = vmov 2  }
  0xcf   : > { %v717_v25 = vadd.f32 %v715_v54, %v697_v2  ;;  %v727_v27 = vmul.f32 %v721_v28, %v401_v38  ;;  %v6010_v46 = vmov 3   ;;  %v6014_v44 = vmov 4  }
  0xd0   : > { %v706_v60 = vmul.f32 0.33333334, %v704_v9  ;;  %v698_v37 = vadd.f32 %v696_v24, %v678_v41  ;;  %v735_v21 = vpop.permute.xlu2 %734  ;;  %v728_v19 = vmul.f32 %v725_v12, %v402_v33  ;;  %3435 = vset.pattern.permute.xlu0 %v6010_v46  ;;  %v6017_v35 = vmov 5  }
  0xd1   : > { %3425 = vset.pattern.permute.xlu2 %v6006_v50  ;;  %v737_v34 = vmul.f32 %v731_v5, %v717_v25  ;;  %1176 = vperm.xlu0 %3435, %v3728_v18   ;;  %v6020_v29 = vmov 6   ;;  %v6023_v7 = vmov 7   ;;  %v6027_v2 = vmov 8  }
  0xd2   : > { %3424 = vset.pattern.permute.xlu1 %v6006_v50  ;;  %1448 = vperm.xlu2 %3425, %v3717_v17   ;;  %v716_v0 = vmul.f32 %v713_v6, %v706_v60  ;;  %v4085_v6 = vld [vmem:[%s5945_s6 + $0x8] sm:$0xff] }
  0xd3   : > { %1444 = vperm.xlu1 %3424, %v3707_v15   ;;  %v739_v3 = vadd.f32 %v737_v34, %v727_v27 }
  0xd4   : > { %v718_v39 = vadd.f32 %v716_v0, %v698_v37 }
  0xd5   : > { %v4057_v49 = vpop.permute.xlu1 %751 }
  0xd6   : > { %v738_v47 = vmul.f32 %v735_v21, %v718_v39  ;;  %v4162_v26 = vpop.permute.xlu0 %1240 }
  0xd8   : > { %v740_v30 = vadd.f32 %v738_v47, %v728_v19  ;;  %v4096_v11 = vpop.permute.xlu2 %756 }
  0xd9   : > { %2334 = vperm.xlu0 %3435, %v4065_v1  }
  0xda   : > { %3426 = vset.pattern.permute.xlu2 %v6008_v42  ;;  %796 = vmatpush.msra.mxu0 %v740_v30 }
  0xdb   : > { %1452 = vperm.xlu1 %3424, %v3728_v18   ;;  %1464 = vperm.xlu2 %3426, %v3697_v14  }
  0xdc   : > { %797 = vmatpush.msra.mxu0 %v739_v3 }
  0xdd   : > { %3168 = vmatmul.msk.f32.vlgmr.msra.gmra.mxu0 %vm769_vm0, %v741_v16 }
  0xde   : > { %v4172_v58 = vpop.permute.xlu0 %1284 }
  0xdf   : > { %6024 = vst [vmem:[#allocation10_spill] sm:$0xff] %v4172_v58 }
  0xe0   : > { %v4119_v48 = vpop.permute.xlu2 %1164 }
  0xe3   : > { %3428 = vset.pattern.permute.xlu1 %v6008_v42  ;;  %1476 = vperm.xlu2 %3426, %v3728_v18  }
  0xe4   : > { %1472 = vperm.xlu1 %3428, %v3717_v17   ;;  %v743_v17 = vld [vmem:[%s5942_s3 + $0x10] sm:$0xff] }
  0xe5   : > { %3169 = vmatmul.msk.f32.gmra.mxu0 %vm769_vm0, %v742_v36 }
  0xe6   : > { %v4184_v51 = vpop.permute.xlu0 %1328 }
  0xe7   : > { %6028 = vst [vmem:[#allocation13_spill] sm:$0xff] %v4184_v51 }
  0xe8   : > { %v4127_v57 = vpop.permute.xlu2 %1172 }
  0xe9   : > { %6015 = vst [vmem:[#allocation4_spill] sm:$0xff] %v4127_v57 }
  0xeb   : > { %3430 = vset.pattern.permute.xlu2 %v6009_v52 }
  0xec   : > { %3429 = vset.pattern.permute.xlu1 %v6009_v52  ;;  %1488 = vperm.xlu2 %3430, %v3707_v15   ;;  %v6011_v15 = vmov 0  }
  0xed   : > { %1484 = vperm.xlu1 %3429, %v3697_v14   ;;  %3170 = vmatmul.msk.f32.gmra.mxu0 %vm769_vm0, %v743_v17  ;;  %v4075_v14 = vpop.permute.xlu1 %766 }
  0xee   : > { %v4194_v41 = vpop.permute.xlu0 %1372 }
  0xef   : > { %6031 = vst [vmem:[#allocation16_spill] sm:$0xff] %v4194_v41 }
  0xf0   : > { %v4138_v45 = vpop.permute.xlu2 %1204 }
  0xf1   : > { %6018 = vst [vmem:[#allocation6_spill] sm:$0xff] %v4138_v45 }
  0xf4   : > { %3433 = vset.pattern.permute.xlu2 %v6011_v15 }
  0xf5   : > { %1496 = vperm.xlu1 %3429, %v3728_v18   ;;  %1525 = vperm.xlu2 %3433, %v4065_v1   ;;  %v4093_v18 = vld [vmem:[%s5945_s6 + $0x28] sm:$0xff]  ;;  %v4098_v31 = vpop.permute.xlu1 %1168 }
  0xf6   : > { %3171 = vmatmul.msk.f32.gmra.mxu0 %vm769_vm0, %v744_v63  ;;  %6012 = vst [vmem:[#allocation3_spill] sm:$0xff] %v4093_v18  ;;  %2354 = vperm.xlu0 %3435, %v4093_v18   ;;  %v4209_v12 = vpop.permute.xlu0 %1440 }
  0xf7   : > { %6013 = vst [vmem:[#allocation2_spill] sm:$0xff] %v4098_v31 }
  0xf8   : > { %v4145_v4 = vpop.permute.xlu2 %1212 }
  0xfd   : > { %3434 = vset.pattern.permute.xlu1 %v6011_v15  ;;  %1535 = vperm.xlu2 %3433, %v4080_v61   ;;  %v4121_v32 = vpop.permute.xlu1 %1200 }
  0xfe   : > { %1530 = vperm.xlu1 %3434, %v4085_v6   ;;  %3438 = vset.pattern.permute.xlu0 %v6014_v44  ;;  %v4255_v45 = vpop.permute.xlu0 %1468 }
  0xff   : > { %2406 = vperm.xlu0 %3438, %v4065_v1   ;;  %6034 = vst [vmem:[#allocation19_spill] sm:$0xff] %v4255_v45 }
 0x100   : > { %v4156_v40 = vpop.permute.xlu2 %1248 }
 0x101   : > { %6021 = vst [vmem:[#allocation8_spill] sm:$0xff] %v4156_v40 }
 0x105   : > { %1550 = vperm.xlu2 %3433, %v4093_v18   ;;  %v4131_v59 = vpop.permute.xlu1 %1208 }
 0x106   : > { %1545 = vperm.xlu1 %3434, %v4103_v8   ;;  %6016 = vst [vmem:[#allocation5_spill] sm:$0xff] %v4131_v59 }
 0x107   : > { %2426 = vperm.xlu0 %3438, %v4093_v18  }
 0x108   : > { %v4166_v62 = vpop.permute.xlu2 %1280 }
 0x10d   : > { %1560 = vperm.xlu2 %3433, %v4112_v56   ;;  %v4140_v53 = vpop.permute.xlu1 %1244 }
 0x10e   : > { %1555 = vperm.xlu1 %3434, %v4117_v22   ;;  %6019 = vst [vmem:[#allocation7_spill] sm:$0xff] %v4140_v53 }
 0x10f   : > { %3441 = vset.pattern.permute.xlu0 %v6017_v35 }
 0x110   : > { %2486 = vperm.xlu0 %3441, %v4065_v1   ;;  %v4176_v24 = vpop.permute.xlu2 %1292 }
 0x111   : > { %6025 = vst [vmem:[#allocation11_spill] sm:$0xff] %v4176_v24 }
 0x115   : > { %3437 = vset.pattern.permute.xlu2 %v6010_v46  ;;  %v4148_v20 = vpop.permute.xlu1 %1252 }
 0x116   : > { %3436 = vset.pattern.permute.xlu1 %v6010_v46  ;;  %2342 = vperm.xlu2 %3437, %v4080_v61  }
 0x117   : > { %2338 = vperm.xlu1 %3436, %v4085_v6  }
 0x118   : > { %2506 = vperm.xlu0 %3441, %v4093_v18   ;;  %v4189_v54 = vpop.permute.xlu2 %1324 }
 0x119   : > { %6029 = vst [vmem:[#allocation14_spill] sm:$0xff] %v4189_v54 }
 0x11d   : > { %v4158_v10 = vpop.permute.xlu1 %1288 }
 0x11e   : > { %2350 = vperm.xlu2 %3437, %v4103_v8   ;;  %6022 = vst [vmem:[#allocation9_spill] sm:$0xff] %v4158_v10 }
 0x11f   : > { %2346 = vperm.xlu1 %3436, %v4046_v23  }
 0x120   : > { %3444 = vset.pattern.permute.xlu0 %v6020_v29  ;;  %v4198_v60 = vpop.permute.xlu2 %1360 }
 0x121   : > { %2566 = vperm.xlu0 %3444, %v4065_v1  }
 0x125   : > { %v4168_v28 = vpop.permute.xlu1 %1320 }
 0x126   : > { %2362 = vperm.xlu2 %3437, %v4112_v56  }
 0x127   : > { %2358 = vperm.xlu1 %3436, %v4117_v22  }
 0x128   : > { %v4239_v16 = vpop.permute.xlu2 %1368 }
 0x129   : > { %2586 = vperm.xlu0 %3444, %v4093_v18   ;;  %6032 = vst [vmem:[#allocation17_spill] sm:$0xff] %v4239_v16 }
 0x12d   : > { %v4180_v9 = vpop.permute.xlu1 %1332 }
 0x12e   : > { %3440 = vset.pattern.permute.xlu2 %v6014_v44  ;;  %6026 = vst [vmem:[#allocation12_spill] sm:$0xff] %v4180_v9 }
 0x12f   : > { %3439 = vset.pattern.permute.xlu1 %v6014_v44  ;;  %2414 = vperm.xlu2 %3440, %v4080_v61  }
 0x130   : > { %2410 = vperm.xlu1 %3439, %v4085_v6  }
 0x131   : > { %3447 = vset.pattern.permute.xlu0 %v6023_v7 }
 0x132   : > { %2646 = vperm.xlu0 %3447, %v4065_v1  }
 0x135   : > { %v4191_v55 = vpop.permute.xlu1 %1364 }
 0x136   : > { %6030 = vst [vmem:[#allocation15_spill] sm:$0xff] %v4191_v55 }
 0x137   : > { %2422 = vperm.xlu2 %3440, %v4103_v8  }
 0x138   : > { %2418 = vperm.xlu1 %3439, %v4046_v23  }
 0x13a   : > { %2666 = vperm.xlu0 %3447, %v4093_v18  }
 0x13d   : > { %v4200_v5 = vpop.permute.xlu1 %1400 }
 0x13f   : > { %2434 = vperm.xlu2 %3440, %v4112_v56  }
 0x140   : > { %2430 = vperm.xlu1 %3439, %v4117_v22  }
 0x142   : > { %3450 = vset.pattern.permute.xlu0 %v6027_v2 }
 0x143   : > { %2726 = vperm.xlu0 %3450, %v4065_v1  }
 0x145   : > { %v4241_v36 = vpop.permute.xlu1 %1408 }
 0x146   : > { %6033 = vst [vmem:[#allocation18_spill] sm:$0xff] %v4241_v36 }
 0x147   : > { %3443 = vset.pattern.permute.xlu2 %v6017_v35 }
 0x148   : > { %3442 = vset.pattern.permute.xlu1 %v6017_v35  ;;  %2494 = vperm.xlu2 %3443, %v4080_v61  }
 0x149   : > { %2490 = vperm.xlu1 %3442, %v4085_v6  }
 0x14b   : > { %2746 = vperm.xlu0 %3450, %v4093_v18  }
 0x150   : > { %2502 = vperm.xlu2 %3443, %v4103_v8  }
 0x151   : > { %2498 = vperm.xlu1 %3442, %v4046_v23  }
 0x153   : > { %3457 = vset.pattern.permute.xlu0 %v6009_v52 }
 0x154   : > { %3002 = vperm.xlu0 %3457, %v4112_v56  }
 0x158   : > { %2514 = vperm.xlu2 %3443, %v4112_v56  }
 0x159   : > { %2510 = vperm.xlu1 %3442, %v4117_v22  }
 0x15a   : > { %v799_v37 = vpop.f32.mrf.mxu0 }
 0x15b   : > { %v4204_v0 = vadd.f32 %v799_v37, %v4057_v49 }
 0x15c   : > { %3458 = vset.pattern.permute.xlu0 %v6003_v13 }
 0x15d   : > { %v3172_v25 = vadd.f32 2.2, %v4204_v0  ;;  %v811_v21 = vmul.f32 0.5, %v4204_v0  ;;  %2834 = vperm.xlu0 %3458, %v4112_v56  }
 0x15f   : > { %v4213_v43 = vmul.f32 2.5, %v3172_v25  ;;  %3486 = vtanh.f32 %v811_v21 }
 0x160   : > { %3446 = vset.pattern.permute.xlu2 %v6020_v29 }
 0x161   : > { %3445 = vset.pattern.permute.xlu1 %v6020_v29  ;;  %2574 = vperm.xlu2 %3446, %v4080_v61   ;;  %v4217_v38 = vadd.f32 -1.0, %v4213_v43  ;;  %v4220_v33 = vadd.f32 -2.0, %v4213_v43  ;;  %v4223_v39 = vadd.f32 -3.0, %v4213_v43  ;;  %v4226_v34 = vadd.f32 -4.0, %v4213_v43 }
 0x162   : > { %2570 = vperm.xlu1 %3445, %v4085_v6   ;;  %v4230_v27 = vadd.f32 -5.0, %v4213_v43  ;;  %v4233_v19 = vadd.f32 -6.0, %v4213_v43  ;;  %v4246_v46 = vadd.f32 -7.0, %v4213_v43  ;;  %v802_v63 = vpop.f32.mrf.mxu0  ;;  %v4251_v37 = vadd.f32 -8.0, %v4213_v43 }
 0x163   : > { %v843_v47 = vand.u32 2147483647, %v4217_v38  ;;  %v859_v30 = vand.u32 2147483647, %v4220_v33  ;;  %v875_v3 = vand.u32 2147483647, %v4223_v39 }
 0x164   : > { %v891_v17 = vand.u32 2147483647, %v4226_v34  ;;  %v907_v49 = vand.u32 2147483647, %v4230_v27  ;;  %v923_v29 = vand.u32 2147483647, %v4233_v19 }
 0x165   : > { %v847_v44 = vsub.f32 1.0, %v843_v47  ;;  %v863_v35 = vsub.f32 1.0, %v859_v30  ;;  %v879_v25 = vsub.f32 1.0, %v875_v3  ;;  %v4258_v47 = vadd.f32 %v802_v63, %v4096_v11  ;;  %2822 = vperm.xlu0 %3458, %v4103_v8  }
 0x166   : > { %v895_v55 = vsub.f32 1.0, %v891_v17  ;;  %v911_v53 = vsub.f32 1.0, %v907_v49  ;;  %v927_v31 = vsub.f32 1.0, %v923_v29  ;;  %v939_v36 = vand.u32 2147483647, %v4246_v46 }
 0x167   : > { %v851_v54 = vmax.f32 %v847_v44, 0.0  ;;  %v867_v58 = vmax.f32 %v863_v35, 0.0  ;;  %v883_v30 = vmax.f32 %v879_v25, 0.0  ;;  %v955_v21 = vand.u32 2147483647, %v4251_v37  ;;  %v3487_v25 = vpop.eup %3486 }
 0x168   : > { %v4263_v3 = vadd.f32 -9.0, %v4213_v43  ;;  %v899_v17 = vmax.f32 %v895_v55, 0.0  ;;  %v4266_v44 = vadd.f32 -10.0, %v4213_v43  ;;  %v915_v45 = vmax.f32 %v911_v53, 0.0 }
 0x169   : > { %2582 = vperm.xlu2 %3446, %v4103_v8   ;;  %v999_v49 = vmul.f32 %v851_v54, %v4213_v43  ;;  %v1003_v35 = vmul.f32 %v4223_v39, %v867_v58  ;;  %v943_v11 = vsub.f32 1.0, %v939_v36  ;;  %v959_v63 = vsub.f32 1.0, %v955_v21  ;;  %v4279_v36 = vpop.permute.xlu2 %1404  ;;  %v4281_v21 = vpop.permute.xlu1 %1444 }
 0x16a   : > { %2578 = vperm.xlu1 %3445, %v4046_v23   ;;  %v971_v29 = vand.u32 2147483647, %v4263_v3  ;;  %v987_v16 = vand.u32 2147483647, %v4266_v44  ;;  %v1015_v10 = vmul.f32 %v4217_v38, %v867_v58  ;;  %v1019_v55 = vmul.f32 %v4226_v34, %v883_v30  ;;  %6035 = vst [vmem:[#allocation20_spill] sm:$0xff] %v4279_v36 }
 0x16b   : > { %v1007_v51 = vsub.f32 %v999_v49, %v1003_v35  ;;  %v4276_v40 = vmul.f32 0.5, %v4258_v47  ;;  %v931_v54 = vmax.f32 %v927_v31, 0.0  ;;  %v1031_v53 = vmul.f32 %v4220_v33, %v883_v30  ;;  %6036 = vst [vmem:[#allocation21_spill] sm:$0xff] %v4281_v21 }
 0x16c   : > { %v975_v59 = vsub.f32 1.0, %v971_v29  ;;  %v947_v57 = vmax.f32 %v943_v11, 0.0  ;;  %v963_v18 = vmax.f32 %v959_v63, 0.0  ;;  %v991_v49 = vsub.f32 1.0, %v987_v16 }
 0x16d   : > { %v1023_v35 = vsub.f32 %v1015_v10, %v1019_v55  ;;  %v4284_v58 = vmul.f32 0.5, %v3487_v25  ;;  %v1035_v13 = vmul.f32 %v4230_v27, %v899_v17  ;;  %v1047_v41 = vmul.f32 %v4223_v39, %v899_v17  ;;  %v4293_v55 = vpop.permute.xlu0 %1492  ;;  %2814 = vperm.xlu0 %3458, %v4080_v61  }
 0x16e   : > { %v1051_v31 = vmul.f32 %v4233_v19, %v915_v45  ;;  %v979_v30 = vmax.f32 %v975_v59, 0.0  ;;  %v1011_v29 = vmul.f32 0.5, %v1007_v51  ;;  %v1063_v11 = vmul.f32 %v4226_v34, %v915_v45  ;;  %6037 = vst [vmem:[#allocation22_spill] sm:$0xff] %v4293_v55 }
 0x16f   : > { %v1027_v36 = vmul.f32 0.5, %v1023_v35  ;;  %v1039_v63 = vsub.f32 %v1031_v53, %v1035_v13  ;;  %v1067_v10 = vmul.f32 %v4246_v46, %v931_v54  ;;  %v1079_v25 = vmul.f32 %v4230_v27, %v931_v54  ;;  %v805_v13 = vpop.f32.mrf.mxu0 }
 0x170   : > { %v1055_v16 = vsub.f32 %v1047_v41, %v1051_v31  ;;  %v995_v21 = vmax.f32 %v991_v49, 0.0  ;;  %v1083_v17 = vmul.f32 %v4251_v37, %v947_v57  ;;  %v1095_v9 = vmul.f32 %v4233_v19, %v947_v57 }
 0x171   : > { %2594 = vperm.xlu2 %3446, %v4112_v56   ;;  %v1099_v24 = vmul.f32 %v4263_v3, %v963_v18  ;;  %v1043_v59 = vmul.f32 0.5, %v1039_v63  ;;  %v1071_v35 = vsub.f32 %v1063_v11, %v1067_v10  ;;  %v1111_v45 = vmul.f32 %v4246_v46, %v963_v18 }
 0x172   : > { %2590 = vperm.xlu1 %3445, %v4117_v22   ;;  %v1059_v51 = vmul.f32 0.5, %v1055_v16  ;;  %v1087_v41 = vsub.f32 %v1079_v25, %v1083_v17  ;;  %v1115_v31 = vmul.f32 %v4266_v44, %v979_v30  ;;  %v1127_v54 = vmul.f32 %v4251_v37, %v979_v30  ;;  %v4310_v17 = vpop.permute.xlu2 %1412 }
 0x173   : > { %v1103_v53 = vsub.f32 %v1095_v9, %v1099_v24  ;;  %v1075_v49 = vmul.f32 0.5, %v1071_v35  ;;  %v3216_v55 = vadd.f32 -11.0, %v4213_v43  ;;  %v1147_v57 = vmul.f32 %v1011_v29, %v4213_v43  ;;  %6038 = vst [vmem:[#allocation23_spill] sm:$0xff] %v4310_v17  ;;  %v4312_v43 = vpop.permute.xlu1 %1452 }
 0x174   : > { %v1151_v63 = vmul.f32 %v4226_v34, %v1027_v36  ;;  %v1091_v16 = vmul.f32 0.5, %v1087_v41  ;;  %v1119_v10 = vsub.f32 %v1111_v45, %v1115_v31  ;;  %v1183_v18 = vmul.f32 %v4217_v38, %v1027_v36  ;;  %6039 = vst [vmem:[#allocation24_spill] sm:$0xff] %v4312_v43 }
 0x175   : > { %v1107_v11 = vmul.f32 0.5, %v1103_v53  ;;  %v1135_v24 = vmul.f32 %v3216_v55, %v995_v21  ;;  %v1187_v30 = vmul.f32 %v4230_v27, %v1043_v59  ;;  %v1223_v25 = vmul.f32 %v4220_v33, %v1043_v59  ;;  %3467 = vset.pattern.permute.xlu0 %v6006_v50 }
 0x176   : > { %v1155_v9 = vsub.f32 %v1147_v57, %v1151_v63  ;;  %v1123_v29 = vmul.f32 0.5, %v1119_v10  ;;  %v1227_v35 = vmul.f32 %v4233_v19, %v1059_v51  ;;  %v1263_v45 = vmul.f32 %v4223_v39, %v1059_v51  ;;  %2894 = vperm.xlu0 %3467, %v4080_v61  }
 0x177   : > { %v1267_v38 = vmul.f32 %v4246_v46, %v1075_v49  ;;  %v1139_v36 = vsub.f32 %v1127_v54, %v1135_v24  ;;  %v1191_v33 = vsub.f32 %v1183_v18, %v1187_v30  ;;  %v1307_v53 = vmul.f32 %v4251_v37, %v1091_v16  ;;  %v762_v18 = vpop.permute.xlu0 %761 }
 0x178   : > { %v1159_v21 = vmul.f32 0.33333334, %v1155_v9  ;;  %v1231_v59 = vsub.f32 %v1223_v25, %v1227_v35  ;;  %v1343_v31 = vmul.f32 %v4230_v27, %v1091_v16  ;;  %v1347_v63 = vmul.f32 %v4263_v3, %v1107_v11  ;;  %v808_v16 = vpop.f32.mrf.mxu0 }
 0x179   : > { %3449 = vset.pattern.permute.xlu2 %v6023_v7  ;;  %v1271_v41 = vsub.f32 %v1263_v45, %v1267_v38  ;;  %v1143_v57 = vmul.f32 0.5, %v1139_v36  ;;  %v1195_v51 = vmul.f32 0.33333334, %v1191_v33  ;;  %v1383_v54 = vmul.f32 %v4233_v19, %v1107_v11 }
 0x17a   : > { %3448 = vset.pattern.permute.xlu1 %v6023_v7  ;;  %2654 = vperm.xlu2 %3449, %v4080_v61   ;;  %v1303_v7 = vmul.f32 %v4226_v34, %v1075_v49  ;;  %v1179_v39 = vmul.f32 %v4119_v48, %v1159_v21  ;;  %v1235_v10 = vmul.f32 0.33333334, %v1231_v59  ;;  %v1351_v49 = vsub.f32 %v1343_v31, %v1347_v63 }
 0x17b   : > { %2650 = vperm.xlu1 %3448, %v4085_v6   ;;  %v1275_v43 = vmul.f32 0.33333334, %v1271_v41  ;;  %v1215_v34 = vmul.f32 %v4121_v32, %v1195_v51  ;;  %v1387_v37 = vmul.f32 %v4266_v44, %v1123_v29  ;;  %v1423_v27 = vmul.f32 %v4246_v46, %v1123_v29  ;;  %v4343_v29 = vpop.permute.xlu2 %1448 }
 0x17c   : > { %v1311_v17 = vsub.f32 %v1303_v7, %v1307_v53  ;;  %3488 = vtanh.f32 %v4276_v40  ;;  %v3173_v48 = vadd.f32 2.2, %v4258_v47  ;;  %v1255_v3 = vmul.f32 %v4162_v26, %v1235_v10 }
 0x17d   : > { %v1427_v19 = vmul.f32 %v3216_v55, %v1143_v57  ;;  %v1219_v11 = vadd.f32 %v1215_v34, %v1179_v39  ;;  %v1391_v9 = vsub.f32 %v1383_v54, %v1387_v37  ;;  %v4333_v30 = vadd.f32 %v805_v13, %v762_v18  ;;  %v4345_v13 = vpop.permute.xlu1 %1472 }
 0x17e   : > { %v1315_v24 = vmul.f32 0.33333334, %v1311_v17  ;;  %v823_v32 = vadd.f32 0.5, %v4284_v58  ;;  %v1355_v44 = vmul.f32 0.33333334, %v1351_v49  ;;  %v4337_v46 = vadd.f32 %v808_v16, %v4075_v14  ;;  %3472 = vset.pattern.permute.xlu0 %v6008_v42 }
 0x17f   : > { %v1431_v25 = vsub.f32 %v1423_v27, %v1427_v19  ;;  %v1259_v40 = vadd.f32 %v1255_v3, %v1219_v11  ;;  %v1295_v26 = vmul.f32 %v4166_v62, %v1275_v43  ;;  %v1395_v55 = vmul.f32 0.33333334, %v1391_v9  ;;  %2946 = vperm.xlu0 %3472, %v4046_v23  }
 0x180   : > { %v813_v17 = vmul.f32 0.5, %v4333_v30  ;;  %v4347_v58 = vmul.f32 2.5, %v3173_v48  ;;  %v3174_v14 = vadd.f32 2.2, %v4333_v30  ;;  %v814_v45 = vmul.f32 0.5, %v4337_v46 }
 0x181   : > { %v1435_v35 = vmul.f32 0.33333334, %v1431_v25  ;;  %v1299_v38 = vadd.f32 %v1295_v26, %v1259_v40  ;;  %v1335_v36 = vmul.f32 %v4168_v28, %v1315_v24  ;;  %v3175_v62 = vadd.f32 2.2, %v4337_v46 }
 0x182   : > { %2662 = vperm.xlu2 %3449, %v4103_v8   ;;  %3490 = vtanh.f32 %v813_v17  ;;  %v4353_v43 = vpop.eup %3488  ;;  %v4356_v21 = vmul.f32 %v823_v32, %v4204_v0  ;;  %v1375_v33 = vmul.f32 %v4198_v60, %v1355_v44  ;;  %v4359_v7 = vmul.f32 2.5, %v3174_v14 }
 0x183   : > { %2658 = vperm.xlu1 %3448, %v4046_v23   ;;  %3492 = vtanh.f32 %v814_v45  ;;  %v1339_v59 = vadd.f32 %v1335_v36, %v1299_v38  ;;  %v1415_v41 = vmul.f32 %v4200_v5, %v1395_v55  ;;  %v1455_v53 = vmul.f32 %v4209_v12, %v1435_v35  ;;  %v4410_v40 = vpop.permute.xlu2 %1464 }
 0x184   : > { %v4363_v31 = vmul.f32 2.5, %v3175_v62  ;;  %v4367_v28 = vadd.f32 -1.0, %v4359_v7  ;;  %v4370_v0 = vadd.f32 -2.0, %v4359_v7  ;;  %v4373_v60 = vadd.f32 -3.0, %v4359_v7 }
 0x185   : > { %v4376_v57 = vadd.f32 -4.0, %v4359_v7  ;;  %v1379_v5 = vadd.f32 %v1375_v33, %v1339_v59  ;;  %v1485_v26 = vpop.permute.xlu1 %1484 }
 0x186   : > { %v4380_v12 = vadd.f32 -1.0, %v4363_v31  ;;  %v4383_v39 = vadd.f32 -2.0, %v4363_v31  ;;  %v4386_v51 = vadd.f32 -3.0, %v4363_v31  ;;  %v4389_v63 = vadd.f32 -4.0, %v4363_v31 }
 0x187   : > { %v4392_v10 = vadd.f32 -5.0, %v4363_v31  ;;  %v4395_v54 = vadd.f32 -6.0, %v4363_v31  ;;  %v4398_v18 = vadd.f32 -7.0, %v4363_v31  ;;  %v1419_v49 = vadd.f32 %v1415_v41, %v1379_v5  ;;  %2938 = vperm.xlu0 %3472, %v4085_v6  }
 0x188   : > { %v3491_v34 = vpop.eup %3490  ;;  %v846_v37 = vand.u32 2147483647, %v4380_v12  ;;  %v862_v27 = vand.u32 2147483647, %v4383_v39  ;;  %v878_v16 = vand.u32 2147483647, %v4386_v51 }
 0x189   : > { %v3493_v48 = vpop.eup %3492  ;;  %v821_v3 = vmul.f32 0.5, %v3491_v34  ;;  %v894_v19 = vand.u32 2147483647, %v4389_v63  ;;  %v910_v11 = vand.u32 2147483647, %v4392_v10  ;;  %v4408_v24 = vadd.f32 -8.0, %v4363_v31  ;;  %v4421_v34 = vpop.permute.xlu0 %1540 }
 0x18a   : > { %2674 = vperm.xlu2 %3449, %v4112_v56   ;;  %v1459_v9 = vadd.f32 %v1455_v53, %v1419_v49  ;;  %v822_v32 = vmul.f32 0.5, %v3493_v48  ;;  %v850_v44 = vsub.f32 1.0, %v846_v37  ;;  %v866_v25 = vsub.f32 1.0, %v862_v27 }
 0x18b   : > { %2670 = vperm.xlu1 %3448, %v4117_v22   ;;  %v825_v55 = vadd.f32 0.5, %v821_v3  ;;  %v882_v17 = vsub.f32 1.0, %v878_v16  ;;  %v898_v35 = vsub.f32 1.0, %v894_v19  ;;  %v914_v14 = vsub.f32 1.0, %v910_v11 }
 0x18c   : > { %v4412_v45 = vmul.f32 %v1485_v26, %v1459_v9  ;;  %v826_v38 = vadd.f32 0.5, %v822_v32  ;;  %v854_v36 = vmax.f32 %v850_v44, 0.0  ;;  %v870_v62 = vmax.f32 %v866_v25, 0.0 }
 0x18d   : > { %v4415_v33 = vmul.f32 %v825_v55, %v4333_v30  ;;  %v886_v59 = vmax.f32 %v882_v17, 0.0  ;;  %v902_v41 = vmax.f32 %v898_v35, 0.0  ;;  %v918_v53 = vmax.f32 %v914_v14, 0.0 }
 0x18e   : > { %v4419_v5 = vmul.f32 %v826_v38, %v4337_v46  ;;  %v926_v49 = vand.u32 2147483647, %v4395_v54  ;;  %v942_v37 = vand.u32 2147483647, %v4398_v18  ;;  %v1002_v27 = vmul.f32 %v854_v36, %v4363_v31 }
 0x18f   : > { %v1006_v16 = vmul.f32 %v4386_v51, %v870_v62  ;;  %v1018_v30 = vmul.f32 %v4380_v12, %v870_v62  ;;  %v1022_v48 = vmul.f32 %v4389_v63, %v886_v59  ;;  %v1034_v3 = vmul.f32 %v4383_v39, %v886_v59  ;;  %3478 = vset.pattern.permute.xlu0 %v6009_v52 }
 0x190   : > { %v930_v46 = vsub.f32 1.0, %v926_v49  ;;  %v946_v19 = vsub.f32 1.0, %v942_v37  ;;  %v1038_v11 = vmul.f32 %v4392_v10, %v902_v41  ;;  %v1050_v9 = vmul.f32 %v4386_v51, %v902_v41  ;;  %v1477_v49 = vpop.permute.xlu2 %1476  ;;  %2974 = vperm.xlu0 %3478, %v4065_v1  }
 0x191   : > { %v1010_v32 = vsub.f32 %v1002_v27, %v1006_v16  ;;  %v1026_v44 = vsub.f32 %v1018_v30, %v1022_v48  ;;  %v1054_v25 = vmul.f32 %v4395_v54, %v918_v53  ;;  %v1066_v26 = vmul.f32 %v4389_v63, %v918_v53 }
 0x192   : > { %3452 = vset.pattern.permute.xlu2 %v6027_v2  ;;  %v934_v55 = vmax.f32 %v930_v46, 0.0  ;;  %v950_v17 = vmax.f32 %v946_v19, 0.0  ;;  %v1042_v35 = vsub.f32 %v1034_v3, %v1038_v11  ;;  %v958_v14 = vand.u32 2147483647, %v4408_v24 }
 0x193   : > { %3451 = vset.pattern.permute.xlu1 %v6027_v2  ;;  %2734 = vperm.xlu2 %3452, %v4080_v61   ;;  %v1014_v38 = vmul.f32 0.5, %v1010_v32  ;;  %v1030_v36 = vmul.f32 0.5, %v1026_v44  ;;  %v1058_v62 = vsub.f32 %v1050_v9, %v1054_v25  ;;  %v4440_v2 = vadd.f32 -9.0, %v4363_v31  ;;  %v1177_v44 = vpop.permute.xlu0 %1176 }
 0x194   : > { %2730 = vperm.xlu1 %3451, %v4085_v6   ;;  %v1046_v61 = vmul.f32 0.5, %v1042_v35  ;;  %v1070_v59 = vmul.f32 %v4398_v18, %v934_v55  ;;  %v1082_v41 = vmul.f32 %v4392_v10, %v934_v55  ;;  %v1086_v53 = vmul.f32 %v4408_v24, %v950_v17 }
 0x195   : > { %v1062_v6 = vmul.f32 0.5, %v1058_v62  ;;  %v1150_v37 = vmul.f32 %v1014_v38, %v4363_v31  ;;  %v1154_v27 = vmul.f32 %v4389_v63, %v1030_v36  ;;  %v1186_v16 = vmul.f32 %v4380_v12, %v1030_v36 }
 0x196   : > { %v1074_v30 = vsub.f32 %v1066_v26, %v1070_v59  ;;  %v1090_v48 = vsub.f32 %v1082_v41, %v1086_v53  ;;  %v1190_v3 = vmul.f32 %v4392_v10, %v1046_v61  ;;  %v1226_v46 = vmul.f32 %v4383_v39, %v1046_v61 }
 0x197   : > { %v1158_v19 = vsub.f32 %v1150_v37, %v1154_v27  ;;  %v1230_v11 = vmul.f32 %v4395_v54, %v1062_v6  ;;  %v1266_v9 = vmul.f32 %v4386_v51, %v1062_v6  ;;  %v962_v32 = vsub.f32 1.0, %v958_v14 }
 0x198   : > { %v1078_v25 = vmul.f32 0.5, %v1074_v30  ;;  %v1094_v55 = vmul.f32 0.5, %v1090_v48  ;;  %v1194_v12 = vsub.f32 %v1186_v16, %v1190_v3  ;;  %v974_v35 = vand.u32 2147483647, %v4440_v2  ;;  %3480 = vset.pattern.permute.xlu0 %v6011_v15 }
 0x199   : > { %v1162_v26 = vmul.f32 0.33333334, %v1158_v19  ;;  %v1234_v38 = vsub.f32 %v1226_v46, %v1230_v11  ;;  %v966_v36 = vmax.f32 %v962_v32, 0.0  ;;  %v3215_v39 = vadd.f32 -10.0, %v4363_v31  ;;  %v4467_v11 = vpop.permute.xlu2 %1488 }
 0x19a   : > { %v1198_v1 = vmul.f32 0.33333334, %v1194_v12  ;;  %v1270_v62 = vmul.f32 %v4398_v18, %v1078_v25  ;;  %v1306_v51 = vmul.f32 %v4389_v63, %v1078_v25  ;;  %v1310_v14 = vmul.f32 %v4408_v24, %v1094_v55  ;;  %v6041_v12 = vld [vmem:[#allocation12_spill] sm:$0xff] }
 0x19b   : > { %2742 = vperm.xlu2 %3452, %v4103_v8   ;;  %v1182_v61 = vmul.f32 %v1177_v44, %v1162_v26  ;;  %v1238_v59 = vmul.f32 0.33333334, %v1234_v38  ;;  %v978_v41 = vsub.f32 1.0, %v974_v35  ;;  %v990_v53 = vand.u32 2147483647, %v3215_v39 }
 0x19c   : > { %2738 = vperm.xlu1 %3451, %v4046_v23   ;;  %v1218_v8 = vmul.f32 %v4145_v4, %v1198_v1  ;;  %v1274_v6 = vsub.f32 %v1266_v9, %v1270_v62  ;;  %v1314_v37 = vsub.f32 %v1306_v51, %v1310_v14  ;;  %v1098_v27 = vmul.f32 %v4395_v54, %v950_v17 }
 0x19d   : > { %v1258_v16 = vmul.f32 %v4148_v20, %v1238_v59  ;;  %v982_v23 = vmax.f32 %v978_v41, 0.0  ;;  %v994_v30 = vsub.f32 1.0, %v990_v53  ;;  %v1102_v48 = vmul.f32 %v4440_v2, %v966_v36  ;;  %v6040_v20 = vld [vmem:[#allocation11_spill] sm:$0xff] }
 0x19e   : > { %v1222_v3 = vadd.f32 %v1218_v8, %v1182_v61  ;;  %v1278_v63 = vmul.f32 0.33333334, %v1274_v6  ;;  %v1318_v46 = vmul.f32 0.33333334, %v1314_v37  ;;  %v1114_v19 = vmul.f32 %v4398_v18, %v966_v36 }
 0x19f   : > { %v998_v4 = vmax.f32 %v994_v30, 0.0  ;;  %v1106_v9 = vsub.f32 %v1098_v27, %v1102_v48  ;;  %v1118_v32 = vmul.f32 %v3215_v39, %v982_v23  ;;  %v1130_v17 = vmul.f32 %v4408_v24, %v982_v23 }
 0x1a0   : > { %v1262_v44 = vadd.f32 %v1258_v16, %v1222_v3  ;;  %v1298_v25 = vmul.f32 %v6040_v20, %v1278_v63  ;;  %v1338_v35 = vmul.f32 %v6041_v12, %v1318_v46  ;;  %v3219_v26 = vadd.f32 -11.0, %v4363_v31 }
 0x1a1   : > { %v1110_v38 = vmul.f32 0.5, %v1106_v9  ;;  %v1122_v36 = vsub.f32 %v1114_v19, %v1118_v32  ;;  %v1346_v1 = vmul.f32 %v4392_v10, %v1094_v55  ;;  %v4476_v62 = vmul.f32 %v1477_v49, %v4419_v5  ;;  %v6042_v9 = vld [vmem:[#allocation16_spill] sm:$0xff] }
 0x1a2   : > { %v1302_v51 = vadd.f32 %v1298_v25, %v1262_v44  ;;  %v1138_v24 = vmul.f32 %v3219_v26, %v998_v4  ;;  %v845_v14 = vand.u32 2147483647, %v4367_v28  ;;  %v861_v61 = vand.u32 2147483647, %v4370_v0 }
 0x1a3   : > { %2754 = vperm.xlu2 %3452, %v4112_v56   ;;  %v1126_v59 = vmul.f32 0.5, %v1122_v36  ;;  %v1350_v31 = vmul.f32 %v4440_v2, %v1110_v38  ;;  %v1386_v41 = vmul.f32 %v4395_v54, %v1110_v38  ;;  %v877_v53 = vand.u32 2147483647, %v4373_v60 }
 0x1a4   : > { %2750 = vperm.xlu1 %3451, %v4117_v22   ;;  %v1342_v8 = vadd.f32 %v1338_v35, %v1302_v51  ;;  %v1142_v10 = vsub.f32 %v1130_v17, %v1138_v24  ;;  %v849_v55 = vsub.f32 1.0, %v845_v14  ;;  %v865_v5 = vsub.f32 1.0, %v861_v61 }
 0x1a5   : > { %v1354_v49 = vsub.f32 %v1346_v1, %v1350_v31  ;;  %v1390_v6 = vmul.f32 %v3215_v39, %v1126_v59  ;;  %v1426_v37 = vmul.f32 %v4398_v18, %v1126_v59  ;;  %v881_v27 = vsub.f32 1.0, %v877_v53  ;;  %v4496_v18 = vpop.permute.xlu2 %1525  ;;  %v6044_v1 = vld [vmem:[#allocation23_spill] sm:$0xff] }
 0x1a6   : > { %v1146_v16 = vmul.f32 0.5, %v1142_v10  ;;  %v853_v23 = vmax.f32 %v849_v55, 0.0  ;;  %v869_v30 = vmax.f32 %v865_v5, 0.0  ;;  %v893_v48 = vand.u32 2147483647, %v4376_v57 }
 0x1a7   : > { %v1358_v3 = vmul.f32 0.33333334, %v1354_v49  ;;  %v1394_v2 = vsub.f32 %v1386_v41, %v1390_v6  ;;  %v885_v63 = vmax.f32 %v881_v27, 0.0  ;;  %v4487_v54 = vadd.f32 -5.0, %v4359_v7  ;;  %v6045_v49 = vld [vmem:[#allocation24_spill] sm:$0xff] }
 0x1a8   : > { %v1430_v46 = vmul.f32 %v3219_v26, %v1146_v16  ;;  %v897_v19 = vsub.f32 1.0, %v893_v48  ;;  %v4490_v4 = vadd.f32 -6.0, %v4359_v7  ;;  %v4493_v39 = vadd.f32 -7.0, %v4359_v7 }
 0x1a9   : > { %v1378_v32 = vmul.f32 %v6042_v9, %v1358_v3  ;;  %v1398_v17 = vmul.f32 0.33333334, %v1394_v2  ;;  %v909_v44 = vand.u32 2147483647, %v4487_v54  ;;  %v4501_v20 = vadd.f32 -8.0, %v4359_v7 }
 0x1aa   : > { %v6043_v25 = vmov 9   ;;  %v1434_v12 = vsub.f32 %v1426_v37, %v1430_v46  ;;  %v901_v35 = vmax.f32 %v897_v19, 0.0  ;;  %v925_v26 = vand.u32 2147483647, %v4490_v4 }
 0x1ab   : > { %3454 = vset.pattern.permute.xlu2 %v6006_v50  ;;  %v941_v38 = vand.u32 2147483647, %v4493_v39  ;;  %v1382_v36 = vadd.f32 %v1378_v32, %v1342_v8  ;;  %v1418_v51 = vmul.f32 %v6044_v1, %v1398_v17  ;;  %v913_v24 = vsub.f32 1.0, %v909_v44  ;;  %v1497_v17 = vpop.permute.xlu1 %1496 }
 0x1ac   : > { %3453 = vset.pattern.permute.xlu1 %v6043_v25  ;;  %2914 = vperm.xlu2 %3454, %v4112_v56   ;;  %v957_v14 = vand.u32 2147483647, %v4501_v20  ;;  %v1438_v61 = vmul.f32 0.33333334, %v1434_v12  ;;  %v929_v59 = vsub.f32 1.0, %v925_v26  ;;  %v4511_v41 = vadd.f32 -9.0, %v4359_v7 }
 0x1ad   : > { %2830 = vperm.xlu1 %3453, %v4117_v22   ;;  %v945_v31 = vsub.f32 1.0, %v941_v38  ;;  %v1422_v53 = vadd.f32 %v1418_v51, %v1382_v36  ;;  %v917_v10 = vmax.f32 %v913_v24, 0.0  ;;  %v4514_v5 = vadd.f32 -10.0, %v4359_v7  ;;  %v6046_v24 = vld [vmem:[#allocation3_spill] sm:$0xff] }
 0x1ae   : > { %v961_v55 = vsub.f32 1.0, %v957_v14  ;;  %v1458_v6 = vmul.f32 %v6045_v49, %v1438_v61  ;;  %v933_v8 = vmax.f32 %v929_v59, 0.0  ;;  %v973_v27 = vand.u32 2147483647, %v4511_v41  ;;  %v4528_v14 = vpop.permute.xlu2 %1535 }
 0x1af   : > { %v949_v37 = vmax.f32 %v945_v31, 0.0  ;;  %v989_v48 = vand.u32 2147483647, %v4514_v5  ;;  %v1001_v3 = vmul.f32 %v853_v23, %v4359_v7  ;;  %v1005_v2 = vmul.f32 %v4373_v60, %v869_v30 }
 0x1b0   : > { %v965_v16 = vmax.f32 %v961_v55, 0.0  ;;  %v1462_v46 = vadd.f32 %v1458_v6, %v1422_v53  ;;  %v977_v19 = vsub.f32 1.0, %v973_v27  ;;  %v1017_v9 = vmul.f32 %v4367_v28, %v869_v30 }
 0x1b1   : > { %v1021_v32 = vmul.f32 %v4376_v57, %v885_v63  ;;  %v993_v44 = vsub.f32 1.0, %v989_v48  ;;  %v1009_v12 = vsub.f32 %v1001_v3, %v1005_v2  ;;  %v1033_v26 = vmul.f32 %v4370_v0, %v885_v63 }
 0x1b2   : > { %v1037_v38 = vmul.f32 %v4487_v54, %v901_v35  ;;  %v1502_v36 = vmul.f32 %v1497_v17, %v1462_v46  ;;  %v981_v1 = vmax.f32 %v977_v19, 0.0  ;;  %v1049_v51 = vmul.f32 %v4373_v60, %v901_v35 }
 0x1b3   : > { %v1025_v23 = vsub.f32 %v1017_v9, %v1021_v32  ;;  %v997_v30 = vmax.f32 %v993_v44, 0.0  ;;  %v1013_v61 = vmul.f32 0.5, %v1009_v12  ;;  %v1053_v31 = vmul.f32 %v4490_v4, %v917_v10 }
 0x1b4   : > { %2910 = vperm.xlu2 %3454, %v4117_v22   ;;  %v1041_v59 = vsub.f32 %v1033_v26, %v1037_v38  ;;  %v1506_v63 = vadd.f32 %v1502_v36, %v4476_v62  ;;  %v1065_v55 = vmul.f32 %v4376_v57, %v917_v10  ;;  %v1069_v22 = vmul.f32 %v4493_v39, %v933_v8 }
 0x1b5   : > { %2826 = vperm.xlu1 %3453, %v6046_v24   ;;  %v1029_v53 = vmul.f32 0.5, %v1025_v23  ;;  %v1057_v6 = vsub.f32 %v1049_v51, %v1053_v31  ;;  %v1081_v35 = vmul.f32 %v4487_v54, %v933_v8  ;;  %v1085_v27 = vmul.f32 %v4501_v20, %v949_v37 }
 0x1b6   : > { %v1045_v49 = vmul.f32 0.5, %v1041_v59  ;;  %1600 = vmatpush.msra.mxu1 %v1506_v63  ;;  %3327 = vmatpush.msra.mxu3 %v1506_v63  ;;  %v1073_v48 = vsub.f32 %v1065_v55, %v1069_v22  ;;  %v1097_v3 = vmul.f32 %v4490_v4, %v949_v37  ;;  %v1101_v2 = vmul.f32 %v4511_v41, %v965_v16 }
 0x1b7   : > { %v3218_v62 = vadd.f32 -11.0, %v4359_v7  ;;  %v1061_v46 = vmul.f32 0.5, %v1057_v6  ;;  %v1089_v19 = vsub.f32 %v1081_v35, %v1085_v27  ;;  %v1113_v10 = vmul.f32 %v4493_v39, %v965_v16 }
 0x1b8   : > { %v1117_v9 = vmul.f32 %v4514_v5, %v981_v1  ;;  %v1077_v32 = vmul.f32 0.5, %v1073_v48  ;;  %v1105_v17 = vsub.f32 %v1097_v3, %v1101_v2  ;;  %v1129_v8 = vmul.f32 %v4501_v20, %v981_v1  ;;  %v6047_v48 = vld [vmem:[#allocation4_spill] sm:$0xff] }
 0x1b9   : > { %v1137_v44 = vmul.f32 %v3218_v62, %v997_v30  ;;  %v1093_v12 = vmul.f32 0.5, %v1089_v19  ;;  %v1149_v38 = vmul.f32 %v1013_v61, %v4359_v7  ;;  %v1153_v37 = vmul.f32 %v4376_v57, %v1029_v53  ;;  %v4554_v61 = vld [vmem:[%s5945_s6 + $0x28] sm:$0xff]  ;;  %v6048_v19 = vld [vmem:[#allocation5_spill] sm:$0xff] }
 0x1ba   : > { %v1121_v26 = vsub.f32 %v1113_v10, %v1117_v9  ;;  %v1109_v36 = vmul.f32 0.5, %v1105_v17  ;;  %v1185_v51 = vmul.f32 %v4367_v28, %v1029_v53  ;;  %v1189_v16 = vmul.f32 %v4487_v54, %v1045_v49 }
 0x1bb   : > { %v1141_v23 = vsub.f32 %v1129_v8, %v1137_v44  ;;  %v1157_v24 = vsub.f32 %v1149_v38, %v1153_v37  ;;  %v1225_v30 = vmul.f32 %v4370_v0, %v1045_v49  ;;  %v1229_v7 = vmul.f32 %v4490_v4, %v1061_v46 }
 0x1bc   : > { %3456 = vset.pattern.permute.xlu2 %v6008_v42  ;;  %v1125_v1 = vmul.f32 0.5, %v1121_v26  ;;  %v1193_v59 = vsub.f32 %v1185_v51, %v1189_v16  ;;  %v1265_v31 = vmul.f32 %v4373_v60, %v1061_v46  ;;  %v1269_v63 = vmul.f32 %v4493_v39, %v1077_v32  ;;  %v6052_v16 = vld [vmem:[#allocation17_spill] sm:$0xff] }
 0x1bd   : > { %3455 = vset.pattern.permute.xlu1 %v6006_v50  ;;  %2962 = vperm.xlu2 %3456, %v4112_v56   ;;  %v1145_v28 = vmul.f32 0.5, %v1141_v23  ;;  %v4559_v56 = vpop.permute.xlu2 %1550  ;;  %v1161_v53 = vmul.f32 0.33333334, %v1157_v24  ;;  %v1233_v55 = vsub.f32 %v1225_v30, %v1229_v7  ;;  %v1305_v0 = vmul.f32 %v4376_v57, %v1077_v32  ;;  %v6049_v32 = vld [vmem:[#allocation8_spill] sm:$0xff] }
 0x1be   : > { %2906 = vperm.xlu1 %3455, %v4554_v61   ;;  %v1309_v22 = vmul.f32 %v4501_v20, %v1093_v12  ;;  %v1197_v49 = vmul.f32 0.33333334, %v1193_v59  ;;  %v1273_v6 = vsub.f32 %v1265_v31, %v1269_v63  ;;  %v1345_v35 = vmul.f32 %v4487_v54, %v1093_v12  ;;  %v6053_v63 = vld [vmem:[#allocation18_spill] sm:$0xff] }
 0x1bf   : > { %v1349_v27 = vmul.f32 %v4511_v41, %v1109_v36  ;;  %v1181_v3 = vmul.f32 %v6047_v48, %v1161_v53  ;;  %v1237_v2 = vmul.f32 0.33333334, %v1233_v55  ;;  %v1385_v46 = vmul.f32 %v4490_v4, %v1109_v36  ;;  %v6050_v41 = vld [vmem:[#allocation9_spill] sm:$0xff] }
 0x1c0   : > { %v1313_v60 = vsub.f32 %v1305_v0, %v1309_v22  ;;  %v1217_v10 = vmul.f32 %v6048_v19, %v1197_v49  ;;  %v1277_v9 = vmul.f32 0.33333334, %v1273_v6  ;;  %v1389_v57 = vmul.f32 %v4514_v5, %v1125_v1  ;;  %v6051_v4 = vld [vmem:[#allocation13_spill] sm:$0xff] }
 0x1c1   : > { %v1353_v17 = vsub.f32 %v1345_v35, %v1349_v27  ;;  %v1257_v20 = vmul.f32 %v6049_v32, %v1237_v2  ;;  %v1425_v44 = vmul.f32 %v4493_v39, %v1125_v1  ;;  %v1429_v54 = vmul.f32 %v3218_v62, %v1145_v28  ;;  %v4585_v39 = vld [vmem:[%s5945_s6 + $0x20] sm:$0xff] }
 0x1c2   : > { %v1317_v8 = vmul.f32 0.33333334, %v1313_v60  ;;  %v1221_v12 = vadd.f32 %v1217_v10, %v1181_v3  ;;  %v1297_v26 = vmul.f32 %v6050_v41, %v1277_v9  ;;  %v1393_v37 = vsub.f32 %v1385_v46, %v1389_v57 }
 0x1c3   : > { %v1357_v38 = vmul.f32 0.33333334, %v1353_v17  ;;  %v1433_v23 = vsub.f32 %v1425_v44, %v1429_v54  ;;  %v4576_v51 = vmul.f32 %v4345_v13, %v4415_v33  ;;  %v4579_v5 = vadd.f32 -1.0, %v4347_v58  ;;  %v4595_v13 = vld [vmem:[%s5945_s6 + $0x18] sm:$0xff] }
 0x1c4   : > { %v1337_v36 = vmul.f32 %v6051_v4, %v1317_v8  ;;  %v1261_v62 = vadd.f32 %v1257_v20, %v1221_v12  ;;  %v1397_v24 = vmul.f32 0.33333334, %v1393_v37  ;;  %v4590_v30 = vadd.f32 -2.0, %v4347_v58  ;;  %v3513_v37 = vld [vmem:[%s5945_s6 + $0x30] sm:$0xff] }
 0x1c5   : > { %3460 = vset.pattern.permute.xlu2 %v6006_v50  ;;  %v1377_v1 = vmul.f32 %v6052_v16, %v1357_v38  ;;  %v1437_v33 = vmul.f32 0.33333334, %v1433_v23  ;;  %v844_v7 = vand.u32 2147483647, %v4579_v5  ;;  %v4600_v28 = vadd.f32 -3.0, %v4347_v58  ;;  %v4610_v22 = vpop.permute.xlu2 %1560 }
 0x1c6   : > { %3459 = vset.pattern.permute.xlu1 %v6043_v25  ;;  %2902 = vperm.xlu2 %3460, %v4585_v39   ;;  %v4603_v59 = vadd.f32 -4.0, %v4347_v58  ;;  %v1301_v31 = vadd.f32 %v1297_v26, %v1261_v62  ;;  %v1417_v53 = vmul.f32 %v6053_v63, %v1397_v24  ;;  %v860_v55 = vand.u32 2147483647, %v4590_v30 }
 0x1c7   : > { %2818 = vperm.xlu1 %3459, %v4595_v13   ;;  %v4608_v0 = vadd.f32 -5.0, %v4347_v58  ;;  %v1457_v49 = vmul.f32 %v4343_v29, %v1437_v33  ;;  %v848_v6 = vsub.f32 1.0, %v844_v7  ;;  %v876_v35 = vand.u32 2147483647, %v4600_v28 }
 0x1c8   : > { %v892_v27 = vand.u32 2147483647, %v4603_v59  ;;  %v1341_v48 = vadd.f32 %v1337_v36, %v1301_v31  ;;  %v864_v3 = vsub.f32 1.0, %v860_v55  ;;  %v4617_v60 = vadd.f32 -6.0, %v4347_v58 }
 0x1c9   : > { %v908_v2 = vand.u32 2147483647, %v4608_v0  ;;  %v852_v46 = vmax.f32 %v848_v6, 0.0  ;;  %v880_v19 = vsub.f32 1.0, %v876_v35  ;;  %v4620_v9 = vadd.f32 -7.0, %v4347_v58  ;;  %v6055_v6 = vld [vmem:[#allocation22_spill] sm:$0xff] }
 0x1ca   : > { %v896_v10 = vsub.f32 1.0, %v892_v27  ;;  %v1381_v17 = vadd.f32 %v1377_v1, %v1341_v48  ;;  %v868_v29 = vmax.f32 %v864_v3, 0.0  ;;  %v924_v32 = vand.u32 2147483647, %v4617_v60 }
 0x1cb   : > { %v912_v57 = vsub.f32 1.0, %v908_v2  ;;  %v884_v20 = vmax.f32 %v880_v19, 0.0  ;;  %v940_v44 = vand.u32 2147483647, %v4620_v9  ;;  %v4625_v54 = vadd.f32 -8.0, %v4347_v58 }
 0x1cc   : > { %v900_v8 = vmax.f32 %v896_v10, 0.0  ;;  %v1421_v12 = vadd.f32 %v1417_v53, %v1381_v17  ;;  %v928_v26 = vsub.f32 1.0, %v924_v32  ;;  %v4629_v38 = vadd.f32 -9.0, %v4347_v58 }
 0x1cd   : > { %v916_v41 = vmax.f32 %v912_v57, 0.0  ;;  %v944_v4 = vsub.f32 1.0, %v940_v44  ;;  %v956_v36 = vand.u32 2147483647, %v4625_v54  ;;  %v4637_v23 = vadd.f32 -10.0, %v4347_v58  ;;  %v4642_v7 = vpop.permute.xlu2 %2342 }
 0x1ce   : > { %3462 = vset.pattern.permute.xlu2 %v6009_v52  ;;  %v1000_v62 = vmul.f32 %v852_v46, %v4347_v58  ;;  %v1461_v16 = vadd.f32 %v1457_v49, %v1421_v12  ;;  %v932_v1 = vmax.f32 %v928_v26, 0.0  ;;  %v972_v24 = vand.u32 2147483647, %v4629_v38  ;;  %6054 = vst [vmem:[#allocation11_spill] sm:$0xff] %v4642_v7 }
 0x1cf   : > { %3461 = vset.pattern.permute.xlu1 %v6008_v42  ;;  %2998 = vperm.xlu2 %3462, %v3513_v37   ;;  %v1004_v33 = vmul.f32 %v4600_v28, %v868_v29  ;;  %v948_v31 = vmax.f32 %v944_v4, 0.0  ;;  %v960_v63 = vsub.f32 1.0, %v956_v36  ;;  %v988_v53 = vand.u32 2147483647, %v4637_v23 }
 0x1d0   : > { %2958 = vperm.xlu1 %3461, %v3513_v37   ;;  %v1016_v55 = vmul.f32 %v4579_v5, %v868_v29  ;;  %v1501_v35 = vmul.f32 %v6055_v6, %v1461_v16  ;;  %v976_v27 = vsub.f32 1.0, %v972_v24  ;;  %v1020_v3 = vmul.f32 %v4603_v59, %v884_v20 }
 0x1d1   : > { %v1008_v48 = vsub.f32 %v1000_v62, %v1004_v33  ;;  %v964_v49 = vmax.f32 %v960_v63, 0.0  ;;  %v992_v2 = vsub.f32 1.0, %v988_v53  ;;  %v1032_v46 = vmul.f32 %v4590_v30, %v884_v20 }
 0x1d2   : > { %v1036_v19 = vmul.f32 %v4608_v0, %v900_v8  ;;  %v1505_v10 = vadd.f32 %v1501_v35, %v4576_v51  ;;  %v980_v17 = vmax.f32 %v976_v27, 0.0  ;;  %v1024_v32 = vsub.f32 %v1016_v55, %v1020_v3 }
 0x1d3   : > { %v1012_v57 = vmul.f32 0.5, %v1008_v48  ;;  %v996_v44 = vmax.f32 %v992_v2, 0.0  ;;  %v1048_v29 = vmul.f32 %v4600_v28, %v900_v8  ;;  %v1052_v26 = vmul.f32 %v4617_v60, %v916_v41 }
 0x1d4   : > { %v1040_v12 = vsub.f32 %v1032_v46, %v1036_v19  ;;  %1601 = vmatpush.msra.mxu1 %v1505_v10  ;;  %3328 = vmatpush.msra.mxu3 %v1505_v10  ;;  %v1028_v37 = vmul.f32 0.5, %v1024_v32  ;;  %v1064_v4 = vmul.f32 %v4603_v59, %v916_v41  ;;  %v1068_v20 = vmul.f32 %v4620_v9, %v932_v1 }
 0x1d5   : > { %v1080_v36 = vmul.f32 %v4608_v0, %v932_v1  ;;  %v1056_v51 = vsub.f32 %v1048_v29, %v1052_v26  ;;  %v1084_v16 = vmul.f32 %v4625_v54, %v948_v31  ;;  %v1096_v24 = vmul.f32 %v4617_v60, %v948_v31  ;;  %v4668_v3 = vpop.permute.xlu2 %2350 }
 0x1d6   : > { %v1044_v62 = vmul.f32 0.5, %v1040_v12  ;;  %v1072_v8 = vsub.f32 %v1064_v4, %v1068_v20  ;;  %v1100_v33 = vmul.f32 %v4629_v38, %v964_v49  ;;  %v1112_v63 = vmul.f32 %v4620_v9, %v964_v49  ;;  %6056 = vst [vmem:[#allocation12_spill] sm:$0xff] %v4668_v3 }
 0x1d7   : > { %3464 = vset.pattern.permute.xlu2 %v6008_v42  ;;  %v1116_v41 = vmul.f32 %v4637_v23, %v980_v17  ;;  %v1060_v1 = vmul.f32 0.5, %v1056_v51  ;;  %v1088_v53 = vsub.f32 %v1080_v36, %v1084_v16  ;;  %v1128_v55 = vmul.f32 %v4625_v54, %v980_v17 }
 0x1d8   : > { %3463 = vset.pattern.permute.xlu1 %v6006_v50  ;;  %2954 = vperm.xlu2 %3464, %v4554_v61   ;;  %v3217_v6 = vadd.f32 -11.0, %v4347_v58  ;;  %v1076_v31 = vmul.f32 0.5, %v1072_v8  ;;  %v1104_v35 = vsub.f32 %v1096_v24, %v1100_v33  ;;  %v1148_v48 = vmul.f32 %v1012_v57, %v4347_v58  ;;  %v4676_v57 = vpop.permute.xlu1 %1530 }
 0x1d9   : > { %2898 = vperm.xlu1 %3463, %v4595_v13   ;;  %v1120_v27 = vsub.f32 %v1112_v63, %v1116_v41  ;;  %v1092_v49 = vmul.f32 0.5, %v1088_v53  ;;  %v1152_v46 = vmul.f32 %v4603_v59, %v1028_v37  ;;  %v1184_v19 = vmul.f32 %v4579_v5, %v1028_v37 }
 0x1da   : > { %v1136_v2 = vmul.f32 %v3217_v6, %v996_v44  ;;  %v1108_v10 = vmul.f32 0.5, %v1104_v35  ;;  %v1188_v17 = vmul.f32 %v4608_v0, %v1044_v62  ;;  %v1224_v12 = vmul.f32 %v4590_v30, %v1044_v62 }
 0x1db   : > { %v1124_v32 = vmul.f32 0.5, %v1120_v27  ;;  %v1156_v26 = vsub.f32 %v1148_v48, %v1152_v46  ;;  %v1228_v4 = vmul.f32 %v4617_v60, %v1060_v1  ;;  %v1264_v58 = vmul.f32 %v4600_v28, %v1060_v1  ;;  %v6057_v28 = vld [vmem:[#allocation2_spill] sm:$0xff] }
 0x1dc   : > { %v1140_v29 = vsub.f32 %v1128_v55, %v1136_v2  ;;  %v1192_v20 = vsub.f32 %v1184_v19, %v1188_v17  ;;  %v1268_v44 = vmul.f32 %v4620_v9, %v1076_v31  ;;  %v1304_v36 = vmul.f32 %v4603_v59, %v1076_v31  ;;  %v6061_v17 = vld [vmem:[#allocation10_spill] sm:$0xff] }
 0x1dd   : > { %v1308_v5 = vmul.f32 %v4625_v54, %v1092_v49  ;;  %v1160_v51 = vmul.f32 0.33333334, %v1156_v26  ;;  %v1232_v16 = vsub.f32 %v1224_v12, %v1228_v4  ;;  %v1344_v30 = vmul.f32 %v4608_v0, %v1092_v49  ;;  %v4691_v0 = vld [vmem:[%s5945_s6 + $0x8] sm:$0xff]  ;;  %v6058_v54 = vld [vmem:[#allocation6_spill] sm:$0xff]  ;;  %v4699_v46 = vpop.permute.xlu2 %2362 }
 0x1de   : > { %v1144_v37 = vmul.f32 0.5, %v1140_v29  ;;  %v1196_v62 = vmul.f32 0.33333334, %v1192_v20  ;;  %v1272_v24 = vsub.f32 %v1264_v58, %v1268_v44  ;;  %v1348_v33 = vmul.f32 %v4629_v38, %v1108_v10  ;;  %6060 = vst [vmem:[#allocation16_spill] sm:$0xff] %v4699_v46  ;;  %v6062_v26 = vld [vmem:[#allocation14_spill] sm:$0xff]  ;;  %v6063_v44 = vld [vmem:[#allocation15_spill] sm:$0xff] }
 0x1df   : > { %v1312_v8 = vsub.f32 %v1304_v36, %v1308_v5  ;;  %v1180_v63 = vmul.f32 %v6057_v28, %v1160_v51  ;;  %v1236_v41 = vmul.f32 0.33333334, %v1232_v16  ;;  %v1384_v1 = vmul.f32 %v4617_v60, %v1108_v10  ;;  %v6065_v16 = vld [vmem:[#allocation21_spill] sm:$0xff] }
 0x1e0   : > { %3466 = vset.pattern.permute.xlu2 %v6043_v25  ;;  %v1388_v59 = vmul.f32 %v4637_v23, %v1124_v32  ;;  %v1216_v38 = vmul.f32 %v6058_v54, %v1196_v62  ;;  %v1276_v53 = vmul.f32 0.33333334, %v1272_v24  ;;  %v1352_v55 = vsub.f32 %v1344_v30, %v1348_v33  ;;  %v6059_v23 = vld [vmem:[#allocation7_spill] sm:$0xff] }
 0x1e1   : > { %3465 = vset.pattern.permute.xlu1 %v6009_v52  ;;  %2810 = vperm.xlu2 %3466, %v4691_v0   ;;  %v1424_v31 = vmul.f32 %v4620_v9, %v1124_v32  ;;  %v1428_v60 = vmul.f32 %v3217_v6, %v1144_v37  ;;  %v1256_v27 = vmul.f32 %v6059_v23, %v1236_v41  ;;  %v1316_v48 = vmul.f32 0.33333334, %v1312_v8  ;;  %v4705_v6 = vpop.permute.xlu1 %1545  ;;  %v6067_v33 = vld [vmem:[#allocation19_spill] sm:$0xff]  ;;  %v1507_v41 = vld [vmem:[%s5944_s5] sm:$0xff] }
 0x1e2   : > { %2994 = vperm.xlu1 %3465, %v4554_v61   ;;  %v1220_v35 = vadd.f32 %v1216_v38, %v1180_v63  ;;  %v1392_v49 = vsub.f32 %v1384_v1, %v1388_v59  ;;  %v820_v2 = vmul.f32 0.5, %v4353_v43  ;;  %v1479_v19 = vmul.f32 %v4410_v40, %v4356_v21  ;;  %v1508_v1 = vld [vmem:[%s5944_s5 + $0x8] sm:$0xff] }
 0x1e3   : > { %v1296_v12 = vmul.f32 %v6061_v17, %v1276_v53  ;;  %v1356_v29 = vmul.f32 0.33333334, %v1352_v55  ;;  %v1432_v61 = vsub.f32 %v1424_v31, %v1428_v60  ;;  %v1336_v4 = vmul.f32 %v6062_v26, %v1316_v48  ;;  %v1512_v59 = vld [vmem:[%s5944_s5 + $0x28] sm:$0xff]  ;;  %v1509_v53 = vld [vmem:[%s5944_s5 + $0x10] sm:$0xff]  ;;  %v1510_v60 = vld [vmem:[%s5944_s5 + $0x18] sm:$0xff] }
 0x1e4   : > { %v1260_v10 = vadd.f32 %v1256_v27, %v1220_v35  ;;  %v1503_v9 = vadd.f32 %v4412_v45, %v1479_v19  ;;  %v1396_v58 = vmul.f32 0.33333334, %v1392_v49  ;;  %v824_v43 = vadd.f32 0.5, %v820_v2  ;;  %v6064_v45 = vld [vmem:[#allocation20_spill] sm:$0xff]  ;;  %v1514_v35 = vld [vmem:[%s5944_s5 + $0x38] sm:$0xff] }
 0x1e5   : > { %v1376_v36 = vmul.f32 %v6063_v44, %v1356_v29  ;;  %v1436_v21 = vmul.f32 0.33333334, %v1432_v61  ;;  %v4716_v62 = vpop.permute.xlu2 %2414  ;;  %v1513_v55 = vld [vmem:[%s5944_s5 + $0x30] sm:$0xff] }
 0x1e6   : > { %v1300_v32 = vadd.f32 %v1296_v12, %v1260_v10  ;;  %v1416_v5 = vmul.f32 %v6064_v45, %v1396_v58  ;;  %v828_v37 = vmul.f32 %v824_v43, %v4258_v47  ;;  %6066 = vst [vmem:[#allocation23_spill] sm:$0xff] %v4716_v62  ;;  %v3515_v47 = vld [vmem:[%s5945_s6] sm:$0xff] }
 0x1e7   : > { %v1456_v30 = vmul.f32 %v6065_v16, %v1436_v21 }
 0x1e8   : > { %v1340_v20 = vadd.f32 %v1336_v4, %v1300_v32  ;;  %v1480_v28 = vmul.f32 %v6067_v33, %v828_v37  ;;  %v4831_v37 = vpop.permute.xlu0 %2334 }
 0x1e9   : > { %3469 = vset.pattern.permute.xlu2 %v6009_v52  ;;  %v4718_v8 = vpop.permute.xlu1 %1555  ;;  %6090 = vst [vmem:[#allocation28_spill] sm:$0xff] %v4831_v37 }
 0x1ea   : > { %3468 = vset.pattern.permute.xlu1 %v6008_v42  ;;  %2990 = vperm.xlu2 %3469, %v4585_v39   ;;  %v1380_v40 = vadd.f32 %v1376_v36, %v1340_v20 }
 0x1eb   : > { %2950 = vperm.xlu1 %3468, %v4585_v39  }
 0x1ec   : > { %v1420_v51 = vadd.f32 %v1416_v5, %v1380_v40 }
 0x1ee   : > { %v1460_v24 = vadd.f32 %v1456_v30, %v1420_v51 }
 0x1f0   : > { %v1500_v63 = vmul.f32 %v4467_v11, %v1460_v24  ;;  %v4734_v11 = vpop.permute.xlu2 %2422 }
 0x1f1   : > { %6068 = vst [vmem:[#allocation24_spill] sm:$0xff] %v4734_v11 }
 0x1f2   : > { %3471 = vset.pattern.permute.xlu2 %v6006_v50  ;;  %v1504_v39 = vadd.f32 %v1500_v63, %v1480_v28  ;;  %v1511_v50 = vld [vmem:[%s5944_s5 + $0x20] sm:$0xff] }
 0x1f3   : > { %3470 = vset.pattern.permute.xlu1 %v6043_v25  ;;  %2890 = vperm.xlu2 %3471, %v4691_v0   ;;  %v4738_v25 = vpop.permute.xlu1 %2338 }
 0x1f4   : > { %2806 = vperm.xlu1 %3470, %v3515_v47   ;;  %1602 = vmatpush.msra.mxu1 %v1504_v39 }
 0x1f5   : > { %3329 = vmatpush.msra.mxu3 %v1504_v39 }
 0x1f6   : > { %1603 = vmatpush.msra.mxu1 %v1503_v9 }
 0x1f7   : > { %3330 = vmatpush.msra.mxu3 %v1503_v9  ;;  %3220 = vmatmul.msk.f32.vlgmr.msra.gmra.mxu1 %vm1563_vm1, %v1507_v41 }
 0x1f8   : > { %3224 = vmatmul.msk.f32.vlgmr.msra.gmra.mxu3 %vm1563_vm1, %v1511_v50  ;;  %v4750_v54 = vpop.permute.xlu2 %2434 }
 0x1f9   : > { %6069 = vst [vmem:[#allocation3_spill] sm:$0xff] %v4750_v54 }
 0x1fb   : > { %2886 = vperm.xlu2 %3471, %v3515_v47   ;;  %v4757_v38 = vpop.permute.xlu1 %2346 }
 0x1fc   : > { %3473 = vset.pattern.permute.xlu1 %v6009_v52 }
 0x1fd   : > { %2986 = vperm.xlu1 %3473, %v4595_v13   ;;  %v3516_v13 = vld [vmem:[%s5945_s6 + $0x10] sm:$0xff] }
 0x1ff   : > { %3221 = vmatmul.msk.f32.gmra.mxu1 %vm1563_vm1, %v1508_v1 }
 0x200   : > { %3225 = vmatmul.msk.f32.gmra.mxu3 %vm1563_vm1, %v1512_v59  ;;  %v4768_v31 = vpop.permute.xlu2 %2494 }
 0x201   : > { %6070 = vst [vmem:[#allocation4_spill] sm:$0xff] %v4768_v31 }
 0x203   : > { %3475 = vset.pattern.permute.xlu2 %v6009_v52  ;;  %v4778_v23 = vpop.permute.xlu1 %2358 }
 0x204   : > { %2982 = vperm.xlu2 %3475, %v3516_v13   ;;  %6071 = vst [vmem:[#allocation5_spill] sm:$0xff] %v4778_v23 }
 0x205   : > { %3474 = vset.pattern.permute.xlu1 %v6008_v42 }
 0x206   : > { %2942 = vperm.xlu1 %3474, %v3516_v13  }
 0x207   : > { %3222 = vmatmul.msk.f32.gmra.mxu1 %vm1563_vm1, %v1509_v53 }
 0x208   : > { %3226 = vmatmul.msk.f32.gmra.mxu3 %vm1563_vm1, %v1513_v55 }
 0x20b   : > { %v4785_v27 = vpop.permute.xlu1 %2410 }
 0x20c   : > { %3477 = vset.pattern.permute.xlu2 %v6008_v42  ;;  %v4782_v42 = vpop.permute.xlu2 %2502 }
 0x20d   : > { %2934 = vperm.xlu2 %3477, %v3515_v47   ;;  %6072 = vst [vmem:[#allocation8_spill] sm:$0xff] %v4782_v42  ;;  %v4851_v47 = vpop.permute.xlu0 %2354 }
 0x20e   : > { %3476 = vset.pattern.permute.xlu1 %v6009_v52  ;;  %6094 = vst [vmem:[#allocation32_spill] sm:$0xff] %v4851_v47 }
 0x20f   : > { %2978 = vperm.xlu1 %3476, %v4691_v0   ;;  %3223 = vmatmul.msk.f32.gmra.mxu1 %vm1563_vm1, %v1510_v60 }
 0x210   : > { %3227 = vmatmul.msk.f32.gmra.mxu3 %vm1563_vm1, %v1514_v35 }
 0x213   : > { %v4789_v49 = vpop.permute.xlu1 %2418 }
 0x214   : > { %v4787_v48 = vpop.permute.xlu2 %2514 }
 0x215   : > { %6073 = vst [vmem:[#allocation9_spill] sm:$0xff] %v4787_v48 }
 0x217   : > { %3479 = vset.pattern.permute.xlu1 %v6011_v15 }
 0x21b   : > { %v4793_v52 = vpop.permute.xlu1 %2430 }
 0x21c   : > { %v4791_v2 = vpop.permute.xlu2 %2574  ;;  %6075 = vst [vmem:[#allocation17_spill] sm:$0xff] %v4793_v52 }
 0x21d   : > { %6074 = vst [vmem:[#allocation13_spill] sm:$0xff] %v4791_v2 }
 0x223   : > { %v4797_v19 = vpop.permute.xlu1 %2490 }
 0x224   : > { %v4795_v0 = vpop.permute.xlu2 %2582  ;;  %6077 = vst [vmem:[#allocation22_spill] sm:$0xff] %v4797_v19 }
 0x225   : > { %6076 = vst [vmem:[#allocation18_spill] sm:$0xff] %v4795_v0 }
 0x22b   : > { %v4801_v17 = vpop.permute.xlu1 %2498 }
 0x22c   : > { %v4799_v10 = vpop.permute.xlu2 %2594 }
 0x22d   : > { %6078 = vst [vmem:[#allocation2_spill] sm:$0xff] %v4799_v10 }
 0x233   : > { %v4805_v15 = vpop.permute.xlu1 %2510 }
 0x234   : > { %v4803_v12 = vpop.permute.xlu2 %2654  ;;  %6080 = vst [vmem:[#allocation7_spill] sm:$0xff] %v4805_v15 }
 0x235   : > { %6079 = vst [vmem:[#allocation6_spill] sm:$0xff] %v4803_v12 }
 0x23b   : > { %v4809_v61 = vpop.permute.xlu1 %2570 }
 0x23c   : > { %v4807_v29 = vpop.permute.xlu2 %2662  ;;  %6082 = vst [vmem:[#allocation14_spill] sm:$0xff] %v4809_v61 }
 0x23d   : > { %6081 = vst [vmem:[#allocation10_spill] sm:$0xff] %v4807_v29 }
 0x243   : > { %v4813_v32 = vpop.permute.xlu1 %2578 }
 0x244   : > { %v4811_v9 = vpop.permute.xlu2 %2674 }
 0x245   : > { %6083 = vst [vmem:[#allocation15_spill] sm:$0xff] %v4811_v9 }
 0x24b   : > { %v4817_v4 = vpop.permute.xlu1 %2590 }
 0x24c   : > { %v4815_v26 = vpop.permute.xlu2 %2734  ;;  %6085 = vst [vmem:[#allocation21_spill] sm:$0xff] %v4817_v4 }
 0x24d   : > { %6084 = vst [vmem:[#allocation20_spill] sm:$0xff] %v4815_v26 }
 0x253   : > { %v4821_v43 = vpop.permute.xlu1 %2650 }
 0x254   : > { %v4819_v58 = vpop.permute.xlu2 %2742  ;;  %6087 = vst [vmem:[#allocation25_spill] sm:$0xff] %v4821_v43 }
 0x255   : > { %6086 = vst [vmem:[#allocation19_spill] sm:$0xff] %v4819_v58 }
 0x25b   : > { %v4828_v40 = vpop.permute.xlu1 %2658 }
 0x25c   : > { %v4823_v44 = vpop.permute.xlu2 %2754 }
 0x25d   : > { %6088 = vst [vmem:[#allocation26_spill] sm:$0xff] %v4823_v44 }
 0x263   : > { %v4846_v63 = vpop.permute.xlu1 %2670 }
 0x264   : > { %v4835_v16 = vpop.permute.xlu2 %2914  ;;  %6093 = vst [vmem:[#allocation31_spill] sm:$0xff] %v4846_v63 }
 0x265   : > { %6091 = vst [vmem:[#allocation29_spill] sm:$0xff] %v4835_v16 }
 0x26b   : > { %v4873_v26 = vpop.permute.xlu1 %2730 }
 0x26c   : > { %6100 = vst [vmem:[#allocation38_spill] sm:$0xff] %v4873_v26 }
 0x274   : > { %v1605_v20 = vpop.f32.mrf.mxu1 }
 0x275   : > { %v4861_v53 = vadd.f32 %v1605_v20, %v4496_v18 }
 0x277   : > { %6096 = vst [vmem:[#allocation34_spill] sm:$0xff] %v4861_v53  ;;  %v1629_v18 = vmul.f32 0.5, %v4861_v53 }
 0x27b   : > { %v1617_v36 = vpop.f32.mrf.mxu3 }
 0x27c   : > { %v4826_v21 = vadd.f32 %v1617_v36, %v4705_v6  ;;  %v1608_v45 = vpop.f32.mrf.mxu1 }
 0x27d   : > { %v4854_v41 = vadd.f32 %v1608_v45, %v4676_v57 }
 0x27e   : > { %6089 = vst [vmem:[#allocation27_spill] sm:$0xff] %v4826_v21  ;;  %v3232_v5 = vadd.f32 2.2, %v4826_v21 }
 0x27f   : > { %6095 = vst [vmem:[#allocation33_spill] sm:$0xff] %v4854_v41  ;;  %v1630_v55 = vmul.f32 0.5, %v4854_v41 }
 0x280   : > { %v4833_v51 = vmul.f32 2.5, %v3232_v5  ;;  %v4864_v5 = vpop.permute.xlu2 %2910 }
 0x281   : > { %6097 = vst [vmem:[#allocation35_spill] sm:$0xff] %v4864_v5  ;;  %3494 = vtanh.f32 %v1630_v55 }
 0x282   : > { %v4838_v33 = vadd.f32 -8.0, %v4833_v51  ;;  %v4841_v28 = vadd.f32 -9.0, %v4833_v51  ;;  %v4844_v6 = vadd.f32 -10.0, %v4833_v51  ;;  %3496 = vtanh.f32 %v1629_v18 }
 0x283   : > { %v1620_v30 = vpop.f32.mrf.mxu3 }
 0x284   : > { %v1611_v24 = vpop.f32.mrf.mxu1  ;;  %6092 = vst [vmem:[#allocation30_spill] sm:$0xff] %v4841_v28  ;;  %v4849_v39 = vadd.f32 %v1620_v30, %v4559_v56  ;;  %v1921_v50 = vand.u32 2147483647, %v4838_v33  ;;  %v1953_v1 = vand.u32 2147483647, %v4841_v28  ;;  %v4871_v30 = vpop.permute.xlu0 %2406 }
 0x285   : > { %v1985_v59 = vand.u32 2147483647, %v4844_v6  ;;  %6099 = vst [vmem:[#allocation37_spill] sm:$0xff] %v4871_v30  ;;  %v4928_v30 = vpop.permute.xlu1 %2738 }
 0x286   : > { %v3233_v13 = vadd.f32 2.2, %v4849_v39  ;;  %v1929_v60 = vsub.f32 1.0, %v1921_v50  ;;  %v1961_v35 = vsub.f32 1.0, %v1953_v1  ;;  %v3228_v50 = vadd.f32 2.2, %v4861_v53 }
 0x287   : > { %v1993_v36 = vsub.f32 1.0, %v1985_v59  ;;  %v1633_v1 = vmul.f32 0.5, %v4826_v21  ;;  %v4879_v59 = vadd.f32 %v1611_v24, %v4528_v14  ;;  %v1634_v14 = vmul.f32 0.5, %v4849_v39  ;;  %v3495_v4 = vpop.eup %3494 }
 0x288   : > { %v4869_v45 = vmul.f32 2.5, %v3233_v13  ;;  %v1937_v20 = vmax.f32 %v1929_v60, 0.0  ;;  %v1969_v63 = vmax.f32 %v1961_v35, 0.0  ;;  %v4883_v13 = vadd.f32 -7.0, %v4833_v51  ;;  %v4924_v54 = vpop.eup %3496 }
 0x289   : > { %v2001_v12 = vmax.f32 %v1993_v36, 0.0  ;;  %6101 = vst [vmem:[#allocation39_spill] sm:$0xff] %v4879_v59  ;;  %v3229_v35 = vadd.f32 2.2, %v4854_v41  ;;  %v4902_v15 = vmul.f32 2.5, %v3228_v50  ;;  %3498 = vtanh.f32 %v1633_v1 }
 0x28a   : > { %6098 = vst [vmem:[#allocation36_spill] sm:$0xff] %v4869_v45  ;;  %v4889_v55 = vadd.f32 -8.0, %v4869_v45  ;;  %v4892_v60 = vadd.f32 -9.0, %v4869_v45  ;;  %v2233_v36 = vmul.f32 %v4883_v13, %v1937_v20  ;;  %v2241_v53 = vmul.f32 %v4844_v6, %v1969_v63 }
 0x28b   : > { %v2265_v21 = vmul.f32 %v4838_v33, %v1969_v63  ;;  %6104 = vst [vmem:[#allocation42_spill] sm:$0xff] %v4902_v15  ;;  %v1631_v18 = vmul.f32 0.5, %v4879_v59  ;;  %v1623_v23 = vpop.f32.mrf.mxu3  ;;  %v4913_v63 = vpop.permute.xlu2 %2962  ;;  %v3230_v50 = vadd.f32 2.2, %v4879_v59  ;;  %3500 = vtanh.f32 %v1634_v14 }
 0x28c   : > { %v1614_v56 = vpop.f32.mrf.mxu1  ;;  %6102 = vst [vmem:[#allocation40_spill] sm:$0xff] %v4889_v55  ;;  %v1922_v41 = vand.u32 2147483647, %v4889_v55  ;;  %v1954_v52 = vand.u32 2147483647, %v4892_v60  ;;  %v2249_v9 = vsub.f32 %v2233_v36, %v2241_v53  ;;  %v1646_v48 = vmul.f32 0.5, %v3495_v4  ;;  %v4926_v46 = vpop.permute.xlu0 %2426 }
 0x28d   : > { %v4867_v57 = vadd.f32 %v1614_v56, %v4421_v34  ;;  %v4886_v56 = vadd.f32 -11.0, %v4833_v51  ;;  %6103 = vst [vmem:[#allocation41_spill] sm:$0xff] %v4892_v60  ;;  %3502 = vtanh.f32 %v1631_v18  ;;  %v4934_v59 = vadd.f32 -7.0, %v4869_v45  ;;  %v4990_v26 = vpop.permute.xlu1 %2750 }
 0x28e   : > { %6105 = vst [vmem:[#allocation43_spill] sm:$0xff] %v4913_v63  ;;  %v4937_v63 = vadd.f32 %v1623_v23, %v4718_v8  ;;  %v4939_v53 = vsub.f32 1.0, %v1922_v41  ;;  %v4945_v36 = vmul.f32 2.5, %v3230_v50  ;;  %v2257_v8 = vmul.f32 0.5, %v2249_v9 }
 0x28f   : > { %v3231_v34 = vadd.f32 2.2, %v4867_v57  ;;  %v2281_v5 = vmul.f32 %v4886_v56, %v2001_v12  ;;  %v4915_v12 = vmul.f32 2.5, %v3229_v35  ;;  %6106 = vst [vmem:[#allocation44_spill] sm:$0xff] %v4924_v54  ;;  %v4931_v35 = vmul.f32 %v4841_v28, %v1937_v20  ;;  %v4943_v14 = vpop.eup %3498 }
 0x290   : > { %6107 = vst [vmem:[#allocation45_spill] sm:$0xff] %v4926_v46  ;;  %v4953_v41 = vadd.f32 -11.0, %v4869_v45  ;;  %v1635_v37 = vmul.f32 0.5, %v4937_v63  ;;  %v4959_v2 = vadd.f32 0.5, %v1646_v48  ;;  %v1938_v7 = vmax.f32 %v4939_v53, 0.0 }
 0x291   : > { %v4896_v24 = vmul.f32 2.5, %v3231_v34  ;;  %v4908_v34 = vadd.f32 -10.0, %v4869_v45  ;;  %v2289_v10 = vsub.f32 %v2265_v21, %v2281_v5  ;;  %6108 = vst [vmem:[#allocation46_spill] sm:$0xff] %v4937_v63  ;;  %v1962_v21 = vsub.f32 1.0, %v1954_v52  ;;  %v3501_v62 = vpop.eup %3500 }
 0x292   : > { %6109 = vst [vmem:[#allocation47_spill] sm:$0xff] %v4943_v14  ;;  %v3234_v14 = vadd.f32 2.2, %v4937_v63  ;;  %v1632_v46 = vmul.f32 0.5, %v4867_v57  ;;  %3504 = vtanh.f32 %v1635_v37 }
 0x293   : > { %v4911_v16 = vadd.f32 -1.0, %v4896_v24  ;;  %v4919_v1 = vadd.f32 -2.0, %v4896_v24  ;;  %v4922_v44 = vadd.f32 -3.0, %v4896_v24  ;;  %v1986_v4 = vand.u32 2147483647, %v4908_v34  ;;  %6110 = vst [vmem:[#allocation48_spill] sm:$0xff] %v4945_v36  ;;  %v4967_v15 = vpop.eup %3502  ;;  %v2903_v53 = vpop.permute.xlu2 %2902 }
 0x294   : > { %v4950_v54 = vadd.f32 -4.0, %v4896_v24  ;;  %v2297_v23 = vmul.f32 0.5, %v2289_v10  ;;  %v4956_v52 = vadd.f32 -5.0, %v4896_v24  ;;  %6111 = vst [vmem:[#allocation49_spill] sm:$0xff] %v4959_v2  ;;  %v4963_v31 = vadd.f32 -6.0, %v4896_v24  ;;  %v4988_v63 = vpop.permute.xlu0 %2486 }
 0x295   : > { %v1696_v5 = vand.u32 2147483647, %v4911_v16  ;;  %v1728_v20 = vand.u32 2147483647, %v4919_v1  ;;  %v1760_v18 = vand.u32 2147483647, %v4922_v44  ;;  %v2857_v2 = vmul.f32 %v4883_v13, %v2257_v8 }
 0x296   : > { %v1792_v50 = vand.u32 2147483647, %v4950_v54  ;;  %v1970_v9 = vmax.f32 %v1962_v21, 0.0  ;;  %v1994_v10 = vsub.f32 1.0, %v1986_v4  ;;  %6112 = vst [vmem:[#allocation50_spill] sm:$0xff] %v4967_v15  ;;  %v2865_v58 = vmul.f32 %v4886_v56, %v2297_v23 }
 0x297   : > { %v1704_v47 = vsub.f32 1.0, %v1696_v5  ;;  %v1736_v36 = vsub.f32 1.0, %v1728_v20  ;;  %v1768_v48 = vsub.f32 1.0, %v1760_v18  ;;  %v1824_v29 = vand.u32 2147483647, %v4956_v52  ;;  %6115 = vst [vmem:[#allocation53_spill] sm:$0xff] %v4988_v63 }
 0x298   : > { %v4974_v0 = vadd.f32 -7.0, %v4896_v24  ;;  %v4977_v21 = vmul.f32 %v4844_v6, %v2257_v8  ;;  %v1800_v4 = vsub.f32 1.0, %v1792_v50  ;;  %v1856_v15 = vand.u32 2147483647, %v4963_v31  ;;  %6116 = vst [vmem:[#allocation54_spill] sm:$0xff] %v4990_v26 }
 0x299   : > { %v4981_v5 = vadd.f32 -8.0, %v4896_v24  ;;  %v2002_v20 = vmax.f32 %v1994_v10, 0.0  ;;  %v2234_v18 = vmul.f32 %v4934_v59, %v1938_v7  ;;  %v2242_v56 = vmul.f32 %v4908_v34, %v1970_v9 }
 0x29a   : > { %6113 = vst [vmem:[#allocation51_spill] sm:$0xff] %v4974_v0  ;;  %v4986_v23 = vadd.f32 -9.0, %v4896_v24  ;;  %v1712_v6 = vmax.f32 %v1704_v47, 0.0  ;;  %v1744_v8 = vmax.f32 %v1736_v36, 0.0  ;;  %v1776_v50 = vmax.f32 %v1768_v48, 0.0  ;;  %v1626_v47 = vpop.f32.mrf.mxu3 }
 0x29b   : > { %6114 = vst [vmem:[#allocation52_spill] sm:$0xff] %v4977_v21  ;;  %v2873_v21 = vsub.f32 %v2857_v2, %v2865_v58  ;;  %v4992_v42 = vmul.f32 2.5, %v3234_v14  ;;  %v1832_v11 = vsub.f32 1.0, %v1824_v29  ;;  %v1888_v10 = vand.u32 2147483647, %v4974_v0 }
 0x29c   : > { %3506 = vtanh.f32 %v1632_v46  ;;  %v1808_v3 = vmax.f32 %v1800_v4, 0.0  ;;  %v1864_v28 = vsub.f32 1.0, %v1856_v15  ;;  %v1920_v45 = vand.u32 2147483647, %v4981_v5 }
 0x29d   : > { %6117 = vst [vmem:[#allocation55_spill] sm:$0xff] %v4992_v42  ;;  %v2250_v43 = vsub.f32 %v2234_v18, %v2242_v56  ;;  %v2266_v63 = vmul.f32 %v4889_v55, %v1970_v9  ;;  %v2282_v26 = vmul.f32 %v4953_v41, %v2002_v20  ;;  %v1952_v37 = vand.u32 2147483647, %v4986_v23  ;;  %v5006_v9 = vpop.eup %3504 }
 0x29e   : > { %v2008_v2 = vmul.f32 %v1712_v6, %v4896_v24  ;;  %v2016_v58 = vmul.f32 %v4922_v44, %v1744_v8  ;;  %v2040_v29 = vmul.f32 %v4911_v16, %v1744_v8  ;;  %v2048_v46 = vmul.f32 %v4950_v54, %v1776_v50 }
 0x29f   : > { %v2881_v14 = vmul.f32 0.33333334, %v2873_v21  ;;  %v5004_v15 = vmul.f32 %v4892_v60, %v1938_v7  ;;  %v1840_v36 = vmax.f32 %v1832_v11, 0.0  ;;  %v1896_v48 = vsub.f32 1.0, %v1888_v10  ;;  %v5018_v11 = vpop.permute.xlu2 %2998 }
 0x2a0   : > { %v1872_v4 = vmax.f32 %v1864_v28, 0.0  ;;  %v1928_v20 = vsub.f32 1.0, %v1920_v45  ;;  %v2072_v18 = vmul.f32 %v4919_v1, %v1776_v50  ;;  %v2080_v56 = vmul.f32 %v4956_v52, %v1808_v3  ;;  %6120 = vst [vmem:[#allocation58_spill] sm:$0xff] %v5018_v11 }
 0x2a1   : > { %6118 = vst [vmem:[#allocation56_spill] sm:$0xff] %v5004_v15  ;;  %v1650_v6 = vmul.f32 0.5, %v3501_v62  ;;  %v5011_v42 = vadd.f32 %v1626_v47, %v4610_v22  ;;  %v5013_v8 = vsub.f32 1.0, %v1952_v37  ;;  %v5016_v21 = vadd.f32 -1.0, %v4915_v12  ;;  %v5024_v47 = vpop.permute.xlu0 %2506  ;;  %v5026_v37 = vpop.permute.xlu1 %2830 }
 0x2a2   : > { %v3507_v7 = vpop.eup %3506  ;;  %v2258_v10 = vmul.f32 0.5, %v2250_v43  ;;  %v2290_v60 = vsub.f32 %v2266_v63, %v2282_v26  ;;  %v2024_v28 = vsub.f32 %v2008_v2, %v2016_v58  ;;  %v2056_v45 = vsub.f32 %v2040_v29, %v2048_v46  ;;  %6122 = vst [vmem:[#allocation60_spill] sm:$0xff] %v5024_v47 }
 0x2a3   : > { %6119 = vst [vmem:[#allocation57_spill] sm:$0xff] %v5011_v42  ;;  %v5020_v15 = vmul.f32 %v2903_v53, %v2881_v14  ;;  %v1904_v50 = vmax.f32 %v1896_v48, 0.0  ;;  %v2104_v62 = vmul.f32 %v4922_v44, %v1808_v3  ;;  %v2112_v22 = vmul.f32 %v4963_v31, %v1840_v36 }
 0x2a4   : > { %6123 = vst [vmem:[#allocation61_spill] sm:$0xff] %v5026_v37  ;;  %v1936_v55 = vmax.f32 %v1928_v20, 0.0  ;;  %v2088_v61 = vsub.f32 %v2072_v18, %v2080_v56  ;;  %v2136_v19 = vmul.f32 %v4950_v54, %v1840_v36  ;;  %v2144_v43 = vmul.f32 %v4974_v0, %v1872_v4 }
 0x2a5   : > { %6121 = vst [vmem:[#allocation59_spill] sm:$0xff] %v5020_v15  ;;  %v1658_v26 = vadd.f32 0.5, %v1650_v6  ;;  %v1636_v63 = vmul.f32 0.5, %v5011_v42  ;;  %v3235_v53 = vadd.f32 2.2, %v5011_v42  ;;  %v2298_v3 = vmul.f32 0.5, %v2290_v60 }
 0x2a6   : > { %v5034_v58 = vmul.f32 %v4908_v34, %v2258_v10  ;;  %v2032_v29 = vmul.f32 0.5, %v2024_v28  ;;  %v2064_v46 = vmul.f32 0.5, %v2056_v45  ;;  %v5037_v14 = vadd.f32 -10.0, %v4896_v24 }
 0x2a7   : > { %v2120_v48 = vsub.f32 %v2104_v62, %v2112_v22  ;;  %v2168_v36 = vmul.f32 %v4956_v52, %v1872_v4  ;;  %v2176_v20 = vmul.f32 %v4981_v5, %v1904_v50  ;;  %v2096_v18 = vmul.f32 0.5, %v2088_v61 }
 0x2a8   : > { %6124 = vst [vmem:[#allocation62_spill] sm:$0xff] %v5034_v58  ;;  %v2152_v56 = vsub.f32 %v2136_v19, %v2144_v43  ;;  %v2200_v6 = vmul.f32 %v4963_v31, %v1904_v50  ;;  %v2208_v2 = vmul.f32 %v4986_v23, %v1936_v55  ;;  %v1648_v60 = vmul.f32 0.5, %v3507_v7 }
 0x2a9   : > { %v1666_v34 = vmul.f32 %v1658_v26, %v4849_v39  ;;  %v2232_v28 = vmul.f32 %v4974_v0, %v1936_v55  ;;  %v6125_v45 = vmax.f32 %v5013_v8, 0.0  ;;  %v5049_v62 = vmul.f32 %v4934_v59, %v2258_v10  ;;  %v2955_v55 = vpop.permute.xlu2 %2954 }
 0x2aa   : > { %v5052_v4 = vmul.f32 %v4953_v41, %v2298_v3  ;;  %v2304_v19 = vmul.f32 %v2032_v29, %v4896_v24  ;;  %v2312_v61 = vmul.f32 %v4950_v54, %v2064_v46  ;;  %3508 = vtanh.f32 %v1636_v63  ;;  %v5065_v29 = vpop.permute.xlu0 %2566  ;;  %v5067_v63 = vpop.permute.xlu1 %2826 }
 0x2ab   : > { %v2240_v11 = vmul.f32 %v5037_v14, %v6125_v45  ;;  %v5056_v7 = vmul.f32 2.5, %v3235_v53  ;;  %v2128_v39 = vmul.f32 0.5, %v2120_v48  ;;  %v2184_v50 = vsub.f32 %v2168_v36, %v2176_v20  ;;  %6128 = vst [vmem:[#allocation65_spill] sm:$0xff] %v5065_v29 }
 0x2ac   : > { %v2160_v22 = vmul.f32 0.5, %v2152_v56  ;;  %v2216_v43 = vsub.f32 %v2200_v6, %v2208_v2  ;;  %v2376_v26 = vmul.f32 %v4911_v16, %v2064_v46  ;;  %v2384_v10 = vmul.f32 %v4956_v52, %v2096_v18  ;;  %6129 = vst [vmem:[#allocation66_spill] sm:$0xff] %v5067_v63 }
 0x2ad   : > { %6126 = vst [vmem:[#allocation63_spill] sm:$0xff] %v5056_v7  ;;  %v1656_v45 = vadd.f32 0.5, %v1648_v60  ;;  %v5060_v15 = vmul.f32 %v2955_v55, %v1666_v34  ;;  %v2248_v41 = vsub.f32 %v2232_v28, %v2240_v11  ;;  %v5063_v3 = vadd.f32 -2.0, %v4915_v12 }
 0x2ae   : > { %v2320_v48 = vsub.f32 %v2304_v19, %v2312_v61  ;;  %v5072_v2 = vadd.f32 -3.0, %v4915_v12  ;;  %v5075_v16 = vadd.f32 -4.0, %v4915_v12  ;;  %v2192_v46 = vmul.f32 0.5, %v2184_v50 }
 0x2af   : > { %6127 = vst [vmem:[#allocation64_spill] sm:$0xff] %v5060_v15  ;;  %v2456_v11 = vmul.f32 %v4919_v1, %v2096_v18  ;;  %v2464_v36 = vmul.f32 %v4963_v31, %v2128_v39  ;;  %v5080_v20 = vadd.f32 -5.0, %v4915_v12  ;;  %v2224_v56 = vmul.f32 0.5, %v2216_v43 }
 0x2b0   : > { %v2392_v6 = vsub.f32 %v2376_v26, %v2384_v10  ;;  %v2536_v60 = vmul.f32 %v4922_v44, %v2128_v39  ;;  %v2544_v34 = vmul.f32 %v4974_v0, %v2160_v22  ;;  %v5084_v28 = vpop.eup %3508  ;;  %v5086_v19 = vmul.f32 0.5, %v2248_v41 }
 0x2b1   : > { %6130 = vst [vmem:[#allocation67_spill] sm:$0xff] %v5084_v28  ;;  %v1694_v61 = vand.u32 2147483647, %v5016_v21  ;;  %v1726_v50 = vand.u32 2147483647, %v5063_v3  ;;  %v5091_v1 = vadd.f32 -6.0, %v4915_v12  ;;  %v2616_v55 = vmul.f32 %v4950_v54, %v2160_v22 }
 0x2b2   : > { %6131 = vst [vmem:[#allocation68_spill] sm:$0xff] %v5086_v19  ;;  %v2328_v18 = vmul.f32 0.33333334, %v2320_v48  ;;  %v1758_v43 = vand.u32 2147483647, %v5072_v2  ;;  %v2472_v39 = vsub.f32 %v2456_v11, %v2464_v36  ;;  %v2624_v26 = vmul.f32 %v4981_v5, %v2192_v46 }
 0x2b3   : > { %v1790_v44 = vand.u32 2147483647, %v5075_v16  ;;  %v1822_v10 = vand.u32 2147483647, %v5080_v20  ;;  %v5099_v41 = vadd.f32 -7.0, %v4915_v12  ;;  %v2552_v15 = vsub.f32 %v2536_v60, %v2544_v34  ;;  %v5114_v60 = vpop.permute.xlu1 %2906 }
 0x2b4   : > { %v2400_v53 = vmul.f32 0.33333334, %v2392_v6  ;;  %v2696_v37 = vmul.f32 %v4956_v52, %v2192_v46  ;;  %v2704_v48 = vmul.f32 %v4986_v23, %v2224_v56  ;;  %v1702_v29 = vsub.f32 1.0, %v1694_v61  ;;  %v5112_v46 = vpop.permute.xlu0 %2586  ;;  %6133 = vst [vmem:[#allocation70_spill] sm:$0xff] %v5114_v60 }
 0x2b5   : > { %v1734_v54 = vsub.f32 1.0, %v1726_v50  ;;  %v1854_v22 = vand.u32 2147483647, %v5091_v1  ;;  %v5105_v42 = vadd.f32 -8.0, %v4915_v12  ;;  %v2368_v11 = vmul.f32 %v4757_v38, %v2328_v18  ;;  %6132 = vst [vmem:[#allocation69_spill] sm:$0xff] %v5112_v46 }
 0x2b6   : > { %v2776_v36 = vmul.f32 %v4963_v31, %v2224_v56  ;;  %v1766_v28 = vsub.f32 1.0, %v1758_v43  ;;  %v1798_v7 = vsub.f32 1.0, %v1790_v44  ;;  %v2480_v63 = vmul.f32 0.33333334, %v2472_v39 }
 0x2b7   : > { %v2784_v6 = vmul.f32 %v5037_v14, %v5086_v19  ;;  %v1830_v52 = vsub.f32 1.0, %v1822_v10  ;;  %v1886_v23 = vand.u32 2147483647, %v5099_v41  ;;  %v2440_v34 = vmul.f32 %v4789_v49, %v2400_v53 }
 0x2b8   : > { %v2632_v61 = vsub.f32 %v2616_v55, %v2624_v26  ;;  %v2712_v50 = vsub.f32 %v2696_v37, %v2704_v48  ;;  %v5118_v38 = vadd.f32 -9.0, %v4915_v12  ;;  %v1710_v31 = vmax.f32 %v1702_v29, 0.0 }
 0x2b9   : > { %v1742_v56 = vmax.f32 %v1734_v54, 0.0  ;;  %v1862_v18 = vsub.f32 1.0, %v1854_v22  ;;  %v1918_v43 = vand.u32 2147483647, %v5105_v42  ;;  %v5122_v44 = vmul.f32 %v1656_v45, %v4867_v57 }
 0x2ba   : > { %v2560_v39 = vmul.f32 0.33333334, %v2552_v15  ;;  %v1774_v10 = vmax.f32 %v1766_v28, 0.0  ;;  %v1806_v46 = vmax.f32 %v1798_v7, 0.0  ;;  %v2520_v58 = vmul.f32 %v4801_v17, %v2480_v63 }
 0x2bb   : > { %6134 = vst [vmem:[#allocation71_spill] sm:$0xff] %v5122_v44  ;;  %v2792_v47 = vsub.f32 %v2776_v36, %v2784_v6  ;;  %v1838_v49 = vmax.f32 %v1830_v52, 0.0  ;;  %v1894_v53 = vsub.f32 1.0, %v1886_v23  ;;  %v2448_v37 = vadd.f32 %v2440_v34, %v2368_v11 }
 0x2bc   : > { %v2640_v55 = vmul.f32 0.33333334, %v2632_v61  ;;  %v2720_v26 = vmul.f32 0.33333334, %v2712_v50  ;;  %v1950_v29 = vand.u32 2147483647, %v5118_v38  ;;  %v2006_v22 = vmul.f32 %v1710_v31, %v4915_v12 }
 0x2bd   : > { %v1870_v48 = vmax.f32 %v1862_v18, 0.0  ;;  %v1926_v54 = vsub.f32 1.0, %v1918_v43  ;;  %v2014_v57 = vmul.f32 %v5072_v2, %v1742_v56  ;;  %v2038_v15 = vmul.f32 %v5016_v21, %v1742_v56  ;;  %v5144_v18 = vpop.permute.xlu0 %2646 }
 0x2be   : > { %v2046_v7 = vmul.f32 %v5075_v16, %v1774_v10  ;;  %v2070_v17 = vmul.f32 %v5063_v3, %v1774_v10  ;;  %v2078_v45 = vmul.f32 %v5080_v20, %v1806_v46  ;;  %v2800_v63 = vmul.f32 0.33333334, %v2792_v47  ;;  %6138 = vst [vmem:[#allocation74_spill] sm:$0xff] %v5144_v18 }
 0x2bf   : > { %v1902_v28 = vmax.f32 %v1894_v53, 0.0  ;;  %v2102_v11 = vmul.f32 %v5072_v2, %v1806_v46  ;;  %v2110_v36 = vmul.f32 %v5091_v1, %v1838_v49  ;;  %v6135_v6 = vsub.f32 %v5049_v62, %v5052_v4  ;;  %v2819_v46 = vpop.permute.xlu1 %2818 }
 0x2c0   : > { %v2528_v23 = vadd.f32 %v2520_v58, %v2448_v37  ;;  %v2600_v34 = vmul.f32 %v4813_v32, %v2560_v39  ;;  %v5140_v61 = vsub.f32 1.0, %v1950_v29  ;;  %v1934_v50 = vmax.f32 %v1926_v54, 0.0 }
 0x2c1   : > { %v5137_v52 = vmul.f32 0.33333334, %v6135_v6  ;;  %v2022_v31 = vsub.f32 %v2006_v22, %v2014_v57  ;;  %v2134_v56 = vmul.f32 %v5075_v16, %v1838_v49  ;;  %v2142_v47 = vmul.f32 %v5099_v41, %v1870_v48 }
 0x2c2   : > { %6137 = vst [vmem:[#allocation73_spill] sm:$0xff] %v5140_v61  ;;  %v5147_v43 = vmul.f32 %v4828_v40, %v2640_v55  ;;  %v5150_v62 = vmul.f32 %v4928_v30, %v2720_v26  ;;  %v2054_v58 = vsub.f32 %v2038_v15, %v2046_v7  ;;  %v2086_v4 = vsub.f32 %v2070_v17, %v2078_v45 }
 0x2c3   : > { %6136 = vst [vmem:[#allocation72_spill] sm:$0xff] %v5137_v52  ;;  %v5152_v32 = vmul.f32 %v2819_v46, %v2800_v63  ;;  %v2118_v39 = vsub.f32 %v2102_v11, %v2110_v36  ;;  %v2166_v10 = vmul.f32 %v5080_v20, %v1870_v48  ;;  %v2174_v49 = vmul.f32 %v5105_v42, %v1902_v28 }
 0x2c4   : > { %v5156_v53 = vadd.f32 %v2600_v34, %v2528_v23  ;;  %v5992_v37 = vmax.f32 %v5140_v61, 0.0  ;;  %v5160_v29 = vadd.f32 -10.0, %v4915_v12  ;;  %v5163_v40 = vadd.f32 -1.0, %v4833_v51 }
 0x2c5   : > { %6139 = vst [vmem:[#allocation75_spill] sm:$0xff] %v5152_v32  ;;  %v2030_v30 = vmul.f32 0.5, %v2022_v31  ;;  %v2150_v55 = vsub.f32 %v2134_v56, %v2142_v47  ;;  %v2198_v26 = vmul.f32 %v5091_v1, %v1902_v28  ;;  %v2206_v54 = vmul.f32 %v5118_v38, %v1934_v50 }
 0x2c6   : > { %v2062_v22 = vmul.f32 0.5, %v2054_v58  ;;  %v2094_v48 = vmul.f32 0.5, %v2086_v4  ;;  %v1697_v57 = vand.u32 2147483647, %v5163_v40  ;;  %v5169_v15 = vadd.f32 -2.0, %v4833_v51 }
 0x2c7   : > { %v2126_v7 = vmul.f32 0.5, %v2118_v39  ;;  %v2182_v17 = vsub.f32 %v2166_v10, %v2174_v49  ;;  %v2230_v45 = vmul.f32 %v5099_v41, %v1934_v50  ;;  %v5173_v63 = vadd.f32 -3.0, %v4833_v51 }
 0x2c8   : > { %v2238_v28 = vmul.f32 %v5160_v29, %v5992_v37  ;;  %v1705_v11 = vsub.f32 1.0, %v1697_v57  ;;  %v1729_v36 = vand.u32 2147483647, %v5169_v15  ;;  %v5180_v6 = vadd.f32 -4.0, %v4833_v51 }
 0x2c9   : > { %v2158_v23 = vmul.f32 0.5, %v2150_v55  ;;  %v2214_v34 = vsub.f32 %v2198_v26, %v2206_v54  ;;  %v1761_v31 = vand.u32 2147483647, %v5173_v63  ;;  %v5184_v56 = vadd.f32 -5.0, %v4833_v51  ;;  %v5193_v55 = vpop.permute.xlu0 %2666 }
 0x2ca   : > { %v2302_v50 = vmul.f32 %v2030_v30, %v4915_v12  ;;  %v1713_v47 = vmax.f32 %v1705_v11, 0.0  ;;  %v1737_v46 = vsub.f32 1.0, %v1729_v36  ;;  %v1793_v58 = vand.u32 2147483647, %v5180_v6  ;;  %6140 = vst [vmem:[#allocation76_spill] sm:$0xff] %v5193_v55 }
 0x2cb   : > { %v2310_v4 = vmul.f32 %v5075_v16, %v2062_v22  ;;  %v1769_v39 = vsub.f32 1.0, %v1761_v31  ;;  %v1825_v10 = vand.u32 2147483647, %v5184_v56  ;;  %v5191_v49 = vadd.f32 -6.0, %v4833_v51 }
 0x2cc   : > { %v2374_v26 = vmul.f32 %v5016_v21, %v2062_v22  ;;  %v2382_v54 = vmul.f32 %v5080_v20, %v2094_v48  ;;  %v1745_v57 = vmax.f32 %v1737_v46, 0.0  ;;  %v1801_v30 = vsub.f32 1.0, %v1793_v58 }
 0x2cd   : > { %v1777_v11 = vmax.f32 %v1769_v39, 0.0  ;;  %v1833_v36 = vsub.f32 1.0, %v1825_v10  ;;  %v1857_v37 = vand.u32 2147483647, %v5191_v49  ;;  %v1889_v44 = vand.u32 2147483647, %v4883_v13 }
 0x2ce   : > { %v1809_v31 = vmax.f32 %v1801_v30, 0.0  ;;  %v2009_v18 = vmul.f32 %v1713_v47, %v4833_v51  ;;  %v2017_v32 = vmul.f32 %v5173_v63, %v1745_v57  ;;  %v2041_v60 = vmul.f32 %v5163_v40, %v1745_v57 }
 0x2cf   : > { %v2190_v55 = vmul.f32 0.5, %v2182_v17  ;;  %v2318_v52 = vsub.f32 %v2302_v50, %v2310_v4  ;;  %v1841_v21 = vmax.f32 %v1833_v36, 0.0  ;;  %v2049_v22 = vmul.f32 %v5180_v6, %v1777_v11 }
 0x2d0   : > { %v2246_v46 = vsub.f32 %v2230_v45, %v2238_v28  ;;  %v1865_v58 = vsub.f32 1.0, %v1857_v37  ;;  %v2073_v39 = vmul.f32 %v5169_v15, %v1777_v11  ;;  %v2081_v10 = vmul.f32 %v5184_v56, %v1809_v31 }
 0x2d1   : > { %v2390_v0 = vsub.f32 %v2374_v26, %v2382_v54  ;;  %v2454_v30 = vmul.f32 %v5063_v3, %v2094_v48  ;;  %v2462_v47 = vmul.f32 %v5091_v1, %v2126_v7  ;;  %v1897_v19 = vsub.f32 1.0, %v1889_v44 }
 0x2d2   : > { %v2534_v61 = vmul.f32 %v5072_v2, %v2126_v7  ;;  %v2542_v17 = vmul.f32 %v5099_v41, %v2158_v23  ;;  %v2025_v50 = vsub.f32 %v2009_v18, %v2017_v32  ;;  %v2057_v4 = vsub.f32 %v2041_v60, %v2049_v22  ;;  %v5217_v60 = vpop.permute.xlu0 %2726 }
 0x2d3   : > { %v2222_v57 = vmul.f32 0.5, %v2214_v34  ;;  %v2326_v36 = vmul.f32 0.33333334, %v2318_v52  ;;  %v2105_v37 = vmul.f32 %v5173_v63, %v1809_v31  ;;  %v2113_v45 = vmul.f32 %v5191_v49, %v1841_v21  ;;  %6141 = vst [vmem:[#allocation77_spill] sm:$0xff] %v5217_v60  ;;  %v6188_v60 = vld [vmem:[#allocation23_spill] sm:$0xff] }
 0x2d4   : > { %v2614_v28 = vmul.f32 %v5075_v16, %v2158_v23  ;;  %v2622_v26 = vmul.f32 %v5105_v42, %v2190_v55  ;;  %v1873_v3 = vmax.f32 %v1865_v58, 0.0  ;;  %v2089_v48 = vsub.f32 %v2073_v39, %v2081_v10 }
 0x2d5   : > { %v2688_v44 = vadd.f32 %v5147_v43, %v5156_v53  ;;  %v5215_v2 = vmul.f32 0.5, %v2246_v46  ;;  %v2398_v7 = vmul.f32 0.33333334, %v2390_v0  ;;  %v1905_v18 = vmax.f32 %v1897_v19, 0.0 }
 0x2d6   : > { %v2470_v52 = vsub.f32 %v2454_v30, %v2462_v47  ;;  %v2550_v32 = vsub.f32 %v2534_v61, %v2542_v17  ;;  %v2033_v34 = vmul.f32 0.5, %v2025_v50  ;;  %v2065_v54 = vmul.f32 0.5, %v2057_v4 }
 0x2d7   : > { %v2366_v11 = vmul.f32 %v4738_v25, %v2326_v36  ;;  %v2694_v16 = vmul.f32 %v5080_v20, %v2190_v55  ;;  %v2702_v23 = vmul.f32 %v5118_v38, %v2222_v57  ;;  %v2121_v31 = vsub.f32 %v2105_v37, %v2113_v45  ;;  %v6142_v37 = vld [vmem:[#allocation22_spill] sm:$0xff] }
 0x2d8   : > { %v2630_v22 = vsub.f32 %v2614_v28, %v2622_v26  ;;  %v2097_v58 = vmul.f32 0.5, %v2089_v48  ;;  %v2137_v43 = vmul.f32 %v5180_v6, %v1841_v21  ;;  %v2145_v0 = vmul.f32 %v4883_v13, %v1873_v3 }
 0x2d9   : > { %v2438_v19 = vmul.f32 %v4785_v27, %v2398_v7  ;;  %v2169_v53 = vmul.f32 %v5184_v56, %v1873_v3  ;;  %v2177_v61 = vmul.f32 %v4838_v33, %v1905_v18  ;;  %v2201_v46 = vmul.f32 %v5191_v49, %v1905_v18  ;;  %v6143_v3 = vld [vmem:[#allocation14_spill] sm:$0xff] }
 0x2da   : > { %v2478_v25 = vmul.f32 0.33333334, %v2470_v52  ;;  %v5229_v20 = vmul.f32 %v5091_v1, %v2222_v57  ;;  %v2305_v38 = vmul.f32 %v2033_v34, %v4833_v51  ;;  %v2313_v55 = vmul.f32 %v5180_v6, %v2065_v54  ;;  %v5253_v18 = vpop.permute.xlu0 %2746 }
 0x2db   : > { %v2558_v39 = vmul.f32 0.33333334, %v2550_v32  ;;  %v2710_v21 = vsub.f32 %v2694_v16, %v2702_v23  ;;  %v5235_v10 = vmul.f32 %v5160_v29, %v5215_v2  ;;  %v2129_v27 = vmul.f32 0.5, %v2121_v31  ;;  %v6145_v31 = vld [vmem:[#allocation36_spill] sm:$0xff] }
 0x2dc   : > { %v2638_v30 = vmul.f32 0.33333334, %v2630_v22  ;;  %v2153_v47 = vsub.f32 %v2137_v43, %v2145_v0  ;;  %v2377_v17 = vmul.f32 %v5163_v40, %v2065_v54  ;;  %v2385_v50 = vmul.f32 %v5184_v56, %v2097_v58 }
 0x2dd   : > { %v2446_v4 = vadd.f32 %v2438_v19, %v2366_v11  ;;  %v1651_v1 = vmul.f32 0.5, %v5006_v9  ;;  %v2185_v57 = vsub.f32 %v2169_v53, %v2177_v61  ;;  %v2217_v51 = vsub.f32 %v2201_v46, %v4931_v35  ;;  %v6144_v35 = vld [vmem:[#allocation25_spill] sm:$0xff] }
 0x2de   : > { %v5242_v36 = vadd.f32 %v5150_v62, %v2688_v44  ;;  %v2518_v45 = vmul.f32 %v6142_v37, %v2478_v25  ;;  %v2321_v28 = vsub.f32 %v2305_v38, %v2313_v55  ;;  %v1984_v26 = vand.u32 2147483647, %v5037_v14 }
 0x2df   : > { %v5247_v48 = vmul.f32 %v6143_v3, %v2558_v39  ;;  %v5249_v40 = vmul.f32 0.33333334, %v2710_v21  ;;  %v2457_v7 = vmul.f32 %v5169_v15, %v2097_v58  ;;  %v2465_v9 = vmul.f32 %v5191_v49, %v2129_v27 }
 0x2e0   : > { %v5256_v52 = vmul.f32 %v6144_v35, %v2638_v30  ;;  %v2790_v62 = vsub.f32 %v5229_v20, %v5235_v10  ;;  %v2161_v44 = vmul.f32 0.5, %v2153_v47  ;;  %v2393_v32 = vsub.f32 %v2377_v17, %v2385_v50  ;;  %v2811_v10 = vpop.permute.xlu2 %2810 }
 0x2e1   : > { %v5260_v14 = vadd.f32 %v2518_v45, %v2446_v4  ;;  %v5262_v34 = vadd.f32 0.5, %v1651_v1  ;;  %v2193_v54 = vmul.f32 0.5, %v2185_v57  ;;  %v5264_v11 = vmul.f32 0.5, %v2217_v51  ;;  %v6147_v45 = vld [vmem:[#allocation12_spill] sm:$0xff] }
 0x2e2   : > { %v2329_v15 = vmul.f32 0.33333334, %v2321_v28  ;;  %v2537_v16 = vmul.f32 %v5173_v63, %v2129_v27  ;;  %v1992_v23 = vsub.f32 1.0, %v1984_v26  ;;  %v5268_v22 = vadd.f32 -1.0, %v6145_v31  ;;  %v6148_v26 = vld [vmem:[#allocation24_spill] sm:$0xff] }
 0x2e3   : > { %v2473_v58 = vsub.f32 %v2457_v7, %v2465_v9  ;;  %v5271_v43 = vadd.f32 -2.0, %v6145_v31  ;;  %v5274_v0 = vadd.f32 -3.0, %v6145_v31  ;;  %v5277_v19 = vadd.f32 -4.0, %v6145_v31 }
 0x2e4   : > { %v2401_v53 = vmul.f32 0.33333334, %v2393_v32  ;;  %v2545_v61 = vmul.f32 %v4883_v13, %v2161_v44  ;;  %v1698_v46 = vand.u32 2147483647, %v5268_v22  ;;  %v5282_v63 = vadd.f32 -5.0, %v6145_v31 }
 0x2e5   : > { %v2617_v25 = vmul.f32 %v5180_v6, %v2161_v44  ;;  %v1730_v38 = vand.u32 2147483647, %v5271_v43  ;;  %v1762_v55 = vand.u32 2147483647, %v5274_v0  ;;  %v1794_v39 = vand.u32 2147483647, %v5277_v19 }
 0x2e6   : > { %v2625_v21 = vmul.f32 %v4838_v33, %v2193_v54  ;;  %v2697_v27 = vmul.f32 %v5184_v56, %v2193_v54  ;;  %v1706_v30 = vsub.f32 1.0, %v1698_v46  ;;  %v1826_v13 = vand.u32 2147483647, %v5282_v63  ;;  %v6146_v6 = vld [vmem:[#allocation30_spill] sm:$0xff]  ;;  %v5295_v56 = vpop.permute.xlu0 %3002  ;;  %v6149_v54 = vld [vmem:[#allocation8_spill] sm:$0xff] }
 0x2e7   : > { %v2481_v47 = vmul.f32 0.33333334, %v2473_v58  ;;  %v1738_v17 = vsub.f32 1.0, %v1730_v38  ;;  %v1770_v50 = vsub.f32 1.0, %v1762_v55  ;;  %v1802_v4 = vsub.f32 1.0, %v1794_v39 }
 0x2e8   : > { %v2553_v1 = vsub.f32 %v2537_v16, %v2545_v61  ;;  %v2705_v57 = vmul.f32 %v6146_v6, %v5264_v11  ;;  %v1714_v51 = vmax.f32 %v1706_v30, 0.0  ;;  %v1834_v37 = vsub.f32 1.0, %v1826_v13 }
 0x2e9   : > { %v2369_v28 = vmul.f32 %v6147_v45, %v2329_v15  ;;  %v2441_v3 = vmul.f32 %v6148_v26, %v2401_v53  ;;  %v1746_v33 = vmax.f32 %v1738_v17, 0.0  ;;  %v1778_v7 = vmax.f32 %v1770_v50, 0.0 }
 0x2ea   : > { %v2633_v9 = vsub.f32 %v2617_v25, %v2625_v21  ;;  %v2000_v35 = vmax.f32 %v1992_v23, 0.0  ;;  %v1810_v44 = vmax.f32 %v1802_v4, 0.0  ;;  %v5298_v32 = vadd.f32 -6.0, %v6145_v31 }
 0x2eb   : > { %v2521_v16 = vmul.f32 %v6149_v54, %v2481_v47  ;;  %v1890_v58 = vand.u32 2147483647, %v4934_v59  ;;  %v2010_v61 = vmul.f32 %v1714_v51, %v6145_v31  ;;  %v2018_v15 = vmul.f32 %v5274_v0, %v1746_v33 }
 0x2ec   : > { %v2561_v46 = vmul.f32 0.33333334, %v2553_v1  ;;  %v1842_v53 = vmax.f32 %v1834_v37, 0.0  ;;  %v1858_v38 = vand.u32 2147483647, %v5298_v32  ;;  %v2042_v55 = vmul.f32 %v5268_v22, %v1746_v33 }
 0x2ed   : > { %v2449_v25 = vadd.f32 %v2441_v3, %v2369_v28  ;;  %v3319_v23 = vadd.f32 -11.0, %v4896_v24  ;;  %v1982_v39 = vand.u32 2147483647, %v5160_v29  ;;  %v2050_v21 = vmul.f32 %v5277_v19, %v1778_v7 }
 0x2ee   : > { %v1866_v30 = vsub.f32 1.0, %v1858_v38  ;;  %v1898_v13 = vsub.f32 1.0, %v1890_v58  ;;  %v2074_v47 = vmul.f32 %v5271_v43, %v1778_v7  ;;  %v2082_v17 = vmul.f32 %v5282_v63, %v1810_v44  ;;  %v6152_v58 = vld [vmem:[#allocation18_spill] sm:$0xff] }
 0x2ef   : > { %v6150_v50 = vmax.f32 %v5013_v8, 0.0  ;;  %v2280_v1 = vmul.f32 %v3319_v23, %v2000_v35  ;;  %v2026_v6 = vsub.f32 %v2010_v61, %v2018_v15  ;;  %v2058_v51 = vsub.f32 %v2042_v55, %v2050_v21  ;;  %v5323_v55 = vpop.permute.xlu0 %2834 }
 0x2f0   : > { %v1874_v37 = vmax.f32 %v1866_v30, 0.0  ;;  %v2090_v45 = vsub.f32 %v2074_v47, %v2082_v17  ;;  %v2106_v24 = vmul.f32 %v5274_v0, %v1810_v44  ;;  %v2114_v29 = vmul.f32 %v5298_v32, %v1842_v53  ;;  %v6155_v30 = vld [vmem:[#allocation40_spill] sm:$0xff] }
 0x2f1   : > { %v2264_v4 = vmul.f32 %v4981_v5, %v6150_v50  ;;  %v2529_v28 = vadd.f32 %v2521_v16, %v2449_v25  ;;  %v2713_v26 = vsub.f32 %v2697_v27, %v2705_v57  ;;  %v2777_v3 = vmul.f32 %v5191_v49, %v5264_v11  ;;  %v6151_v5 = vld [vmem:[#allocation38_spill] sm:$0xff] }
 0x2f2   : > { %v1990_v33 = vsub.f32 1.0, %v1982_v39  ;;  %v2606_v8 = vadd.f32 %v5247_v48, %v5260_v14  ;;  %v2758_v7 = vmul.f32 %v6151_v5, %v5249_v40  ;;  %v2641_v35 = vmul.f32 0.33333334, %v2633_v9  ;;  %v6153_v14 = vld [vmem:[#allocation52_spill] sm:$0xff]  ;;  %v6154_v9 = vld [vmem:[#allocation10_spill] sm:$0xff] }
 0x2f3   : > { %v1906_v54 = vmax.f32 %v1898_v13, 0.0  ;;  %v2601_v61 = vmul.f32 %v6152_v58, %v2561_v46  ;;  %v2034_v15 = vmul.f32 0.5, %v2026_v6  ;;  %v2066_v44 = vmul.f32 0.5, %v2058_v51 }
 0x2f4   : > { %v2098_v38 = vmul.f32 0.5, %v2090_v45  ;;  %v2288_v27 = vsub.f32 %v2264_v4, %v2280_v1  ;;  %v2122_v57 = vsub.f32 %v2106_v24, %v2114_v29  ;;  %v2138_v49 = vmul.f32 %v5277_v19, %v1842_v53  ;;  %v6156_v45 = vld [vmem:[#allocation73_spill] sm:$0xff] }
 0x2f5   : > { %v2146_v11 = vmul.f32 %v4934_v59, %v1874_v37  ;;  %v2609_v16 = vadd.f32 %v2601_v61, %v2529_v28  ;;  %v2721_v48 = vmul.f32 0.33333334, %v2713_v26  ;;  %v2793_v25 = vsub.f32 %v2777_v3, %v6153_v14  ;;  %v6158_v28 = vld [vmem:[#allocation46_spill] sm:$0xff]  ;;  %v6159_v3 = vld [vmem:[#allocation68_spill] sm:$0xff] }
 0x2f6   : > { %v1998_v40 = vmax.f32 %v1990_v33, 0.0  ;;  %v2681_v39 = vmul.f32 %v6154_v9, %v2641_v35  ;;  %v3317_v46 = vadd.f32 -11.0, %v4915_v12  ;;  %v2170_v21 = vmul.f32 %v5282_v63, %v1874_v37  ;;  %v6160_v33 = vld [vmem:[#allocation51_spill] sm:$0xff] }
 0x2f7   : > { %v2178_v13 = vmul.f32 %v6155_v30, %v1906_v54  ;;  %v2306_v47 = vmul.f32 %v2034_v15, %v6145_v31  ;;  %v2314_v17 = vmul.f32 %v5277_v19, %v2066_v44  ;;  %v2378_v53 = vmul.f32 %v5268_v22, %v2066_v44  ;;  %v6161_v35 = vld [vmem:[#allocation19_spill] sm:$0xff]  ;;  %v2823_v14 = vpop.permute.xlu0 %2822 }
 0x2f8   : > { %v2386_v50 = vmul.f32 %v5282_v63, %v2098_v38  ;;  %v2798_v4 = vmul.f32 0.33333334, %v2790_v62  ;;  %v2296_v1 = vmul.f32 0.5, %v2288_v27  ;;  %v2130_v6 = vmul.f32 0.5, %v2122_v57  ;;  %v2959_v62 = vpop.permute.xlu1 %2958  ;;  %v6163_v57 = vld [vmem:[#allocation70_spill] sm:$0xff] }
 0x2f9   : > { %v2154_v51 = vsub.f32 %v2138_v49, %v2146_v11  ;;  %v2686_v12 = vadd.f32 %v5256_v52, %v2606_v8  ;;  %v2689_v37 = vadd.f32 %v2681_v39, %v2609_v16  ;;  %v6157_v24 = vmax.f32 %v6156_v45, 0.0 }
 0x2fa   : > { %v2278_v29 = vmul.f32 %v3317_v46, %v1998_v40  ;;  %v1667_v22 = vmul.f32 %v5262_v34, %v6158_v28  ;;  %v2801_v26 = vmul.f32 0.33333334, %v2793_v25  ;;  %v2856_v5 = vmul.f32 %v6160_v33, %v6159_v3  ;;  %v6162_v34 = vld [vmem:[#allocation72_spill] sm:$0xff]  ;;  %v6165_v25 = vld [vmem:[#allocation75_spill] sm:$0xff] }
 0x2fb   : > { %v2262_v31 = vmul.f32 %v5105_v42, %v6157_v24  ;;  %v2202_v20 = vmul.f32 %v5298_v32, %v1906_v54  ;;  %v2761_v58 = vmul.f32 %v6161_v35, %v2721_v48  ;;  %v2186_v52 = vsub.f32 %v2170_v21, %v2178_v13  ;;  %v6174_v24 = vld [vmem:[#allocation45_spill] sm:$0xff] }
 0x2fc   : > { %v2322_v8 = vsub.f32 %v2306_v47, %v2314_v17  ;;  %v2394_v61 = vsub.f32 %v2378_v53, %v2386_v50  ;;  %v2864_v15 = vmul.f32 %v3319_v23, %v2296_v1  ;;  %v2162_v44 = vmul.f32 0.5, %v2154_v51  ;;  %v6168_v23 = vld [vmem:[#allocation56_spill] sm:$0xff] }
 0x2fd   : > { %v2458_v42 = vmul.f32 %v5271_v43, %v2098_v38  ;;  %v2466_v27 = vmul.f32 %v5298_v32, %v2130_v6  ;;  %v5353_v49 = vmul.f32 %v6163_v57, %v6162_v34  ;;  %v2766_v11 = vadd.f32 %v2758_v7, %v2686_v12  ;;  %v6172_v12 = vld [vmem:[#allocation48_spill] sm:$0xff] }
 0x2fe   : > { %v2769_v16 = vadd.f32 %v2761_v58, %v2689_v37  ;;  %v2286_v54 = vsub.f32 %v2262_v31, %v2278_v29  ;;  %v5357_v48 = vadd.f32 %v6165_v25, %v5242_v36  ;;  %v2838_v40 = vmul.f32 %v2811_v10, %v2798_v4 }
 0x2ff   : > { %6164 = vst [vmem:[#allocation22_spill] sm:$0xff] %v5353_v49  ;;  %v5359_v9 = vmul.f32 %v2959_v62, %v1667_v22  ;;  %v2218_v39 = vsub.f32 %v2202_v20, %v6168_v23  ;;  %v2841_v43 = vmul.f32 %v2823_v14, %v2801_v26  ;;  %v2194_v38 = vmul.f32 0.5, %v2186_v52  ;;  %v6176_v26 = vld [vmem:[#allocation42_spill] sm:$0xff] }
 0x300   : > { %6166 = vst [vmem:[#allocation14_spill] sm:$0xff] %v5357_v48  ;;  %v2330_v21 = vmul.f32 0.33333334, %v2322_v8  ;;  %v2402_v13 = vmul.f32 0.33333334, %v2394_v61  ;;  %v2872_v47 = vsub.f32 %v2856_v5, %v2864_v15  ;;  %v2474_v17 = vsub.f32 %v2458_v42, %v2466_v27  ;;  %v6179_v15 = vld [vmem:[#allocation60_spill] sm:$0xff] }
 0x301   : > { %6167 = vst [vmem:[#allocation25_spill] sm:$0xff] %v5359_v9  ;;  %v2538_v7 = vmul.f32 %v5274_v0, %v2130_v6  ;;  %v2546_v53 = vmul.f32 %v4934_v59, %v2162_v44  ;;  %v5364_v50 = vadd.f32 %v2838_v40, %v2766_v11  ;;  %v5366_v1 = vadd.f32 %v2841_v43, %v2769_v16  ;;  %v6173_v59 = vld [vmem:[#allocation32_spill] sm:$0xff] }
 0x302   : > { %v2294_v36 = vmul.f32 0.5, %v2286_v54  ;;  %v5370_v4 = vmul.f32 %v5099_v41, %v5215_v2  ;;  %v2226_v51 = vmul.f32 0.5, %v2218_v39  ;;  %v5373_v37 = vadd.f32 -1.0, %v6172_v12 }
 0x303   : > { %6169 = vst [vmem:[#allocation36_spill] sm:$0xff] %v5364_v50  ;;  %v5376_v45 = vadd.f32 -2.0, %v6172_v12  ;;  %v5379_v0 = vadd.f32 -3.0, %v6172_v12  ;;  %v2370_v6 = vmul.f32 %v6173_v59, %v2330_v21  ;;  %v2442_v31 = vmul.f32 %v6174_v24, %v2402_v13  ;;  %v6180_v21 = vld [vmem:[#allocation62_spill] sm:$0xff]  ;;  %v6181_v59 = vld [vmem:[#allocation69_spill] sm:$0xff] }
 0x304   : > { %6170 = vst [vmem:[#allocation30_spill] sm:$0xff] %v5366_v1  ;;  %v2618_v29 = vmul.f32 %v5277_v19, %v2162_v44  ;;  %v2626_v28 = vmul.f32 %v6155_v30, %v2194_v38  ;;  %v5385_v41 = vmul.f32 0.33333334, %v2872_v47  ;;  %v2482_v2 = vmul.f32 0.33333334, %v2474_v17  ;;  %v6178_v19 = vld [vmem:[#allocation41_spill] sm:$0xff] }
 0x305   : > { %6171 = vst [vmem:[#allocation12_spill] sm:$0xff] %v5370_v4  ;;  %v2554_v22 = vsub.f32 %v2538_v7, %v2546_v53  ;;  %v5388_v3 = vadd.f32 -8.0, %v6176_v26  ;;  %v5390_v33 = vmul.f32 %v3317_v46, %v2294_v36  ;;  %v5393_v5 = vadd.f32 -7.0, %v6176_v26 }
 0x306   : > { %6175 = vst [vmem:[#allocation24_spill] sm:$0xff] %v5385_v41  ;;  %v5396_v20 = vadd.f32 -9.0, %v6176_v26  ;;  %v5399_v10 = vadd.f32 -4.0, %v6172_v12  ;;  %v2706_v30 = vmul.f32 %v6178_v19, %v2226_v51  ;;  %v1695_v62 = vand.u32 2147483647, %v5373_v37 }
 0x307   : > { %6177 = vst [vmem:[#allocation8_spill] sm:$0xff] %v5390_v33  ;;  %v1727_v35 = vand.u32 2147483647, %v5376_v45  ;;  %v1759_v58 = vand.u32 2147483647, %v5379_v0  ;;  %v2450_v52 = vadd.f32 %v2442_v31, %v2370_v6  ;;  %v2634_v46 = vsub.f32 %v2618_v29, %v2626_v28  ;;  %v6182_v28 = vld [vmem:[#allocation76_spill] sm:$0xff] }
 0x308   : > { %v2698_v8 = vmul.f32 %v5282_v63, %v2194_v38  ;;  %v5407_v61 = vmul.f32 %v5298_v32, %v2226_v51  ;;  %v2522_v44 = vmul.f32 %v6179_v15, %v2482_v2  ;;  %v2562_v42 = vmul.f32 0.33333334, %v2554_v22 }
 0x309   : > { %v1917_v27 = vand.u32 2147483647, %v5388_v3  ;;  %v5412_v34 = vadd.f32 -5.0, %v6172_v12  ;;  %v1949_v57 = vand.u32 2147483647, %v5396_v20  ;;  %v5417_v16 = vadd.f32 -6.0, %v6172_v12 }
 0x30a   : > { %v1791_v11 = vand.u32 2147483647, %v5399_v10  ;;  %v5420_v63 = vadd.f32 -7.0, %v6172_v12  ;;  %v1703_v32 = vsub.f32 1.0, %v1695_v62  ;;  %v1735_v54 = vsub.f32 1.0, %v1727_v35 }
 0x30b   : > { %v1767_v14 = vsub.f32 1.0, %v1759_v58  ;;  %v1823_v25 = vand.u32 2147483647, %v5412_v34  ;;  %v2642_v40 = vmul.f32 0.33333334, %v2634_v46  ;;  %v2714_v23 = vsub.f32 %v2698_v8, %v2706_v30 }
 0x30c   : > { %v5424_v39 = vadd.f32 -10.0, %v6176_v26  ;;  %v1855_v43 = vand.u32 2147483647, %v5417_v16  ;;  %v2530_v38 = vadd.f32 %v2522_v44, %v2450_v52  ;;  %v2794_v13 = vsub.f32 %v5407_v61, %v6180_v21 }
 0x30d   : > { %v5429_v47 = vsub.f32 1.0, %v1917_v27  ;;  %v5432_v17 = vadd.f32 -8.0, %v6172_v12  ;;  %v1957_v7 = vsub.f32 1.0, %v1949_v57  ;;  %v1799_v53 = vsub.f32 1.0, %v1791_v11 }
 0x30e   : > { %v1831_v36 = vsub.f32 1.0, %v1823_v25  ;;  %v1887_v51 = vand.u32 2147483647, %v5420_v63  ;;  %v2602_v6 = vmul.f32 %v6181_v59, %v2562_v42  ;;  %v1711_v24 = vmax.f32 %v1703_v32, 0.0 }
 0x30f   : > { %v1743_v31 = vmax.f32 %v1735_v54, 0.0  ;;  %v1775_v29 = vmax.f32 %v1767_v14, 0.0  ;;  %v2682_v2 = vmul.f32 %v6182_v28, %v2642_v40  ;;  %v2722_v22 = vmul.f32 0.33333334, %v2714_v23 }
 0x310   : > { %v1981_v19 = vand.u32 2147483647, %v5424_v39  ;;  %v1863_v30 = vsub.f32 1.0, %v1855_v43  ;;  %v2610_v62 = vadd.f32 %v2602_v6, %v2530_v38  ;;  %v5996_v35 = vmax.f32 %v5429_v47, 0.0 }
 0x311   : > { %v1919_v58 = vand.u32 2147483647, %v5432_v17  ;;  %v5441_v52 = vadd.f32 -9.0, %v6172_v12  ;;  %v1965_v46 = vmax.f32 %v1957_v7, 0.0  ;;  %v1807_v8 = vmax.f32 %v1799_v53, 0.0 }
 0x312   : > { %v1839_v61 = vmax.f32 %v1831_v36, 0.0  ;;  %v1895_v15 = vsub.f32 1.0, %v1887_v51  ;;  %v2007_v44 = vmul.f32 %v1711_v24, %v6172_v12  ;;  %v2015_v42 = vmul.f32 %v5379_v0, %v1743_v31 }
 0x313   : > { %v2039_v27 = vmul.f32 %v5373_v37, %v1743_v31  ;;  %v2047_v57 = vmul.f32 %v5399_v10, %v1775_v29  ;;  %v2762_v11 = vmul.f32 %v5253_v18, %v2722_v22  ;;  %v1989_v32 = vsub.f32 1.0, %v1981_v19 }
 0x314   : > { %v1871_v54 = vmax.f32 %v1863_v30, 0.0  ;;  %v5449_v14 = vadd.f32 -10.0, %v6172_v12  ;;  %v2690_v25 = vadd.f32 %v2682_v2, %v2610_v62  ;;  %v2229_v40 = vmul.f32 %v5393_v5, %v5996_v35  ;;  %v6187_v35 = vld [vmem:[#allocation11_spill] sm:$0xff] }
 0x315   : > { %v1927_v23 = vsub.f32 1.0, %v1919_v58  ;;  %v1951_v43 = vand.u32 2147483647, %v5441_v52  ;;  %v2071_v38 = vmul.f32 %v5376_v45, %v1775_v29  ;;  %v2079_v21 = vmul.f32 %v5412_v34, %v1807_v8 }
 0x316   : > { %v2103_v7 = vmul.f32 %v5379_v0, %v1807_v8  ;;  %v2111_v18 = vmul.f32 %v5417_v16, %v1839_v61  ;;  %v2237_v53 = vmul.f32 %v5424_v39, %v1965_v46  ;;  %v1903_v36 = vmax.f32 %v1895_v15, 0.0 }
 0x317   : > { %v2023_v51 = vsub.f32 %v2007_v44, %v2015_v42  ;;  %v2055_v59 = vsub.f32 %v2039_v27, %v2047_v57  ;;  %v1997_v6 = vmax.f32 %v1989_v32, 0.0  ;;  %v1983_v24 = vand.u32 2147483647, %v5449_v14 }
 0x318   : > { %v2135_v31 = vmul.f32 %v5399_v10, %v1839_v61  ;;  %v2143_v28 = vmul.f32 %v5420_v63, %v1871_v54  ;;  %v2802_v2 = vmul.f32 0.33333334, %v2794_v13  ;;  %v5464_v29 = vadd.f32 -11.0, %v6176_v26 }
 0x319   : > { %v1935_v22 = vmax.f32 %v1927_v23, 0.0  ;;  %v1959_v19 = vsub.f32 1.0, %v1951_v43  ;;  %v2770_v30 = vadd.f32 %v2762_v11, %v2690_v25  ;;  %v5467_v62 = vmul.f32 %v5388_v3, %v1965_v46  ;;  %v6183_v23 = vld [vmem:[#allocation66_spill] sm:$0xff] }
 0x31a   : > { %v2087_v58 = vsub.f32 %v2071_v38, %v2079_v21  ;;  %v2119_v8 = vsub.f32 %v2103_v7, %v2111_v18  ;;  %v2031_v15 = vmul.f32 0.5, %v2023_v51  ;;  %v2063_v44 = vmul.f32 0.5, %v2055_v59  ;;  %v6184_v21 = vld [vmem:[#allocation47_spill] sm:$0xff] }
 0x31b   : > { %v2167_v42 = vmul.f32 %v5412_v34, %v1871_v54  ;;  %v2175_v61 = vmul.f32 %v5432_v17, %v1903_v36  ;;  %v2245_v27 = vsub.f32 %v2229_v40, %v2237_v53  ;;  %v5472_v13 = vmul.f32 %v5464_v29, %v1997_v6 }
 0x31c   : > { %v1991_v57 = vsub.f32 1.0, %v1983_v24  ;;  %v2151_v32 = vsub.f32 %v2135_v31, %v2143_v28  ;;  %v2842_v43 = vmul.f32 %v6183_v23, %v2802_v2  ;;  %v1967_v11 = vmax.f32 %v1959_v19, 0.0 }
 0x31d   : > { %v2199_v46 = vmul.f32 %v5417_v16, %v1903_v36  ;;  %v2207_v25 = vmul.f32 %v5441_v52, %v1935_v22  ;;  %v5480_v54 = vmul.f32 0.5, %v6184_v21  ;;  %v2095_v7 = vmul.f32 0.5, %v2087_v58 }
 0x31e   : > { %v2127_v40 = vmul.f32 0.5, %v2119_v8  ;;  %v5482_v18 = vadd.f32 %v2842_v43, %v2770_v30  ;;  %v2183_v53 = vsub.f32 %v2167_v42, %v2175_v61  ;;  %v2303_v51 = vmul.f32 %v2031_v15, %v6172_v12 }
 0x31f   : > { %6185 = vst [vmem:[#allocation38_spill] sm:$0xff] %v5480_v54  ;;  %v2311_v59 = vmul.f32 %v5399_v10, %v2063_v44  ;;  %v5486_v6 = vmul.f32 0.5, %v2245_v27  ;;  %v1999_v24 = vmax.f32 %v1991_v57, 0.0  ;;  %v2159_v31 = vmul.f32 0.5, %v2151_v32 }
 0x320   : > { %6186 = vst [vmem:[#allocation18_spill] sm:$0xff] %v5482_v18  ;;  %v2215_v28 = vsub.f32 %v2199_v46, %v2207_v25  ;;  %v5491_v2 = vmul.f32 %v5420_v63, %v1935_v22  ;;  %v5494_v19 = vmul.f32 %v5449_v14, %v1967_v11  ;;  %v5497_v30 = vmul.f32 %v5432_v17, %v1967_v11 }
 0x321   : > { %v2375_v58 = vmul.f32 %v5373_v37, %v2063_v44  ;;  %v2383_v8 = vmul.f32 %v5412_v34, %v2095_v7  ;;  %v5502_v15 = vmul.f32 %v5376_v45, %v2095_v7  ;;  %v5505_v42 = vmul.f32 %v5417_v16, %v2127_v40 }
 0x322   : > { %v5507_v61 = vmul.f32 0.5, %v2183_v53  ;;  %v5510_v22 = vadd.f32 -11.0, %v6172_v12  ;;  %v2319_v27 = vsub.f32 %v2303_v51, %v2311_v59  ;;  %v5513_v57 = vadd.f32 -1.0, %v6176_v26 }
 0x323   : > { %v5516_v32 = vmul.f32 %v5379_v0, %v2127_v40  ;;  %v5519_v37 = vmul.f32 %v5420_v63, %v2159_v31  ;;  %v5522_v45 = vadd.f32 -2.0, %v6176_v26  ;;  %v5525_v44 = vadd.f32 -3.0, %v6176_v26 }
 0x324   : > { %v5527_v23 = vmul.f32 0.5, %v2215_v28  ;;  %v5532_v43 = vmul.f32 %v5510_v22, %v1999_v24  ;;  %v1693_v0 = vand.u32 2147483647, %v5513_v57  ;;  %v2391_v11 = vsub.f32 %v2375_v58, %v2383_v8 }
 0x325   : > { %v2471_v46 = vsub.f32 %v5502_v15, %v5505_v42  ;;  %v1725_v25 = vand.u32 2147483647, %v5522_v45  ;;  %v1757_v21 = vand.u32 2147483647, %v5525_v44  ;;  %v2327_v7 = vmul.f32 0.33333334, %v2319_v27 }
 0x326   : > { %v5540_v40 = vmul.f32 %v5399_v10, %v2159_v31  ;;  %v1701_v53 = vsub.f32 1.0, %v1693_v0  ;;  %v5543_v51 = vadd.f32 -4.0, %v6176_v26  ;;  %v2551_v59 = vsub.f32 %v5516_v32, %v5519_v37 }
 0x327   : > { %v1733_v24 = vsub.f32 1.0, %v1725_v25  ;;  %v1765_v28 = vsub.f32 1.0, %v1757_v21  ;;  %v5548_v58 = vadd.f32 -5.0, %v6176_v26  ;;  %v5552_v8 = vmul.f32 %v5432_v17, %v5507_v61 }
 0x328   : > { %v1709_v15 = vmax.f32 %v1701_v53, 0.0  ;;  %v1789_v10 = vand.u32 2147483647, %v5543_v51  ;;  %v5556_v31 = vadd.f32 -6.0, %v6176_v26  ;;  %v1885_v32 = vand.u32 2147483647, %v5393_v5 }
 0x329   : > { %v1741_v42 = vmax.f32 %v1733_v24, 0.0  ;;  %v1773_v27 = vmax.f32 %v1765_v28, 0.0  ;;  %v1821_v0 = vand.u32 2147483647, %v5548_v58  ;;  %v2399_v37 = vmul.f32 0.33333334, %v2391_v11 }
 0x32a   : > { %v1797_v25 = vsub.f32 1.0, %v1789_v10  ;;  %v1853_v21 = vand.u32 2147483647, %v5556_v31  ;;  %v2005_v38 = vmul.f32 %v1709_v15, %v6176_v26  ;;  %v1893_v12 = vsub.f32 1.0, %v1885_v32 }
 0x32b   : > { %v1829_v17 = vsub.f32 1.0, %v1821_v0  ;;  %v2013_v53 = vmul.f32 %v5525_v44, %v1741_v42  ;;  %v2037_v36 = vmul.f32 %v5513_v57, %v1741_v42  ;;  %v2367_v50 = vmul.f32 %v6187_v35, %v2327_v7 }
 0x32c   : > { %v1805_v24 = vmax.f32 %v1797_v25, 0.0  ;;  %v1861_v28 = vsub.f32 1.0, %v1853_v21  ;;  %v2045_v9 = vmul.f32 %v5543_v51, %v1773_v27  ;;  %v1901_v1 = vmax.f32 %v1893_v12, 0.0 }
 0x32d   : > { %v1837_v48 = vmax.f32 %v1829_v17, 0.0  ;;  %v2021_v11 = vsub.f32 %v2005_v38, %v2013_v53  ;;  %v2069_v10 = vmul.f32 %v5522_v45, %v1773_v27  ;;  %v2439_v49 = vmul.f32 %v6188_v60, %v2399_v37 }
 0x32e   : > { %v1869_v15 = vmax.f32 %v1861_v28, 0.0  ;;  %v2053_v0 = vsub.f32 %v2037_v36, %v2045_v9  ;;  %v2077_v32 = vmul.f32 %v5548_v58, %v1805_v24  ;;  %v2101_v42 = vmul.f32 %v5525_v44, %v1805_v24 }
 0x32f   : > { %v2029_v18 = vmul.f32 0.5, %v2021_v11  ;;  %v2109_v35 = vmul.f32 %v5556_v31, %v1837_v48  ;;  %v2133_v7 = vmul.f32 %v5543_v51, %v1837_v48  ;;  %v6189_v38 = vmax.f32 %v5429_v47, 0.0 }
 0x330   : > { %v2061_v25 = vmul.f32 0.5, %v2053_v0  ;;  %v2085_v21 = vsub.f32 %v2069_v10, %v2077_v32  ;;  %v2141_v12 = vmul.f32 %v5393_v5, %v1869_v15  ;;  %v2165_v9 = vmul.f32 %v5548_v58, %v1869_v15 }
 0x331   : > { %v2205_v27 = vmul.f32 %v5396_v20, %v6189_v38  ;;  %v2117_v60 = vsub.f32 %v2101_v42, %v2109_v35  ;;  %v2173_v36 = vmul.f32 %v5388_v3, %v1901_v1  ;;  %v2197_v37 = vmul.f32 %v5556_v31, %v1901_v1 }
 0x332   : > { %v2479_v17 = vmul.f32 0.33333334, %v2471_v46  ;;  %v2093_v53 = vmul.f32 0.5, %v2085_v21  ;;  %v2301_v24 = vmul.f32 %v2029_v18, %v6176_v26  ;;  %v2309_v48 = vmul.f32 %v5543_v51, %v2061_v25 }
 0x333   : > { %v2287_v28 = vsub.f32 %v5497_v30, %v5532_v43  ;;  %v2695_v47 = vmul.f32 %v5412_v34, %v5507_v61  ;;  %v2703_v11 = vmul.f32 %v5441_v52, %v5527_v23  ;;  %v2149_v10 = vsub.f32 %v2133_v7, %v2141_v12  ;;  %v6192_v43 = vld [vmem:[#allocation4_spill] sm:$0xff] }
 0x334   : > { %v6190_v15 = vsub.f32 %v5467_v62, %v5472_v13  ;;  %v6191_v26 = vsub.f32 %v5491_v2, %v5494_v19  ;;  %v2447_v46 = vadd.f32 %v2439_v49, %v2367_v50  ;;  %v2125_v0 = vmul.f32 0.5, %v2117_v60 }
 0x335   : > { %v2559_v32 = vmul.f32 0.33333334, %v2551_v59  ;;  %v2631_v30 = vsub.f32 %v5540_v40, %v5552_v8  ;;  %v2181_v34 = vsub.f32 %v2165_v9, %v2173_v36  ;;  %v2213_v61 = vsub.f32 %v2197_v37, %v2205_v27  ;;  %v6193_v8 = vld [vmem:[#allocation13_spill] sm:$0xff]  ;;  %v6194_v27 = vld [vmem:[#allocation63_spill] sm:$0xff] }
 0x336   : > { %v5590_v1 = vmul.f32 0.5, %v6190_v15  ;;  %v2255_v18 = vmul.f32 0.5, %v6191_v26  ;;  %v2519_v52 = vmul.f32 %v6192_v43, %v2479_v17  ;;  %v2317_v42 = vsub.f32 %v2301_v24, %v2309_v48 }
 0x337   : > { %v2373_v35 = vmul.f32 %v5513_v57, %v2061_v25  ;;  %v2381_v62 = vmul.f32 %v5548_v58, %v2093_v53  ;;  %v2295_v13 = vmul.f32 0.5, %v2287_v28  ;;  %v2711_v7 = vsub.f32 %v2695_v47, %v2703_v11  ;;  %v6195_v28 = vld [vmem:[#allocation28_spill] sm:$0xff] }
 0x338   : > { %v5602_v2 = vmul.f32 %v5417_v16, %v5527_v23  ;;  %v2157_v49 = vmul.f32 0.5, %v2149_v10  ;;  %v2527_v50 = vadd.f32 %v2519_v52, %v2447_v46  ;;  %v5605_v19 = vmul.f32 %v5449_v14, %v2255_v18 }
 0x339   : > { %v2453_v40 = vmul.f32 %v5522_v45, %v2093_v53  ;;  %v2461_v59 = vmul.f32 %v5556_v31, %v2125_v0  ;;  %v2599_v21 = vmul.f32 %v6193_v8, %v2559_v32  ;;  %v5610_v57 = vmul.f32 0.33333334, %v2631_v30 }
 0x33a   : > { %v2189_v25 = vmul.f32 0.5, %v2181_v34  ;;  %v5612_v12 = vmul.f32 0.5, %v2213_v61  ;;  %v5615_v38 = vmul.f32 %v5420_v63, %v2255_v18  ;;  %v2325_v16 = vmul.f32 0.33333334, %v2317_v42  ;;  %v6196_v18 = vld [vmem:[#allocation67_spill] sm:$0xff] }
 0x33b   : > { %v2389_v23 = vsub.f32 %v2373_v35, %v2381_v62  ;;  %v5618_v60 = vadd.f32 -1.0, %v6194_v27  ;;  %v5620_v14 = vmul.f32 0.33333334, %v2711_v7  ;;  %v5623_v45 = vmul.f32 %v5510_v22, %v2295_v13 }
 0x33c   : > { %v5626_v9 = vmul.f32 %v5525_v44, %v2125_v0  ;;  %v5629_v36 = vmul.f32 %v5393_v5, %v2157_v49  ;;  %v5631_v37 = vadd.f32 %v2599_v21, %v2527_v50  ;;  %v2469_v63 = vsub.f32 %v2453_v40, %v2461_v59  ;;  %v6197_v40 = vld [vmem:[#allocation37_spill] sm:$0xff] }
 0x33d   : > { %v5634_v17 = vmul.f32 %v5543_v51, %v2157_v49  ;;  %v1700_v53 = vand.u32 2147483647, %v5618_v60  ;;  %v5638_v24 = vmul.f32 %v5388_v3, %v2189_v25  ;;  %v5641_v22 = vmul.f32 %v5548_v58, %v2189_v25 }
 0x33e   : > { %v5645_v44 = vmul.f32 %v5396_v20, %v5612_v12  ;;  %v5648_v48 = vadd.f32 -2.0, %v6194_v27  ;;  %v5651_v47 = vmul.f32 %v6195_v28, %v2325_v16  ;;  %v2397_v51 = vmul.f32 0.33333334, %v2389_v23 }
 0x33f   : > { %v1708_v11 = vsub.f32 1.0, %v1700_v53  ;;  %v5654_v10 = vadd.f32 -3.0, %v6194_v27  ;;  %v5660_v15 = vadd.f32 -4.0, %v6194_v27  ;;  %v5663_v20 = vadd.f32 -5.0, %v6194_v27 }
 0x340   : > { %v1732_v58 = vand.u32 2147483647, %v5648_v48  ;;  %v5665_v26 = vmul.f32 0.33333334, %v2469_v63  ;;  %v1652_v46 = vmul.f32 0.5, %v6196_v18  ;;  %v5670_v32 = vadd.f32 -6.0, %v6194_v27 }
 0x341   : > { %v1764_v0 = vand.u32 2147483647, %v5654_v10  ;;  %v1796_v34 = vand.u32 2147483647, %v5660_v15  ;;  %v1828_v61 = vand.u32 2147483647, %v5663_v20  ;;  %v5683_v59 = vmul.f32 %v6197_v40, %v2397_v51 }
 0x342   : > { %v1740_v30 = vsub.f32 1.0, %v1732_v58  ;;  %v5675_v43 = vadd.f32 -7.0, %v6194_v27  ;;  %v1716_v52 = vmax.f32 %v1708_v11, 0.0  ;;  %v1860_v35 = vand.u32 2147483647, %v5670_v32 }
 0x343   : > { %v1772_v42 = vsub.f32 1.0, %v1764_v0  ;;  %v5679_v62 = vadd.f32 -8.0, %v6194_v27  ;;  %v1804_v7 = vsub.f32 1.0, %v1796_v34  ;;  %v1836_v49 = vsub.f32 1.0, %v1828_v61 }
 0x344   : > { %v1748_v13 = vmax.f32 %v1740_v30, 0.0  ;;  %v1892_v50 = vand.u32 2147483647, %v5675_v43  ;;  %v1868_v21 = vsub.f32 1.0, %v1860_v35  ;;  %v5686_v16 = vadd.f32 0.5, %v1652_v46 }
 0x345   : > { %v1780_v8 = vmax.f32 %v1772_v42, 0.0  ;;  %v1924_v25 = vand.u32 2147483647, %v5679_v62  ;;  %v1812_v23 = vmax.f32 %v1804_v7, 0.0  ;;  %v5689_v53 = vadd.f32 -9.0, %v6194_v27 }
 0x346   : > { %v1900_v63 = vsub.f32 1.0, %v1892_v50  ;;  %v1844_v28 = vmax.f32 %v1836_v49, 0.0  ;;  %v1876_v11 = vmax.f32 %v1868_v21, 0.0  ;;  %v5692_v18 = vadd.f32 -10.0, %v6194_v27 }
 0x347   : > { %v1932_v58 = vsub.f32 1.0, %v1924_v25  ;;  %v1956_v51 = vand.u32 2147483647, %v5689_v53  ;;  %v2012_v30 = vmul.f32 %v1716_v52, %v6194_v27  ;;  %v2020_v34 = vmul.f32 %v5654_v10, %v1748_v13 }
 0x348   : > { %v1908_v0 = vmax.f32 %v1900_v63, 0.0  ;;  %v1988_v61 = vand.u32 2147483647, %v5692_v18  ;;  %v2044_v42 = vmul.f32 %v5618_v60, %v1748_v13  ;;  %v2052_v35 = vmul.f32 %v5660_v15, %v1780_v8 }
 0x349   : > { %v1940_v46 = vmax.f32 %v1932_v58, 0.0  ;;  %v1964_v7 = vsub.f32 1.0, %v1956_v51  ;;  %v2028_v49 = vsub.f32 %v2012_v30, %v2020_v34  ;;  %v2076_v50 = vmul.f32 %v5648_v48, %v1780_v8 }
 0x34a   : > { %v2084_v40 = vmul.f32 %v5663_v20, %v1812_v23  ;;  %v1996_v21 = vsub.f32 1.0, %v1988_v61  ;;  %v2060_v25 = vsub.f32 %v2044_v42, %v2052_v35  ;;  %v2108_v63 = vmul.f32 %v5654_v10, %v1812_v23 }
 0x34b   : > { %v2116_v52 = vmul.f32 %v5670_v32, %v1844_v28  ;;  %v1972_v3 = vmax.f32 %v1964_v7, 0.0  ;;  %v2036_v58 = vmul.f32 0.5, %v2028_v49  ;;  %v2140_v33 = vmul.f32 %v5660_v15, %v1844_v28  ;;  %v5711_v49 = vpop.permute.xlu1 %2898 }
 0x34c   : > { %v2092_v54 = vsub.f32 %v2076_v50, %v2084_v40  ;;  %v2004_v13 = vmax.f32 %v1996_v21, 0.0  ;;  %v2068_v4 = vmul.f32 0.5, %v2060_v25  ;;  %v2148_v51 = vmul.f32 %v5675_v43, %v1876_v11  ;;  %6198 = vst [vmem:[#allocation52_spill] sm:$0xff] %v5711_v49 }
 0x34d   : > { %v2124_v41 = vsub.f32 %v2108_v63, %v2116_v52  ;;  %v2172_v8 = vmul.f32 %v5663_v20, %v1876_v11  ;;  %v2180_v34 = vmul.f32 %v5679_v62, %v1908_v0  ;;  %v2204_v61 = vmul.f32 %v5670_v32, %v1908_v0 }
 0x34e   : > { %v2100_v30 = vmul.f32 0.5, %v2092_v54  ;;  %v2156_v42 = vsub.f32 %v2140_v33, %v2148_v51  ;;  %v2212_v35 = vmul.f32 %v5689_v53, %v1940_v46  ;;  %v2236_v7 = vmul.f32 %v5675_v43, %v1940_v46 }
 0x34f   : > { %v2132_v23 = vmul.f32 0.5, %v2124_v41  ;;  %v2188_v28 = vsub.f32 %v2172_v8, %v2180_v34  ;;  %v2244_v50 = vmul.f32 %v5692_v18, %v1972_v3  ;;  %v2268_v40 = vmul.f32 %v5679_v62, %v1972_v3 }
 0x350   : > { %v3323_v54 = vadd.f32 -11.0, %v6194_v27  ;;  %v2164_v11 = vmul.f32 0.5, %v2156_v42  ;;  %v2220_v21 = vsub.f32 %v2204_v61, %v2212_v35  ;;  %v2308_v25 = vmul.f32 %v2036_v58, %v6194_v27 }
 0x351   : > { %v2316_v41 = vmul.f32 %v5660_v15, %v2068_v4  ;;  %v2196_v33 = vmul.f32 0.5, %v2188_v28  ;;  %v2252_v0 = vsub.f32 %v2236_v7, %v2244_v50  ;;  %v2380_v46 = vmul.f32 %v5618_v60, %v2068_v4  ;;  %v6199_v50 = vld [vmem:[#allocation16_spill] sm:$0xff] }
 0x352   : > { %v2284_v63 = vmul.f32 %v3323_v54, %v2004_v13  ;;  %v2228_v52 = vmul.f32 0.5, %v2220_v21  ;;  %v2388_v8 = vmul.f32 %v5663_v20, %v2100_v30  ;;  %v2460_v34 = vmul.f32 %v5648_v48, %v2100_v30 }
 0x353   : > { %v2324_v51 = vsub.f32 %v2308_v25, %v2316_v41  ;;  %v2260_v3 = vmul.f32 0.5, %v2252_v0  ;;  %v2468_v42 = vmul.f32 %v5670_v32, %v2132_v23  ;;  %v2540_v61 = vmul.f32 %v5654_v10, %v2132_v23  ;;  %v6200_v0 = vld [vmem:[#allocation3_spill] sm:$0xff] }
 0x354   : > { %v2292_v49 = vsub.f32 %v2268_v40, %v2284_v63  ;;  %v2396_v58 = vsub.f32 %v2380_v46, %v2388_v8  ;;  %v2548_v35 = vmul.f32 %v5675_v43, %v2164_v11  ;;  %v2620_v13 = vmul.f32 %v5660_v15, %v2164_v11  ;;  %v5733_v63 = vpop.permute.xlu1 %2994 }
 0x355   : > { %v2332_v27 = vmul.f32 0.33333334, %v2324_v51  ;;  %v2476_v4 = vsub.f32 %v2460_v34, %v2468_v42  ;;  %v2628_v60 = vmul.f32 %v5679_v62, %v2196_v33  ;;  %v2700_v28 = vmul.f32 %v5663_v20, %v2196_v33  ;;  %v6201_v20 = vld [vmem:[#allocation57_spill] sm:$0xff] }
 0x356   : > { %v2300_v7 = vmul.f32 0.5, %v2292_v49  ;;  %v2404_v30 = vmul.f32 0.33333334, %v2396_v58  ;;  %v2556_v40 = vsub.f32 %v2540_v61, %v2548_v35  ;;  %v2708_v21 = vmul.f32 %v5689_v53, %v2228_v52  ;;  %v6203_v34 = vld [vmem:[#allocation9_spill] sm:$0xff]  ;;  %v6205_v35 = vld [vmem:[#allocation55_spill] sm:$0xff] }
 0x357   : > { %v2372_v48 = vmul.f32 %v6199_v50, %v2332_v27  ;;  %v2484_v25 = vmul.f32 0.33333334, %v2476_v4  ;;  %v2636_v10 = vsub.f32 %v2620_v13, %v2628_v60  ;;  %v2780_v23 = vmul.f32 %v5670_v32, %v2228_v52  ;;  %v6206_v13 = vld [vmem:[#allocation15_spill] sm:$0xff] }
 0x358   : > { %v2788_v41 = vmul.f32 %v5692_v18, %v2260_v3  ;;  %v2444_v15 = vmul.f32 %v6200_v0, %v2404_v30  ;;  %v2564_v49 = vmul.f32 0.33333334, %v2556_v40  ;;  %v2716_v11 = vsub.f32 %v2700_v28, %v2708_v21  ;;  %v6207_v60 = vld [vmem:[#allocation43_spill] sm:$0xff]  ;;  %v6208_v40 = vld [vmem:[#allocation26_spill] sm:$0xff] }
 0x359   : > { %v2860_v62 = vmul.f32 %v5675_v43, %v2260_v3  ;;  %v1668_v33 = vmul.f32 %v5686_v16, %v6201_v20  ;;  %v2644_v46 = vmul.f32 0.33333334, %v2636_v10  ;;  %v2868_v53 = vmul.f32 %v3323_v54, %v2300_v7  ;;  %v6204_v54 = vld [vmem:[#allocation2_spill] sm:$0xff] }
 0x35a   : > { %v2796_v51 = vsub.f32 %v2780_v23, %v2788_v41  ;;  %v6202_v8 = vsub.f32 %v5626_v9, %v5629_v36  ;;  %v2452_v52 = vadd.f32 %v2444_v15, %v2372_v48  ;;  %v2524_v42 = vmul.f32 %v6203_v34, %v2484_v25 }
 0x35b   : > { %v5747_v43 = vadd.f32 %v5683_v59, %v5651_v47  ;;  %v2724_v3 = vmul.f32 0.33333334, %v2716_v11  ;;  %v2876_v61 = vsub.f32 %v2860_v62, %v2868_v53  ;;  %v2604_v58 = vmul.f32 %v6204_v54, %v2564_v49  ;;  %v6209_v11 = vld [vmem:[#allocation29_spill] sm:$0xff] }
 0x35c   : > { %v5740_v32 = vmul.f32 0.33333334, %v6202_v8  ;;  %v2804_v16 = vmul.f32 0.33333334, %v2796_v51  ;;  %v2532_v27 = vadd.f32 %v2524_v42, %v2452_v52  ;;  %v5751_v9 = vadd.f32 -1.0, %v6205_v35  ;;  %v5778_v52 = vpop.permute.xlu1 %2950 }
 0x35d   : > { %v5754_v36 = vadd.f32 -2.0, %v6205_v35  ;;  %v2684_v7 = vmul.f32 %v6206_v13, %v2644_v46  ;;  %v2884_v4 = vmul.f32 0.33333334, %v2876_v61  ;;  %v2972_v28 = vmul.f32 %v6207_v60, %v1668_v33 }
 0x35e   : > { %v5759_v47 = vadd.f32 -3.0, %v6205_v35  ;;  %v2612_v59 = vadd.f32 %v2604_v58, %v2532_v27  ;;  %v1699_v50 = vand.u32 2147483647, %v5751_v9  ;;  %v5764_v30 = vadd.f32 -4.0, %v6205_v35 }
 0x35f   : > { %v1731_v48 = vand.u32 2147483647, %v5754_v36  ;;  %v2764_v21 = vmul.f32 %v6208_v40, %v2724_v3  ;;  %v2844_v25 = vmul.f32 %v5323_v55, %v2804_v16  ;;  %v5770_v23 = vadd.f32 -5.0, %v6205_v35 }
 0x360   : > { %v1763_v10 = vand.u32 2147483647, %v5759_v47  ;;  %v2692_v41 = vadd.f32 %v2684_v7, %v2612_v59  ;;  %v1707_v0 = vsub.f32 1.0, %v1699_v50  ;;  %v1795_v49 = vand.u32 2147483647, %v5764_v30 }
 0x361   : > { %v1739_v15 = vsub.f32 1.0, %v1731_v48  ;;  %v2924_v62 = vmul.f32 %v6209_v11, %v2884_v4  ;;  %v1827_v33 = vand.u32 2147483647, %v5770_v23  ;;  %v5776_v46 = vadd.f32 -6.0, %v6205_v35 }
 0x362   : > { %v1771_v20 = vsub.f32 1.0, %v1763_v10  ;;  %v2772_v51 = vadd.f32 %v2764_v21, %v2692_v41  ;;  %v1715_v55 = vmax.f32 %v1707_v0, 0.0  ;;  %v1803_v8 = vsub.f32 1.0, %v1795_v49 }
 0x363   : > { %v1747_v53 = vmax.f32 %v1739_v15, 0.0  ;;  %v1835_v42 = vsub.f32 1.0, %v1827_v33  ;;  %v1859_v3 = vand.u32 2147483647, %v5776_v46  ;;  %v5782_v16 = vadd.f32 -7.0, %v6205_v35 }
 0x364   : > { %v1779_v34 = vmax.f32 %v1771_v20, 0.0  ;;  %v2852_v61 = vadd.f32 %v2844_v25, %v2772_v51  ;;  %v1811_v27 = vmax.f32 %v1803_v8, 0.0  ;;  %v5785_v54 = vadd.f32 -8.0, %v6205_v35  ;;  %v5801_v20 = vpop.permute.xlu0 %2814 }
 0x365   : > { %v5788_v58 = vadd.f32 -9.0, %v6205_v35  ;;  %v1843_v13 = vmax.f32 %v1835_v42, 0.0  ;;  %v1867_v7 = vsub.f32 1.0, %v1859_v3  ;;  %v1891_v4 = vand.u32 2147483647, %v5782_v16 }
 0x366   : > { %v5792_v60 = vadd.f32 -10.0, %v6205_v35  ;;  %v2932_v59 = vadd.f32 %v2924_v62, %v2852_v61  ;;  %v1923_v50 = vand.u32 2147483647, %v5785_v54  ;;  %v2011_v40 = vmul.f32 %v1715_v55, %v6205_v35  ;;  %v5803_v62 = vpop.permute.xlu2 %2990 }
 0x367   : > { %v1955_v48 = vand.u32 2147483647, %v5788_v58  ;;  %v1875_v21 = vmax.f32 %v1867_v7, 0.0  ;;  %v1899_v25 = vsub.f32 1.0, %v1891_v4  ;;  %v2019_v41 = vmul.f32 %v5759_v47, %v1747_v53  ;;  %6210 = vst [vmem:[#allocation10_spill] sm:$0xff] %v5803_v62 }
 0x368   : > { %v1987_v10 = vand.u32 2147483647, %v5792_v60  ;;  %v3012_v0 = vmul.f32 %v5295_v56, %v2932_v59  ;;  %v1931_v15 = vsub.f32 1.0, %v1923_v50  ;;  %v2043_v11 = vmul.f32 %v5751_v9, %v1747_v53 }
 0x369   : > { %v1963_v49 = vsub.f32 1.0, %v1955_v48  ;;  %v1907_v33 = vmax.f32 %v1899_v25, 0.0  ;;  %v2027_v8 = vsub.f32 %v2011_v40, %v2019_v41  ;;  %v2051_v55 = vmul.f32 %v5764_v30, %v1779_v34 }
 0x36a   : > { %v1995_v51 = vsub.f32 1.0, %v1987_v10  ;;  %v3020_v42 = vadd.f32 %v3012_v0, %v2972_v28  ;;  %v1939_v3 = vmax.f32 %v1931_v15, 0.0  ;;  %v2075_v7 = vmul.f32 %v5754_v36, %v1779_v34  ;;  %v5812_v10 = vpop.permute.xlu1 %2806 }
 0x36b   : > { %v1971_v61 = vmax.f32 %v1963_v49, 0.0  ;;  %v2035_v56 = vmul.f32 0.5, %v2027_v8  ;;  %v2059_v59 = vsub.f32 %v2043_v11, %v2051_v55  ;;  %v2083_v50 = vmul.f32 %v5770_v23, %v1811_v27 }
 0x36c   : > { %v2003_v4 = vmax.f32 %v1995_v51, 0.0  ;;  %3040 = vmatpush.msra.mxu2 %v3020_v42  ;;  %v2107_v53 = vmul.f32 %v5759_v47, %v1811_v27  ;;  %v2115_v48 = vmul.f32 %v5776_v46, %v1843_v13  ;;  %v2139_v25 = vmul.f32 %v5764_v30, %v1843_v13 }
 0x36d   : > { %v2147_v40 = vmul.f32 %v5782_v16, %v1875_v21  ;;  %v2067_v28 = vmul.f32 0.5, %v2059_v59  ;;  %v2091_v41 = vsub.f32 %v2075_v7, %v2083_v50  ;;  %v2171_v34 = vmul.f32 %v5770_v23, %v1875_v21 }
 0x36e   : > { %v2179_v0 = vmul.f32 %v5785_v54, %v1907_v33  ;;  %v2123_v15 = vsub.f32 %v2107_v53, %v2115_v48  ;;  %v2203_v11 = vmul.f32 %v5776_v46, %v1907_v33  ;;  %v2211_v27 = vmul.f32 %v5788_v58, %v1939_v3 }
 0x36f   : > { %v2155_v49 = vsub.f32 %v2139_v25, %v2147_v40  ;;  %v2099_v51 = vmul.f32 0.5, %v2091_v41  ;;  %v2235_v13 = vmul.f32 %v5782_v16, %v1939_v3  ;;  %v2243_v55 = vmul.f32 %v5792_v60, %v1971_v61  ;;  %v5826_v41 = vpop.permute.xlu0 %2894 }
 0x370   : > { %v2187_v8 = vsub.f32 %v2171_v34, %v2179_v0  ;;  %v2131_v42 = vmul.f32 0.5, %v2123_v15  ;;  %v2219_v59 = vsub.f32 %v2203_v11, %v2211_v27  ;;  %v2267_v7 = vmul.f32 %v5785_v54, %v1971_v61  ;;  %v5828_v34 = vpop.permute.xlu2 %2890 }
 0x371   : > { %v2163_v18 = vmul.f32 0.5, %v2155_v49  ;;  %v2251_v50 = vsub.f32 %v2235_v13, %v2243_v55  ;;  %v3322_v53 = vadd.f32 -11.0, %v6205_v35  ;;  %v2307_v48 = vmul.f32 %v2035_v56, %v6205_v35 }
 0x372   : > { %v2195_v21 = vmul.f32 0.5, %v2187_v8  ;;  %v2227_v33 = vmul.f32 0.5, %v2219_v59  ;;  %v2315_v25 = vmul.f32 %v5764_v30, %v2067_v28  ;;  %v2379_v40 = vmul.f32 %v5751_v9, %v2067_v28 }
 0x373   : > { %v2387_v3 = vmul.f32 %v5770_v23, %v2099_v51  ;;  %v2259_v0 = vmul.f32 0.5, %v2251_v50  ;;  %v2283_v15 = vmul.f32 %v3322_v53, %v2003_v4  ;;  %v2459_v61 = vmul.f32 %v5754_v36, %v2099_v51 }
 0x374   : > { %v2467_v49 = vmul.f32 %v5776_v46, %v2131_v42  ;;  %v2323_v11 = vsub.f32 %v2307_v48, %v2315_v25  ;;  %v2539_v35 = vmul.f32 %v5759_v47, %v2131_v42  ;;  %v2547_v56 = vmul.f32 %v5782_v16, %v2163_v18  ;;  %v5838_v25 = vpop.permute.xlu1 %2986  ;;  %v6211_v47 = vld [vmem:[#allocation5_spill] sm:$0xff] }
 0x375   : > { %v2395_v27 = vsub.f32 %v2379_v40, %v2387_v3  ;;  %v2291_v8 = vsub.f32 %v2267_v7, %v2283_v15  ;;  %v2619_v28 = vmul.f32 %v5764_v30, %v2163_v18  ;;  %v2627_v13 = vmul.f32 %v5785_v54, %v2195_v21  ;;  %v6212_v7 = vld [vmem:[#allocation17_spill] sm:$0xff]  ;;  %v6214_v15 = vld [vmem:[#allocation7_spill] sm:$0xff] }
 0x376   : > { %v2475_v9 = vsub.f32 %v2459_v61, %v2467_v49  ;;  %v2331_v55 = vmul.f32 0.33333334, %v2323_v11  ;;  %v2555_v50 = vsub.f32 %v2539_v35, %v2547_v56  ;;  %v2699_v4 = vmul.f32 %v5770_v23, %v2195_v21  ;;  %v6213_v30 = vld [vmem:[#allocation53_spill] sm:$0xff] }
 0x377   : > { %v2403_v59 = vmul.f32 0.33333334, %v2395_v27  ;;  %v2299_v36 = vmul.f32 0.5, %v2291_v8  ;;  %v2635_v62 = vsub.f32 %v2619_v28, %v2627_v13  ;;  %v2707_v48 = vmul.f32 %v5788_v58, %v2227_v33  ;;  %v3022_v58 = vld [vmem:[%s5947_s8] sm:$0x7]  ;;  %v6215_v8 = vld [vmem:[#allocation21_spill] sm:$0xff] }
 0x378   : > { %v2483_v51 = vmul.f32 0.33333334, %v2475_v9  ;;  %v2371_v42 = vmul.f32 %v6211_v47, %v2331_v55  ;;  %v2563_v3 = vmul.f32 0.33333334, %v2555_v50  ;;  %v2779_v18 = vmul.f32 %v5776_v46, %v2227_v33  ;;  %3025 = vperm.xlu1 %3479, %v3022_v58   ;;  %v5857_v55 = vpop.permute.xlu0 %2946  ;;  %v6220_v47 = vld [vmem:[#allocation54_spill] sm:$0xff]  ;;  %v6228_v58 = vld [vmem:[#allocation8_spill] sm:$0xff] }
 0x379   : > { %v2443_v40 = vmul.f32 %v6212_v7, %v2403_v59  ;;  %v2517_v54 = vmul.f32 %v6213_v30, %v5665_v26  ;;  %v2715_v23 = vsub.f32 %v2699_v4, %v2707_v48  ;;  %v2787_v21 = vmul.f32 %v5792_v60, %v2259_v0  ;;  %v6219_v4 = vld [vmem:[#allocation31_spill] sm:$0xff]  ;;  %v6224_v30 = vld [vmem:[#allocation50_spill] sm:$0xff] }
 0x37a   : > { %v2523_v61 = vmul.f32 %v6214_v15, %v2483_v51  ;;  %v2643_v11 = vmul.f32 0.33333334, %v2635_v62  ;;  %v2859_v27 = vmul.f32 %v5782_v16, %v2259_v0  ;;  %v2867_v35 = vmul.f32 %v3322_v53, %v2299_v36  ;;  %v2887_v62 = vpop.permute.xlu2 %2886  ;;  %v6216_v16 = vld [vmem:[#allocation6_spill] sm:$0xff]  ;;  %v6218_v0 = vld [vmem:[#allocation65_spill] sm:$0xff]  ;;  %v6225_v15 = vld [vmem:[#allocation24_spill] sm:$0xff] }
 0x37b   : > { %v2451_v49 = vadd.f32 %v2443_v40, %v2371_v42  ;;  %v2525_v46 = vadd.f32 %v2517_v54, %v5747_v43  ;;  %v2773_v26 = vmul.f32 %v5556_v31, %v5612_v12  ;;  %v2781_v33 = vmul.f32 %v5424_v39, %v5486_v6 }
 0x37c   : > { %v2795_v56 = vsub.f32 %v2779_v18, %v2787_v21  ;;  %v2603_v9 = vmul.f32 %v6215_v8, %v2563_v3  ;;  %v2723_v28 = vmul.f32 0.33333334, %v2715_v23  ;;  %v2875_v13 = vsub.f32 %v2859_v27, %v2867_v35  ;;  %v6227_v21 = vld [vmem:[#allocation12_spill] sm:$0xff] }
 0x37d   : > { %v2531_v60 = vadd.f32 %v2523_v61, %v2451_v49  ;;  %v2679_v53 = vmul.f32 %v6216_v16, %v5610_v57  ;;  %v2791_v43 = vsub.f32 %v5602_v2, %v5605_v19  ;;  %v6217_v31 = vsub.f32 %v5634_v17, %v5638_v24  ;;  %v6226_v61 = vld [vmem:[#allocation52_spill] sm:$0xff]  ;;  %v6234_v16 = vld [vmem:[#allocation77_spill] sm:$0xff] }
 0x37e   : > { %v2709_v39 = vsub.f32 %v5641_v22, %v5645_v44  ;;  %v2597_v59 = vmul.f32 %v6218_v0, %v5740_v32  ;;  %v2683_v36 = vmul.f32 %v6219_v4, %v2643_v11  ;;  %v2803_v51 = vmul.f32 0.33333334, %v2795_v56  ;;  %v6221_v32 = vld [vmem:[#allocation20_spill] sm:$0xff]  ;;  %v6230_v11 = vld [vmem:[#allocation38_spill] sm:$0xff] }
 0x37f   : > { %v2637_v12 = vmul.f32 0.33333334, %v6217_v31  ;;  %v2611_v50 = vadd.f32 %v2603_v9, %v2531_v60  ;;  %v2853_v57 = vmul.f32 %v5393_v5, %v5486_v6  ;;  %v2861_v2 = vmul.f32 %v5464_v29, %v5590_v1  ;;  %v2943_v5 = vpop.permute.xlu1 %2942  ;;  %v6222_v6 = vld [vmem:[#allocation74_spill] sm:$0xff]  ;;  %v6223_v1 = vld [vmem:[#allocation61_spill] sm:$0xff] }
 0x380   : > { %v2687_v19 = vadd.f32 %v2679_v53, %v5631_v37  ;;  %v2789_v17 = vsub.f32 %v2773_v26, %v2781_v33  ;;  %v2605_v24 = vadd.f32 %v2597_v59, %v2525_v46  ;;  %v2763_v22 = vmul.f32 %v6220_v47, %v2723_v28  ;;  %v6231_v26 = vld [vmem:[#allocation35_spill] sm:$0xff]  ;;  %v6232_v56 = vld [vmem:[#allocation18_spill] sm:$0xff] }
 0x381   : > { %v2691_v48 = vadd.f32 %v2683_v36, %v2611_v50  ;;  %v2883_v44 = vmul.f32 0.33333334, %v2875_v13  ;;  %v2759_v42 = vmul.f32 %v6221_v32, %v5620_v14  ;;  %v2799_v7 = vmul.f32 0.33333334, %v2791_v43  ;;  %v6233_v60 = vld [vmem:[#allocation22_spill] sm:$0xff]  ;;  %v6236_v59 = vld [vmem:[#allocation59_spill] sm:$0xff] }
 0x382   : > { %v2871_v40 = vsub.f32 %v5615_v38, %v5623_v45  ;;  %v2717_v3 = vmul.f32 0.33333334, %v2709_v39  ;;  %v2677_v18 = vmul.f32 %v6222_v6, %v2637_v12  ;;  %v2843_v37 = vmul.f32 %v6223_v1, %v2803_v51  ;;  %v2939_v39 = vpop.permute.xlu0 %2938  ;;  %v6235_v0 = vld [vmem:[#allocation30_spill] sm:$0xff]  ;;  %v6237_v36 = vld [vmem:[#allocation27_spill] sm:$0xff]  ;;  %v6240_v32 = vld [vmem:[#allocation44_spill] sm:$0xff] }
 0x383   : > { %v2771_v29 = vadd.f32 %v2763_v22, %v2691_v48  ;;  %v1647_v54 = vmul.f32 0.5, %v6224_v30  ;;  %v2920_v23 = vmul.f32 %v6226_v61, %v6225_v15  ;;  %v6229_v49 = vsub.f32 %v6227_v21, %v6228_v58  ;;  %v6239_v48 = vld [vmem:[#allocation14_spill] sm:$0xff]  ;;  %v6242_v6 = vld [vmem:[#allocation39_spill] sm:$0xff] }
 0x384   : > { %v1657_v27 = vadd.f32 0.5, %v6230_v11  ;;  %v2767_v35 = vadd.f32 %v2759_v42, %v2687_v19  ;;  %v2685_v38 = vadd.f32 %v2677_v18, %v2605_v24  ;;  %v2797_v45 = vmul.f32 0.33333334, %v2789_v17  ;;  %v2983_v19 = vpop.permute.xlu2 %2982 }
 0x385   : > { %v2878_v14 = vmul.f32 0.33333334, %v6229_v49  ;;  %v2851_v46 = vadd.f32 %v2843_v37, %v2771_v29  ;;  %v2923_v33 = vmul.f32 %v6231_v26, %v2883_v44  ;;  %v2930_v8 = vadd.f32 %v6233_v60, %v6232_v56  ;;  %v6244_v29 = vld [vmem:[#allocation49_spill] sm:$0xff]  ;;  %v6245_v37 = vld [vmem:[#allocation10_spill] sm:$0xff]  ;;  %v6248_v49 = vld [vmem:[#allocation36_spill] sm:$0xff] }
 0x386   : > { %v2869_v9 = vsub.f32 %v2853_v57, %v2861_v2  ;;  %v2839_v28 = vmul.f32 %v5801_v20, %v2799_v7  ;;  %v2879_v13 = vmul.f32 0.33333334, %v2871_v40  ;;  %v2757_v53 = vmul.f32 %v6234_v16, %v2717_v3  ;;  %v6238_v2 = vld [vmem:[#allocation58_spill] sm:$0xff] }
 0x387   : > { %v2837_v43 = vmul.f32 %v5812_v10, %v2797_v45  ;;  %v2931_v31 = vadd.f32 %v2923_v33, %v2851_v46  ;;  %v1655_v12 = vadd.f32 0.5, %v1647_v54  ;;  %v2929_v50 = vadd.f32 %v6236_v59, %v6235_v0  ;;  %v2979_v61 = vpop.permute.xlu1 %2978  ;;  %v6249_v56 = vld [vmem:[#allocation34_spill] sm:$0xff] }
 0x388   : > { %v2918_v4 = vmul.f32 %v5828_v34, %v2878_v14  ;;  %v1665_v51 = vmul.f32 %v1657_v27, %v6237_v36  ;;  %v2847_v17 = vadd.f32 %v2839_v28, %v2767_v35  ;;  %v3010_v57 = vmul.f32 %v5733_v63, %v2930_v8  ;;  %v6241_v34 = vld [vmem:[#allocation25_spill] sm:$0xff]  ;;  %v3021_v28 = vld [vmem:[%s5946_s7] sm:$0x7] }
 0x389   : > { %v2765_v20 = vadd.f32 %v2757_v53, %v2685_v38  ;;  %v3011_v24 = vmul.f32 %v6238_v2, %v2931_v31  ;;  %v2928_v47 = vadd.f32 %v2920_v23, %v6239_v48  ;;  %v2877_v10 = vmul.f32 0.33333334, %v2869_v9  ;;  %v6243_v63 = vld [vmem:[#allocation33_spill] sm:$0xff]  ;;  %v6247_v23 = vld [vmem:[#allocation71_spill] sm:$0xff] }
 0x38a   : > { %v2969_v22 = vmul.f32 %v5778_v52, %v1665_v51  ;;  %v2919_v44 = vmul.f32 %v5826_v41, %v2879_v13  ;;  %v1645_v42 = vmul.f32 0.5, %v6240_v32  ;;  %v1663_v18 = vmul.f32 %v1655_v12, %v6242_v6  ;;  %v6246_v52 = vld [vmem:[#allocation64_spill] sm:$0xff]  ;;  %v2975_v46 = vpop.permute.xlu0 %2974 }
 0x38b   : > { %v2845_v7 = vadd.f32 %v2837_v43, %v2765_v20  ;;  %v3019_v40 = vadd.f32 %v3011_v24, %v6241_v34  ;;  %v3008_v3 = vmul.f32 %v5838_v25, %v2928_v47  ;;  %v1662_v1 = vmul.f32 %v6244_v29, %v6243_v63 }
 0x38c   : > { %v3009_v30 = vmul.f32 %v6245_v37, %v2929_v50  ;;  %v2917_v54 = vmul.f32 %v2887_v62, %v2877_v10  ;;  %v2927_v15 = vadd.f32 %v2919_v44, %v2847_v17  ;;  %v3018_v41 = vadd.f32 %v3010_v57, %v6246_v52  ;;  %v2935_v33 = vpop.permute.xlu2 %2934 }
 0x38d   : > { %3041 = vmatpush.msra.mxu2 %v3019_v40  ;;  %v2968_v21 = vmul.f32 %v5857_v55, %v6247_v23  ;;  %v2967_v58 = vmul.f32 %v2943_v5, %v1663_v18  ;;  %v2926_v14 = vadd.f32 %v2918_v4, %v6248_v49  ;;  %v1653_v11 = vadd.f32 0.5, %v1645_v42 }
 0x38e   : > { %v3007_v25 = vmul.f32 %v2983_v19, %v2927_v15  ;;  %v2925_v27 = vadd.f32 %v2917_v54, %v2845_v7  ;;  %v3017_v35 = vadd.f32 %v3009_v30, %v2969_v22  ;;  %v2966_v62 = vmul.f32 %v2939_v39, %v1662_v1 }
 0x38f   : > { %3042 = vmatpush.msra.mxu2 %v3018_v41  ;;  %v3016_v38 = vadd.f32 %v3008_v3, %v2968_v21  ;;  %v3006_v45 = vmul.f32 %v2979_v61, %v2926_v14  ;;  %v1661_v60 = vmul.f32 %v1653_v11, %v6249_v56 }
 0x390   : > { %v3015_v26 = vadd.f32 %v3007_v25, %v2967_v58  ;;  %v3005_v8 = vmul.f32 %v2975_v46, %v2925_v27 }
 0x391   : > { %3043 = vmatpush.msra.mxu2 %v3017_v35  ;;  %v3014_v55 = vadd.f32 %v3006_v45, %v2966_v62  ;;  %v2965_v5 = vmul.f32 %v2935_v33, %v1661_v60 }
 0x393   : > { %3044 = vmatpush.msra.mxu2 %v3016_v38  ;;  %v3013_v9 = vadd.f32 %v3005_v8, %v2965_v5 }
 0x395   : > { %3045 = vmatpush.msra.mxu2 %v3015_v26 }
 0x397   : > { %3046 = vmatpush.msra.mxu2 %v3014_v55 }
 0x399   : > { %3047 = vmatpush.msra.mxu2 %v3013_v9 }
 0x39a   : > { %3324 = vmatmul.msk.f32.vlgmr.msra.gmra.mxu2 %vm3028_vm2, %v3021_v28 }
 0x3ea   : > { %v3026_v13 = vpop.permute.xlu1 %3025 }
 0x41d   : > { %v3049_v16 = vpop.f32.mrf.mxu2 }
 0x41e   : > { %v3050_v53 = vadd.f32 %v3049_v16, %v3026_v13 }
 0x420   : > { %3052 = vst [vmem:[%s360_s25] sm:$0x7] %v3050_v53 }
 0x421 PF: > { %s19_s13 = sadd.s32 1, %s3555_s13   ;;  %s6250_s30 = smov %s3547_s11 }
 0x422   : > { %p16_p7 = scmp.ge.s32.totalorder %s19_s13, 6   ;;  %s6251_s10 = smov %s3551_s12 }
 0x423   : > { %s6252_s11 = smov %s6255_s14  ;;  %s6253_s12 = smov %s6259_s15 }
 0x424   :  { %18 = sbr.rel (!%p16_p7) target bundleno = 3 (0x3), region = 86 }

</bundles_post_ra>
